<compile_context>
chip_gen: v5e
topology: v5e:2x2
jax: 0.10.0
libtpu: 0.0.40
codegen_flags: <defaults>
</compile_context>

<pallas_src>
import functools
import math

import jax
import jax.numpy as jnp
import numpy as np
from jax.experimental import pallas as pl
from jax.experimental.pallas import tpu as pltpu


# ----------------------------------------------------------------------------
# Pallas kernel: fused conv3x3(+bias) -> bicubic x4 upsample, per batch element
# ----------------------------------------------------------------------------
def _init_block_kernel(xp_ref, wk_ref, b_ref, u_ref, o_ref, *, wp, kw):
    # xp_ref: (Cpad, Sp)   zero-padded input, channel-major, flattened spatial
    # wk_ref: (KH*KW, Cout, Cpad)   conv weight per tap
    # b_ref : (Cout, 1)             conv bias
    # u_ref : (S, OH*OW)            fused crop + bicubic-upsample matrix, S = H*Wp
    # o_ref : (Cout, OH*OW)         lane-dense output (4096 lanes)
    cout, _ = o_ref.shape
    s = u_ref.shape[0]
    taps = wk_ref.shape[0]

    acc = jnp.zeros((cout, s), jnp.float32)
    for k in range(taps):                         # static unroll over the 9 taps
        ky, kx = divmod(k, kw)
        off = ky * wp + kx
        slab = xp_ref[:, off:off + s]             # lane-shifted view (Cpad, S)
        acc = acc + jnp.dot(wk_ref[k], slab, preferred_element_type=jnp.float32)
    conv = acc + b_ref[...]                       # bias, broadcast over lanes

    # fused "crop padded-width columns + separable bicubic x4" as one MXU matmul
    o_ref[...] = jnp.dot(conv, u_ref[...],
                         preferred_element_type=jnp.float32).astype(o_ref.dtype)


# ----------------------------------------------------------------------------
# PyTorch-style bicubic weights (a=-0.75, align_corners=False, clamped access)
# ----------------------------------------------------------------------------
def _bicubic_weight_matrix(in_size, out_size, scale, a=-0.75):
    """Return (out_size, in_size) M so that  out = M @ in  along one axis."""
    def cubic1(x):  # |x| <= 1
        return ((a + 2.0) * x - (a + 3.0)) * x * x + 1.0

    def cubic2(x):  # 1 < |x| < 2
        return ((a * x - 5.0 * a) * x + 8.0 * a) * x - 4.0 * a

    m = np.zeros((out_size, in_size), dtype=np.float64)
    for o in range(out_size):
        src = scale * (o + 0.5) - 0.5
        f = math.floor(src)
        t = src - f
        coeffs = (cubic2(t + 1.0), cubic1(t), cubic1(1.0 - t), cubic2(2.0 - t))
        for k in range(4):
            idx = min(max(f - 1 + k, 0), in_size - 1)   # border-replicate clamp
            m[o, idx] += coeffs[k]
    return m


# ----------------------------------------------------------------------------
# Wrapper: layout prep (host, trace-time constants) + single pallas_call
# ----------------------------------------------------------------------------
def init_block_forward(x, w, b, *, scale_factor=4, cin_pad=8):
    """x: (N, Cin, H, W), w: (Cout, Cin, 3, 3), b: (Cout,) -> (N, Cout, 4H, 4W)."""
    n, cin, h, wd = x.shape
    cout, _, kh, kw = w.shape
    hp, wp = h + kh - 1, wd + kw - 1          # zero-padded spatial extent
    oh, ow = scale_factor * h, scale_factor * wd
    s = h * wp                                # conv on the stride-preserving grid
    sp = hp * wp + (kw - 1)                   # flat length needed by the last tap

    # zero-pad spatially ('same' conv), pad channels to a sublane-friendly 8,
    # flatten spatial, append the few zeros the last shifted view reaches into.
    cpad = max(cin_pad, cin)
    xp = jnp.pad(x, ((0, 0), (0, cpad - cin), (1, 1), (1, 1)))
    xp = xp.reshape(n, cpad, hp * wp)
    xp = jnp.pad(xp, ((0, 0), (0, 0), (0, sp - hp * wp)))

    # conv weights per tap as (taps, Cout, Cpad); extra channels are zeros
    wk = jnp.transpose(w, (2, 3, 0, 1)).reshape(kh * kw, cout, cin)
    wk = jnp.pad(wk, ((0, 0), (0, 0), (0, cpad - cin)))
    b2 = b.reshape(cout, 1).astype(jnp.float32)

    # U[(r*Wp + c), (oh*OW + ow)] = A[oh, r] * B[ow, c]   (zero on padded cols)
    a_h = _bicubic_weight_matrix(h, oh, 1.0 / scale_factor)
    b_w = _bicubic_weight_matrix(wd, ow, 1.0 / scale_factor)
    b_wp = np.zeros((ow, wp), dtype=np.float64)
    b_wp[:, :wd] = b_w
    u = np.einsum('or,pc->rcop', a_h, b_wp).reshape(s, oh * ow)
    u = jnp.asarray(u, dtype=jnp.float32)

    kern = functools.partial(_init_block_kernel, wp=wp, kw=kw)
    out = pl.pallas_call(
        kern,
        out_shape=jax.ShapeDtypeStruct((n, cout, oh * ow), x.dtype),
        grid=(n,),
        in_specs=[
            pl.BlockSpec((None, cpad, sp), lambda i: (i, 0, 0)),
            pl.BlockSpec((kh * kw, cout, cpad), lambda i: (0, 0, 0)),
            pl.BlockSpec((cout, 1), lambda i: (0, 0)),
            pl.BlockSpec((s, oh * ow), lambda i: (0, 0)),
        ],
        out_specs=pl.BlockSpec((None, cout, oh * ow), lambda i: (i, 0, 0)),
        compiler_params=pltpu.CompilerParams(
            dimension_semantics=("parallel",),
            vmem_limit_bytes=32 * 1024 * 1024),
    )(xp, wk, b2, u)
    return out.reshape(n, cout, oh, ow)


# ----------------------------------------------------------------------------
# Pure-JAX reference (same math, no Pallas) for a sanity check
# ----------------------------------------------------------------------------
def init_block_reference(x, w, b, *, scale_factor=4):
    n, cin, h, wd = x.shape
    cout = w.shape[0]
    oh, ow = scale_factor * h, scale_factor * wd
    hi = jax.lax.Precision.HIGHEST
    xpad = jnp.pad(x, ((0, 0), (0, 0), (1, 1), (1, 1)))
    cols = jnp.stack([xpad[:, :, ky:ky + h, kx:kx + wd]
                      for ky in range(3) for kx in range(3)], axis=2)  # (N,Cin,9,H,W)
    conv = jnp.einsum('nckhw,ock->nohw', cols, w.reshape(cout, cin, 9),
                      precision=hi) + b[None, :, None, None]
    a_h = jnp.asarray(_bicubic_weight_matrix(h, oh, 1.0 / scale_factor), jnp.float32)
    b_w = jnp.asarray(_bicubic_weight_matrix(wd, ow, 1.0 / scale_factor), jnp.float32)
    return jnp.einsum('nchw,Oh,Pw->ncOP', conv, a_h, b_w, precision=hi)


if __name__ == "__main__":
    key = jax.random.PRNGKey(0)
    k_x, k_w, k_b = jax.random.split(key, 3)

    # InitBlock defaults: in_c=3, out_c=16; small spatial 16x16, batch 2
    N, CIN, H, W = 2, 3, 16, 16
    COUT, SCALE = 16, 4

    x = jax.random.normal(k_x, (N, CIN, H, W), jnp.float32)          # NCHW like PyTorch
    w = jax.random.normal(k_w, (COUT, CIN, 3, 3), jnp.float32) * 0.1  # Conv2d weight
    b = jax.random.normal(k_b, (COUT,), jnp.float32) * 0.1            # Conv2d bias

    out = jax.jit(init_block_forward)(x, w, b)
    jax.block_until_ready(out)

    assert out.shape == (N, COUT, SCALE * H, SCALE * W)
    assert bool(jnp.all(jnp.isfinite(out)))

    ref = init_block_reference(x, w, b)
    err = float(jnp.max(jnp.abs(out - ref)))
    assert err < 5e-2, f"max|out - ref| = {err}"

    print("KERNEL_OK")
</pallas_src>

<mosaic_0001>
module attributes {stable_mosaic.version = 11 : i64} {
  func.func @_init_block_kernel(%arg0: i32, %arg1: memref<1x8x326xf32, #tpu.memory_space<vmem>>, %arg2: memref<9x16x8xf32, #tpu.memory_space<vmem>>, %arg3: memref<16x1xf32, #tpu.memory_space<vmem>>, %arg4: memref<288x4096xf32, #tpu.memory_space<vmem>>, %arg5: memref<1x16x4096xf32, #tpu.memory_space<vmem>>) attributes {dimension_semantics = [#tpu.dimension_semantics<parallel>], iteration_bounds = array<i64: 2>, scalar_prefetch = 0 : i64, scratch_operands = 0 : i64, tpu.core_type = #tpu.core_type<tc>, window_params = [{transform_indices = @transform_0, window_bounds = array<i64: 1, 8, 326>}, {pipeline_mode = #tpu.pipeline_mode<synchronous>, transform_indices = @transform_1, window_bounds = array<i64: 9, 16, 8>}, {pipeline_mode = #tpu.pipeline_mode<synchronous>, transform_indices = @transform_2, window_bounds = array<i64: 16, 1>}, {pipeline_mode = #tpu.pipeline_mode<synchronous>, transform_indices = @transform_3, window_bounds = array<i64: 288, 4096>}, {transform_indices = @transform_4, window_bounds = array<i64: 1, 16, 4096>}]} {
    %cst = arith.constant 0.000000e+00 : f32
    %0 = vector.broadcast %cst : f32 to vector<16x288xf32>
    %c0 = arith.constant 0 : index
    %c0_0 = arith.constant 0 : index
    %c0_1 = arith.constant 0 : index
    %1 = vector.load %arg1[%c0, %c0_0, %c0_1] : memref<1x8x326xf32, #tpu.memory_space<vmem>>, vector<1x8x288xf32>
    %2 = vector.shape_cast %1 : vector<1x8x288xf32> to vector<8x288xf32>
    %c0_2 = arith.constant 0 : index
    %c0_3 = arith.constant 0 : index
    %c0_4 = arith.constant 0 : index
    %3 = vector.load %arg2[%c0_2, %c0_3, %c0_4] : memref<9x16x8xf32, #tpu.memory_space<vmem>>, vector<1x16x8xf32>
    %4 = vector.shape_cast %3 : vector<1x16x8xf32> to vector<16x8xf32>
    %cst_5 = arith.constant dense<0.000000e+00> : vector<16x288xf32>
    %5 = tpu.matmul %4, %2, %cst_5 {dimension_numbers = #tpu.dot_dimension_numbers<[1], [0], [0], [1], [0, 0, 1, 1], [], []>} : vector<16x8xf32>, vector<8x288xf32>, vector<16x288xf32> -> vector<16x288xf32>
    %6 = arith.addf %0, %5 : vector<16x288xf32>
    %c0_6 = arith.constant 0 : index
    %c0_7 = arith.constant 0 : index
    %c1 = arith.constant 1 : index
    %7 = vector.load %arg1[%c0_6, %c0_7, %c1] : memref<1x8x326xf32, #tpu.memory_space<vmem>>, vector<1x8x288xf32>
    %8 = vector.shape_cast %7 : vector<1x8x288xf32> to vector<8x288xf32>
    %c1_8 = arith.constant 1 : index
    %c0_9 = arith.constant 0 : index
    %c0_10 = arith.constant 0 : index
    %9 = vector.load %arg2[%c1_8, %c0_9, %c0_10] : memref<9x16x8xf32, #tpu.memory_space<vmem>>, vector<1x16x8xf32>
    %10 = vector.shape_cast %9 : vector<1x16x8xf32> to vector<16x8xf32>
    %cst_11 = arith.constant dense<0.000000e+00> : vector<16x288xf32>
    %11 = tpu.matmul %10, %8, %cst_11 {dimension_numbers = #tpu.dot_dimension_numbers<[1], [0], [0], [1], [0, 0, 1, 1], [], []>} : vector<16x8xf32>, vector<8x288xf32>, vector<16x288xf32> -> vector<16x288xf32>
    %12 = arith.addf %6, %11 : vector<16x288xf32>
    %c0_12 = arith.constant 0 : index
    %c0_13 = arith.constant 0 : index
    %c2 = arith.constant 2 : index
    %13 = vector.load %arg1[%c0_12, %c0_13, %c2] : memref<1x8x326xf32, #tpu.memory_space<vmem>>, vector<1x8x288xf32>
    %14 = vector.shape_cast %13 : vector<1x8x288xf32> to vector<8x288xf32>
    %c2_14 = arith.constant 2 : index
    %c0_15 = arith.constant 0 : index
    %c0_16 = arith.constant 0 : index
    %15 = vector.load %arg2[%c2_14, %c0_15, %c0_16] : memref<9x16x8xf32, #tpu.memory_space<vmem>>, vector<1x16x8xf32>
    %16 = vector.shape_cast %15 : vector<1x16x8xf32> to vector<16x8xf32>
    %cst_17 = arith.constant dense<0.000000e+00> : vector<16x288xf32>
    %17 = tpu.matmul %16, %14, %cst_17 {dimension_numbers = #tpu.dot_dimension_numbers<[1], [0], [0], [1], [0, 0, 1, 1], [], []>} : vector<16x8xf32>, vector<8x288xf32>, vector<16x288xf32> -> vector<16x288xf32>
    %18 = arith.addf %12, %17 : vector<16x288xf32>
    %c0_18 = arith.constant 0 : index
    %c0_19 = arith.constant 0 : index
    %c18 = arith.constant 18 : index
    %19 = vector.load %arg1[%c0_18, %c0_19, %c18] : memref<1x8x326xf32, #tpu.memory_space<vmem>>, vector<1x8x288xf32>
    %20 = vector.shape_cast %19 : vector<1x8x288xf32> to vector<8x288xf32>
    %c3 = arith.constant 3 : index
    %c0_20 = arith.constant 0 : index
    %c0_21 = arith.constant 0 : index
    %21 = vector.load %arg2[%c3, %c0_20, %c0_21] : memref<9x16x8xf32, #tpu.memory_space<vmem>>, vector<1x16x8xf32>
    %22 = vector.shape_cast %21 : vector<1x16x8xf32> to vector<16x8xf32>
    %cst_22 = arith.constant dense<0.000000e+00> : vector<16x288xf32>
    %23 = tpu.matmul %22, %20, %cst_22 {dimension_numbers = #tpu.dot_dimension_numbers<[1], [0], [0], [1], [0, 0, 1, 1], [], []>} : vector<16x8xf32>, vector<8x288xf32>, vector<16x288xf32> -> vector<16x288xf32>
    %24 = arith.addf %18, %23 : vector<16x288xf32>
    %c0_23 = arith.constant 0 : index
    %c0_24 = arith.constant 0 : index
    %c19 = arith.constant 19 : index
    %25 = vector.load %arg1[%c0_23, %c0_24, %c19] : memref<1x8x326xf32, #tpu.memory_space<vmem>>, vector<1x8x288xf32>
    %26 = vector.shape_cast %25 : vector<1x8x288xf32> to vector<8x288xf32>
    %c4 = arith.constant 4 : index
    %c0_25 = arith.constant 0 : index
    %c0_26 = arith.constant 0 : index
    %27 = vector.load %arg2[%c4, %c0_25, %c0_26] : memref<9x16x8xf32, #tpu.memory_space<vmem>>, vector<1x16x8xf32>
    %28 = vector.shape_cast %27 : vector<1x16x8xf32> to vector<16x8xf32>
    %cst_27 = arith.constant dense<0.000000e+00> : vector<16x288xf32>
    %29 = tpu.matmul %28, %26, %cst_27 {dimension_numbers = #tpu.dot_dimension_numbers<[1], [0], [0], [1], [0, 0, 1, 1], [], []>} : vector<16x8xf32>, vector<8x288xf32>, vector<16x288xf32> -> vector<16x288xf32>
    %30 = arith.addf %24, %29 : vector<16x288xf32>
    %c0_28 = arith.constant 0 : index
    %c0_29 = arith.constant 0 : index
    %c20 = arith.constant 20 : index
    %31 = vector.load %arg1[%c0_28, %c0_29, %c20] : memref<1x8x326xf32, #tpu.memory_space<vmem>>, vector<1x8x288xf32>
    %32 = vector.shape_cast %31 : vector<1x8x288xf32> to vector<8x288xf32>
    %c5 = arith.constant 5 : index
    %c0_30 = arith.constant 0 : index
    %c0_31 = arith.constant 0 : index
    %33 = vector.load %arg2[%c5, %c0_30, %c0_31] : memref<9x16x8xf32, #tpu.memory_space<vmem>>, vector<1x16x8xf32>
    %34 = vector.shape_cast %33 : vector<1x16x8xf32> to vector<16x8xf32>
    %cst_32 = arith.constant dense<0.000000e+00> : vector<16x288xf32>
    %35 = tpu.matmul %34, %32, %cst_32 {dimension_numbers = #tpu.dot_dimension_numbers<[1], [0], [0], [1], [0, 0, 1, 1], [], []>} : vector<16x8xf32>, vector<8x288xf32>, vector<16x288xf32> -> vector<16x288xf32>
    %36 = arith.addf %30, %35 : vector<16x288xf32>
    %c0_33 = arith.constant 0 : index
    %c0_34 = arith.constant 0 : index
    %c36 = arith.constant 36 : index
    %37 = vector.load %arg1[%c0_33, %c0_34, %c36] : memref<1x8x326xf32, #tpu.memory_space<vmem>>, vector<1x8x288xf32>
    %38 = vector.shape_cast %37 : vector<1x8x288xf32> to vector<8x288xf32>
    %c6 = arith.constant 6 : index
    %c0_35 = arith.constant 0 : index
    %c0_36 = arith.constant 0 : index
    %39 = vector.load %arg2[%c6, %c0_35, %c0_36] : memref<9x16x8xf32, #tpu.memory_space<vmem>>, vector<1x16x8xf32>
    %40 = vector.shape_cast %39 : vector<1x16x8xf32> to vector<16x8xf32>
    %cst_37 = arith.constant dense<0.000000e+00> : vector<16x288xf32>
    %41 = tpu.matmul %40, %38, %cst_37 {dimension_numbers = #tpu.dot_dimension_numbers<[1], [0], [0], [1], [0, 0, 1, 1], [], []>} : vector<16x8xf32>, vector<8x288xf32>, vector<16x288xf32> -> vector<16x288xf32>
    %42 = arith.addf %36, %41 : vector<16x288xf32>
    %c0_38 = arith.constant 0 : index
    %c0_39 = arith.constant 0 : index
    %c37 = arith.constant 37 : index
    %43 = vector.load %arg1[%c0_38, %c0_39, %c37] : memref<1x8x326xf32, #tpu.memory_space<vmem>>, vector<1x8x288xf32>
    %44 = vector.shape_cast %43 : vector<1x8x288xf32> to vector<8x288xf32>
    %c7 = arith.constant 7 : index
    %c0_40 = arith.constant 0 : index
    %c0_41 = arith.constant 0 : index
    %45 = vector.load %arg2[%c7, %c0_40, %c0_41] : memref<9x16x8xf32, #tpu.memory_space<vmem>>, vector<1x16x8xf32>
    %46 = vector.shape_cast %45 : vector<1x16x8xf32> to vector<16x8xf32>
    %cst_42 = arith.constant dense<0.000000e+00> : vector<16x288xf32>
    %47 = tpu.matmul %46, %44, %cst_42 {dimension_numbers = #tpu.dot_dimension_numbers<[1], [0], [0], [1], [0, 0, 1, 1], [], []>} : vector<16x8xf32>, vector<8x288xf32>, vector<16x288xf32> -> vector<16x288xf32>
    %48 = arith.addf %42, %47 : vector<16x288xf32>
    %c0_43 = arith.constant 0 : index
    %c0_44 = arith.constant 0 : index
    %c38 = arith.constant 38 : index
    %49 = vector.load %arg1[%c0_43, %c0_44, %c38] : memref<1x8x326xf32, #tpu.memory_space<vmem>>, vector<1x8x288xf32>
    %50 = vector.shape_cast %49 : vector<1x8x288xf32> to vector<8x288xf32>
    %c8 = arith.constant 8 : index
    %c0_45 = arith.constant 0 : index
    %c0_46 = arith.constant 0 : index
    %51 = vector.load %arg2[%c8, %c0_45, %c0_46] : memref<9x16x8xf32, #tpu.memory_space<vmem>>, vector<1x16x8xf32>
    %52 = vector.shape_cast %51 : vector<1x16x8xf32> to vector<16x8xf32>
    %cst_47 = arith.constant dense<0.000000e+00> : vector<16x288xf32>
    %53 = tpu.matmul %52, %50, %cst_47 {dimension_numbers = #tpu.dot_dimension_numbers<[1], [0], [0], [1], [0, 0, 1, 1], [], []>} : vector<16x8xf32>, vector<8x288xf32>, vector<16x288xf32> -> vector<16x288xf32>
    %54 = arith.addf %48, %53 : vector<16x288xf32>
    %c0_48 = arith.constant 0 : index
    %c0_49 = arith.constant 0 : index
    %55 = vector.load %arg3[%c0_48, %c0_49] : memref<16x1xf32, #tpu.memory_space<vmem>>, vector<16x1xf32>
    %56 = vector.broadcast %55 : vector<16x1xf32> to vector<16x288xf32>
    %57 = arith.addf %54, %56 : vector<16x288xf32>
    %c0_50 = arith.constant 0 : index
    %c0_51 = arith.constant 0 : index
    %58 = vector.load %arg4[%c0_50, %c0_51] : memref<288x4096xf32, #tpu.memory_space<vmem>>, vector<288x4096xf32>
    %cst_52 = arith.constant dense<0.000000e+00> : vector<16x4096xf32>
    %59 = tpu.matmul %57, %58, %cst_52 {dimension_numbers = #tpu.dot_dimension_numbers<[1], [0], [0], [1], [0, 0, 1, 1], [], []>} : vector<16x288xf32>, vector<288x4096xf32>, vector<16x4096xf32> -> vector<16x4096xf32>
    %c0_53 = arith.constant 0 : index
    %c0_54 = arith.constant 0 : index
    %c0_55 = arith.constant 0 : index
    %60 = vector.load %arg5[%c0_53, %c0_54, %c0_55] : memref<1x16x4096xf32, #tpu.memory_space<vmem>>, vector<1x16x4096xf32>
    %61 = vector.shape_cast %60 : vector<1x16x4096xf32> to vector<16x4096xf32>
    %62 = vector.shape_cast %59 : vector<16x4096xf32> to vector<1x16x4096xf32>
    tpu.vector_store %arg5[%c0_53, %c0_54, %c0_55], %62 {strides = array<i32>} : memref<1x16x4096xf32, #tpu.memory_space<vmem>>, vector<1x16x4096xf32>,
    return
  }
  func.func @transform_0(%arg0: i32) -> (i32, i32, i32) {
    %c0_i32 = arith.constant 0 : i32
    %c0_i32_0 = arith.constant 0 : i32
    %c0_i32_1 = arith.constant 0 : i32
    return %arg0, %c0_i32, %c0_i32_0 : i32, i32, i32
  }
  func.func @transform_1(%arg0: i32) -> (i32, i32, i32) {
    %c0_i32 = arith.constant 0 : i32
    %c0_i32_0 = arith.constant 0 : i32
    %c0_i32_1 = arith.constant 0 : i32
    %c0_i32_2 = arith.constant 0 : i32
    return %c0_i32, %c0_i32_0, %c0_i32_1 : i32, i32, i32
  }
  func.func @transform_2(%arg0: i32) -> (i32, i32) {
    %c0_i32 = arith.constant 0 : i32
    %c0_i32_0 = arith.constant 0 : i32
    %c0_i32_1 = arith.constant 0 : i32
    return %c0_i32, %c0_i32_0 : i32, i32
  }
  func.func @transform_3(%arg0: i32) -> (i32, i32) {
    %c0_i32 = arith.constant 0 : i32
    %c0_i32_0 = arith.constant 0 : i32
    %c0_i32_1 = arith.constant 0 : i32
    return %c0_i32, %c0_i32_0 : i32, i32
  }
  func.func @transform_4(%arg0: i32) -> (i32, i32, i32) {
    %c0_i32 = arith.constant 0 : i32
    %c0_i32_0 = arith.constant 0 : i32
    %c0_i32_1 = arith.constant 0 : i32
    return %arg0, %c0_i32, %c0_i32_0 : i32, i32, i32
  }
}

</mosaic_0001>

<bundles_post_ra>
// kernel: init_block_forward.1
= control target key start
LH: loop header
LB: loop body
LE: loop exit
PB: predicated region body
PF: predicated region fallthrough
CT: control target
= control target key end

     0   :  { %9 = vsyncpa [#allocation3], 0  ;;  %s4878_s15 = smov 0   ;;  %s5512_s0 = inlined_call_operand.vmem [shape: f32[2,8,326], index: 0, kind: input, shape index: {}]   ;;  %s5513_s1 = inlined_call_operand.vmem [shape: f32[9,16,8], index: 1, kind: input, shape index: {}]   ;;  %s5514_s2 = inlined_call_operand.vmem [shape: f32[16,1], index: 2, kind: input, shape index: {}]   ;;  %s5515_s3 = inlined_call_operand.hbm [shape: f32[288,4096], index: 3, kind: input, shape index: {}]   ;;  %s5516_s4 = inlined_call_operand.vmem [shape: f32[2,16,4096], index: 4, kind: output, shape index: {}]  }
   0x1 LB: > { %s152_s18 = sshll.u32 %s5515_s3, 4  ;;  %s4577_s19 = sadd.s32 4294967295, %s4839_s15   ;;  %s4839_s15 = sphi %s4878_s15, %s15_s15   ;;  %s153_s18 = int_to_ptr.hbm [resolvable:$true] %s152_s18 }
   0x2   : > { %p4579_p0 = scmp.ge.s32.totalorder %s4839_s15, 1  ;;  %p135_p1 = scmp.lt.s32.totalorder %s4839_s15, 3 }
   0x3   : > { %p4734_p2 = scmp.eq.s32.totalorder %s4577_s19, 0  ;;  %s4841_s20 = smov [#allocation2]  }
   0x4   : > { %p136_p3 = pnand %p4579_p0, %p135_p1  ;;  %s154_s21 = sshll.u32 %s4841_s20, 4  ;;  %s155_s21 = int_to_ptr.vmem [resolvable:$true] %s154_s21 }
   0x5   : > { %s4842_s22 = smov 4096   ;;  %s4843_s23 = smov 256  }
   0x6   : > { %p4730_p4 = pneg %p136_p3  ;;  %178 = sbr.rel (%p136_p3) target bundleno = 1145 (0x479), region = 36 }
   0x8   : > { %p4731_p5 = pnand %p4734_p2, %p4730_p4 }
   0xa   : > { %4733 = dma.hbm_to_vmem [thread:$0]  (!%p4731_p5), %s153_s18, 147456, %s155_s21, [#allocation3], %s4842_s22, %s4842_s22, %s4843_s23  }
   0xb   : > { %4834 = dma.done.wait (%p4734_p2), [#allocation3], 147456  }
   0xc   : > { %4836 = vsyncadd (%p4734_p2), [#allocation3], 4294819840  ;;  %p205_p6 = scmp.lt.s32.totalorder %s4577_s19, 1  ;;  %s4844_s28 = smov 126   ;;  %v4903_v5 = vld [vmem:[%s5513_s1] sm:$0xff]  ;;  %vm238_vm0 = vcmask 64512  }
   0xd   : > { %s4845_s29 = smov 127   ;;  %s4846_s30 = smov 110   ;;  %v4913_v6 = vld [vmem:[%s5513_s1 + $0x8] sm:$0xff]  ;;  %vm232_vm1 = vcmask 1039360   ;;  %v4587_v12 = vld [vmem:[%s5513_s1 + $0x10] sm:$0xff]  ;;  %v4588_v13 = vld [vmem:[%s5513_s1 + $0x18] sm:$0xff] }
   0xe   : > { %s5518_s19 = smov (!%p205_p6, %s4577_s19), 1  ;;  %s4847_s7 = smov 109   ;;  %vm398_vm2 = vcmask 1031168   ;;  %v4601_v21 = vld [vmem:[%s5513_s1 + $0x20] sm:$0xff]  ;;  %vm494_vm3 = vcmask 900096   ;;  %v4602_v29 = vld [vmem:[%s5513_s1 + $0x28] sm:$0xff] }
   0xf   : > { %s4725_s24 = smul.u32 24, %s5518_s19  ;;  %s4848_s8 = smov 108   ;;  %vm590_vm4 = vcmask 891904   ;;  %vm686_vm5 = vcmask 883712   ;;  %v4609_v38 = vld [vmem:[%s5513_s1 + $0x30] sm:$0xff]  ;;  %vm782_vm6 = vcmask 752640  }
  0x10   : > { %s4849_s9 = smov 92   ;;  %s4850_s10 = smov 91   ;;  %v4610_v46 = vld [vmem:[%s5513_s1 + $0x38] sm:$0xff]  ;;  %v4625_v49 = vld [vmem:[%s5513_s1 + $0x50] sm:$0xff]  ;;  %v4617_v51 = vld [vmem:[%s5513_s1 + $0x40] sm:$0xff]  ;;  %vm878_vm7 = vcmask 744448  }
  0x11   : > { %s209_s27 = scalar_lea.vmem %s5512_s0, %s4725_s24  ;;  %s4851_s11 = smov 90   ;;  %v4626_v53 = vld [vmem:[%s5513_s1 + $0x58] sm:$0xff]  ;;  %v4618_v54 = vld [vmem:[%s5513_s1 + $0x48] sm:$0xff]  ;;  %v4633_v60 = vld [vmem:[%s5513_s1 + $0x60] sm:$0xff]  ;;  %vm974_vm8 = vcmask 736256   ;;  %vm2231_vm9 = vcmask 261120  }
  0x12   : > { %v215_v0 = vld [vmem:[%s209_s27] sm:$0xff]  ;;  %v216_v1 = vld [vmem:[%s209_s27 + $0x8] sm:$0xff]  ;;  %v4895_v2 = vld [vmem:[%s209_s27 + $0x10] sm:$0xff] }
  0x13   : > { %v4761_v3 = vpack.i.bf16 %v216_v1, %v215_v0  ;;  %v4766_v4 = vpack.i.bf16 %v4895_v2, %v216_v1  ;;  %335 = vmatpush.msra.mxu3 %v215_v0 }
  0x14   : > { %4595 = vmatmul.msk.f32.vlgmr.msra.gmra.mxu3 %vm238_vm0, %v4903_v5 }
  0x15   : > { %4762 = vrot.lane.b32.xlu1 %v4761_v3, %s4844_s28  ;;  %4757 = vrot.lane.b32.xlu0 %v4761_v3, %s4845_s29 }
  0x16   : > { %4767 = vrot.lane.b32.xlu2 %v4766_v4, %s4846_s30 }
  0x1c   : > { %4596 = vmatmul.msk.f32.gmra.mxu3 %vm238_vm0, %v4913_v6 }
  0x1d   : > { %396 = vrot.lane.b32.xlu1 %v4895_v2, %s4844_s28  ;;  %230 = vrot.lane.b32.xlu0 %v4895_v2, %s4845_s29  ;;  %s4723_s28 = sshll.u32 %s5518_s19, 9 }
  0x1e   : > { %488 = vrot.lane.b32.xlu2 %v215_v0, %s4846_s30  ;;  %s5241_s19 = scalar_lea.vmem %s5516_s4, %s4723_s28 }
  0x25   : > { %4772 = vrot.lane.b32.xlu0 %v4761_v3, %s4847_s7  ;;  %588 = vrot.lane.b32.xlu1 %v4895_v2, %s4847_s7 }
  0x26   : > { %4777 = vrot.lane.b32.xlu2 %v4766_v4, %s4848_s8 }
  0x2d   : > { %680 = vrot.lane.b32.xlu0 %v215_v0, %s4848_s8  ;;  %4782 = vrot.lane.b32.xlu1 %v4761_v3, %s4849_s9 }
  0x2e   : > { %780 = vrot.lane.b32.xlu2 %v4895_v2, %s4849_s9 }
  0x35   : > { %4787 = vrot.lane.b32.xlu0 %v4766_v4, %s4850_s10  ;;  %872 = vrot.lane.b32.xlu1 %v215_v0, %s4850_s10  ;;  %v4634_v0 = vld [vmem:[%s5513_s1 + $0x68] sm:$0xff]  ;;  %v4641_v4 = vld [vmem:[%s5513_s1 + $0x70] sm:$0xff] }
  0x36   : > { %4792 = vrot.lane.b32.xlu2 %v4761_v3, %s4851_s11  ;;  %v4852_v3 = vmov 0  }
  0x37   : > { %4796 = vset.pattern.permute.xlu1 %v4852_v3  ;;  %4797 = vset.pattern.permute.xlu2 %v4852_v3 }
  0x38   : > { %4798 = vset.pattern.permute.xlu0 %v4852_v3 }
  0x3d   : > { %972 = vrot.lane.b32.xlu0 %v4895_v2, %s4851_s11 }
  0x70   : > { %v4768_v7 = vpop.permute.xlu2 %4767 }
  0x71   : > { %v4769_v18 = vunpack.i.l.bf16 %v4768_v7  ;;  %v4770_v22 = vunpack.i.h.bf16 %v4768_v7  ;;  %v4649_v7 = vld [vmem:[%s5513_s1 + $0x80] sm:$0xff] }
  0x73   : > { %v496_v27 = vsel %vm494_vm3, %v4769_v18, %v4770_v22 }
  0x78   : > { %v489_v16 = vpop.permute.xlu2 %488 }
  0x79   : > { %v495_v26 = vsel %vm494_vm3, %v489_v16, %v4769_v18  ;;  %v1432_v18 = vld [vmem:[#allocation2 + $0xb08] sm:$0xff] }
  0x80   : > { %v4778_v28 = vpop.permute.xlu2 %4777 }
  0x81   : > { %v4779_v35 = vunpack.i.l.bf16 %v4778_v28  ;;  %v4780_v36 = vunpack.i.h.bf16 %v4778_v28  ;;  %v1272_v28 = vld [vmem:[#allocation2 + $0x608] sm:$0xff] }
  0x83   : > { %v688_v45 = vsel %vm686_vm5, %v4779_v35, %v4780_v36 }
  0x87   : > { %v4763_v8 = vpop.permute.xlu1 %4762  ;;  %v4758_v9 = vpop.permute.xlu0 %4757 }
  0x88   : > { %v4760_v10 = vunpack.i.h.bf16 %v4758_v9  ;;  %v4759_v11 = vunpack.i.l.bf16 %v4758_v9  ;;  %v4765_v15 = vunpack.i.h.bf16 %v4763_v8  ;;  %v4764_v17 = vunpack.i.l.bf16 %v4763_v8  ;;  %v781_v37 = vpop.permute.xlu2 %780  ;;  %v4650_v8 = vld [vmem:[%s5513_s1 + $0x88] sm:$0xff] }
  0x89   : > { %v1062_v9 = vld [vmem:[%s5514_s2 + $0x8] sm:$0xff] }
  0x8a   : > { %v233_v14 = vsel %vm232_vm1, %v4759_v11, %v4760_v10  ;;  %v399_v25 = vsel %vm398_vm2, %v4764_v17, %v4765_v15  ;;  %1070 = vperm.xlu2 %4797, %v1062_v9   ;;  %v1719_v9 = vld [vmem:[#allocation2 + $0x1400] sm:$0xff] }
  0x8b   : > { %260 = vmatpush.msra.mxu0 %v233_v14  ;;  %4724 = vmatpush.msra.mxu2 %v233_v14 }
  0x8c   : > { %4589 = vmatmul.msk.f32.vlgmr.msra.gmra.mxu0 %vm238_vm0, %v4587_v12  ;;  %4590 = vmatmul.msk.f32.vlgmr.msra.gmra.mxu2 %vm238_vm0, %v4588_v13 }
  0x8d   : > { %358 = vmatpush.msrb.mxu0 %v216_v1  ;;  %v1061_v1 = vld [vmem:[%s5514_s2] sm:$0xff] }
  0x8e   : > { %1065 = vperm.xlu1 %4796, %v1061_v1   ;;  %v1783_v1 = vld [vmem:[#allocation2 + $0x1600] sm:$0xff] }
  0x8f   : > { %v397_v19 = vpop.permute.xlu1 %396  ;;  %v231_v20 = vpop.permute.xlu0 %230 }
  0x90   : > { %v234_v23 = vsel %vm232_vm1, %v4760_v10, %v231_v20  ;;  %v400_v24 = vsel %vm398_vm2, %v4765_v15, %v397_v19  ;;  %306 = vmatpush.msrb.mxu2 %v231_v20  ;;  %471 = vmatpush.msra.mxu0 %v397_v19  ;;  %v4793_v56 = vpop.permute.xlu2 %4792  ;;  %v1560_v10 = vld [vmem:[#allocation2 + $0xf08] sm:$0xff] }
  0x91   : > { %283 = vmatpush.msra.mxu1 %v234_v23  ;;  %448 = vmatpush.msrb.mxu3 %v400_v24  ;;  %v4795_v58 = vunpack.i.h.bf16 %v4793_v56  ;;  %v4794_v59 = vunpack.i.l.bf16 %v4793_v56  ;;  %v1464_v15 = vld [vmem:[#allocation2 + $0xc08] sm:$0xff]  ;;  %v1463_v56 = vld [vmem:[#allocation2 + $0xc00] sm:$0xff] }
  0x92   : > { %4591 = vmatmul.msk.f32.vlgmr.msra.gmra.mxu1 %vm238_vm0, %v4587_v12  ;;  %4605 = vmatmul.msk.f32.vlgmr.msrb.gmra.mxu3 %vm238_vm0, %v4601_v21  ;;  %v1400_v20 = vld [vmem:[#allocation2 + $0xa08] sm:$0xff] }
  0x93   : > { %381 = vmatpush.msrb.mxu1 %v4895_v2  ;;  %567 = vmatpush.msra.mxu3 %v4770_v22  ;;  %v975_v63 = vsel %vm974_vm8, %v4794_v59, %v4795_v58  ;;  %v1336_v22 = vld [vmem:[#allocation2 + $0x808] sm:$0xff]  ;;  %v1431_v59 = vld [vmem:[#allocation2 + $0xb00] sm:$0xff] }
  0x94   : > { %4593 = vmatmul.msk.f32.vlgmr.msrb.gmra.mxu2 %vm238_vm0, %v4587_v12  ;;  %4597 = vmatmul.msk.f32.vlgmr.msrb.gmra.mxu0 %vm238_vm0, %v4903_v5  ;;  %v1528_v12 = vld [vmem:[#allocation2 + $0xe08] sm:$0xff] }
  0x95   : > { %425 = vmatpush.msra.mxu2 %v399_v25  ;;  %521 = vmatpush.msra.mxu1 %v495_v26  ;;  %v1304_v26 = vld [vmem:[#allocation2 + $0x708] sm:$0xff] }
  0x97   : > { %544 = vmatpush.msrb.mxu2 %v496_v27  ;;  %v4773_v30 = vpop.permute.xlu0 %4772  ;;  %v589_v31 = vpop.permute.xlu1 %588 }
  0x98   : > { %v4775_v32 = vunpack.i.h.bf16 %v4773_v30  ;;  %v4774_v33 = vunpack.i.l.bf16 %v4773_v30  ;;  %v5040_v14 = vpop.f32.mrf.mxu3  ;;  %v1208_v30 = vld [vmem:[#allocation2 + $0x408] sm:$0xff] }
  0x9a   : > { %4592 = vmatmul.msk.f32.gmra.mxu1 %vm238_vm0, %v4588_v13  ;;  %4606 = vmatmul.msk.f32.gmra.mxu3 %vm238_vm0, %v4602_v29  ;;  %v591_v34 = vsel %vm590_vm4, %v4774_v33, %v4775_v32  ;;  %v592_v42 = vsel %vm590_vm4, %v4775_v32, %v589_v31 }
  0x9b   : > { %617 = vmatpush.msrb.mxu0 %v591_v34  ;;  %v1176_v34 = vld [vmem:[#allocation2 + $0x308] sm:$0xff] }
  0x9c   : > { %4594 = vmatmul.msk.f32.gmra.mxu2 %vm238_vm0, %v4588_v13  ;;  %4598 = vmatmul.msk.f32.gmra.mxu0 %vm238_vm0, %v4913_v6  ;;  %v1496_v13 = vld [vmem:[#allocation2 + $0xd08] sm:$0xff] }
  0x9f   : > { %v681_v39 = vpop.permute.xlu0 %680  ;;  %v4783_v40 = vpop.permute.xlu1 %4782 }
  0xa0   : > { %v687_v41 = vsel %vm686_vm5, %v681_v39, %v4779_v35  ;;  %v4785_v43 = vunpack.i.h.bf16 %v4783_v40  ;;  %v4784_v48 = vunpack.i.l.bf16 %v4783_v40  ;;  %v5048_v23 = vpop.f32.mrf.mxu3  ;;  %v2007_v39 = vld [vmem:[#allocation2 + $0x1d00] sm:$0xff]  ;;  %v1112_v40 = vld [vmem:[#allocation2 + $0x108] sm:$0xff] }
  0xa1   : > { %713 = vmatpush.msrb.mxu3 %v687_v41  ;;  %v1975_v41 = vld [vmem:[#allocation2 + $0x1c00] sm:$0xff] }
  0xa2   : > { %4599 = vmatmul.msk.f32.vlgmr.msrb.gmra.mxu1 %vm238_vm0, %v4903_v5  ;;  %4615 = vmatmul.msk.f32.vlgmr.msra.gmra.mxu3 %vm238_vm0, %v4609_v38  ;;  %v784_v44 = vsel %vm782_vm6, %v4785_v43, %v781_v37  ;;  %v783_v52 = vsel %vm782_vm6, %v4784_v48, %v4785_v43  ;;  %v1559_v43 = vld [vmem:[#allocation2 + $0xf00] sm:$0xff] }
  0xa3   : > { %640 = vmatpush.msrb.mxu1 %v592_v42  ;;  %832 = vmatpush.msra.mxu3 %v784_v44  ;;  %v1080_v42 = vld [vmem:[#allocation2 + $0x8] sm:$0xff]  ;;  %v1943_v44 = vld [vmem:[#allocation2 + $0x1b00] sm:$0xff] }
  0xa4   : > { %4603 = vmatmul.msk.f32.vlgmr.msra.gmra.mxu2 %vm238_vm0, %v4601_v21  ;;  %4607 = vmatmul.msk.f32.vlgmr.msra.gmra.mxu0 %vm238_vm0, %v4601_v21  ;;  %v1368_v21 = vld [vmem:[#allocation2 + $0x908] sm:$0xff]  ;;  %v1527_v48 = vld [vmem:[#allocation2 + $0xe00] sm:$0xff] }
  0xa5   : > { %663 = vmatpush.msra.mxu2 %v589_v31  ;;  %736 = vmatpush.msra.mxu0 %v688_v45  ;;  %v2071_v31 = vld [vmem:[#allocation2 + $0x1f00] sm:$0xff]  ;;  %v2073_v45 = vld [vmem:[#allocation2 + $0x1f10] sm:$0xff] }
  0xa7   : > { %v4788_v47 = vpop.permute.xlu0 %4787  ;;  %v873_v57 = vpop.permute.xlu1 %872 }
  0xa8   : > { %v4790_v50 = vunpack.i.h.bf16 %v4788_v47  ;;  %v4789_v55 = vunpack.i.l.bf16 %v4788_v47 }
  0xaa   : > { %4600 = vmatmul.msk.f32.gmra.mxu1 %vm238_vm0, %v4913_v6  ;;  %4616 = vmatmul.msk.f32.gmra.mxu3 %vm238_vm0, %v4610_v46  ;;  %v879_v61 = vsel %vm878_vm7, %v873_v57, %v4789_v55  ;;  %v880_v62 = vsel %vm878_vm7, %v4789_v55, %v4790_v50  ;;  %v4642_v6 = vld [vmem:[%s5513_s1 + $0x78] sm:$0xff]  ;;  %v2009_v55 = vld [vmem:[#allocation2 + $0x1d10] sm:$0xff]  ;;  %v1847_v57 = vld [vmem:[#allocation2 + $0x1800] sm:$0xff] }
  0xac   : > { %4604 = vmatmul.msk.f32.gmra.mxu2 %vm238_vm0, %v4602_v29  ;;  %4608 = vmatmul.msk.f32.gmra.mxu0 %vm238_vm0, %v4602_v29  ;;  %v1240_v29 = vld [vmem:[#allocation2 + $0x508] sm:$0xff] }
  0xaf   : > { %v973_v2 = vpop.permute.xlu0 %972 }
  0xb0   : > { %v976_v5 = vsel %vm974_vm8, %v4795_v58, %v973_v2  ;;  %v1977_v58 = vld [vmem:[#allocation2 + $0x1c10] sm:$0xff] }
  0xb2   : > { %4611 = vmatmul.msk.f32.vlgmr.msra.gmra.mxu1 %vm238_vm0, %v4609_v38  ;;  %4627 = vmatmul.msk.f32.vlgmr.msrb.gmra.mxu3 %vm238_vm0, %v4625_v49 }
  0xb3   : > { %759 = vmatpush.msra.mxu1 %v4780_v36  ;;  %951 = vmatpush.msrb.mxu3 %v4790_v50  ;;  %v2039_v36 = vld [vmem:[#allocation2 + $0x1e00] sm:$0xff]  ;;  %v2041_v50 = vld [vmem:[#allocation2 + $0x1e10] sm:$0xff] }
  0xb4   : > { %4613 = vmatmul.msk.f32.vlgmr.msrb.gmra.mxu2 %vm238_vm0, %v4609_v38  ;;  %4619 = vmatmul.msk.f32.vlgmr.msrb.gmra.mxu0 %vm238_vm0, %v4617_v51  ;;  %v1144_v38 = vld [vmem:[#allocation2 + $0x208] sm:$0xff] }
  0xb5   : > { %809 = vmatpush.msrb.mxu2 %v783_v52  ;;  %855 = vmatpush.msrb.mxu0 %v781_v37 }
  0xba   : > { %4612 = vmatmul.msk.f32.gmra.mxu1 %vm238_vm0, %v4610_v46  ;;  %4628 = vmatmul.msk.f32.gmra.mxu3 %vm238_vm0, %v4626_v53 }
  0xbc   : > { %4614 = vmatmul.msk.f32.gmra.mxu2 %vm238_vm0, %v4610_v46  ;;  %4620 = vmatmul.msk.f32.gmra.mxu0 %vm238_vm0, %v4618_v54 }
  0xc2   : > { %4621 = vmatmul.msk.f32.vlgmr.msrb.gmra.mxu1 %vm238_vm0, %v4617_v51  ;;  %4637 = vmatmul.msk.f32.vlgmr.msra.gmra.mxu3 %vm238_vm0, %v4633_v60 }
  0xc3   : > { %905 = vmatpush.msrb.mxu1 %v879_v61  ;;  %2238 = vmatpush.msra.mxu3 %v1559_v43  ;;  %v1945_v61 = vld [vmem:[#allocation2 + $0x1b10] sm:$0xff] }
  0xc4   : > { %4623 = vmatmul.msk.f32.vlgmr.msra.gmra.mxu2 %vm238_vm0, %v4617_v51  ;;  %4629 = vmatmul.msk.f32.vlgmr.msra.gmra.mxu0 %vm238_vm0, %v4625_v49  ;;  %v1721_v43 = vld [vmem:[#allocation2 + $0x1410] sm:$0xff] }
  0xc5   : > { %928 = vmatpush.msra.mxu2 %v880_v62  ;;  %1001 = vmatpush.msra.mxu0 %v975_v63 }
  0xc6   : > { %2239 = vmatpush.msra.mxu3 %v1527_v48  ;;  %v1175_v48 = vld [vmem:[#allocation2 + $0x300] sm:$0xff] }
  0xca   : > { %4622 = vmatmul.msk.f32.gmra.mxu1 %vm238_vm0, %v4618_v54  ;;  %4638 = vmatmul.msk.f32.gmra.mxu3 %vm238_vm0, %v4634_v0 }
  0xcc   : > { %4624 = vmatmul.msk.f32.gmra.mxu2 %vm238_vm0, %v4618_v54  ;;  %4630 = vmatmul.msk.f32.gmra.mxu0 %vm238_vm0, %v4626_v53  ;;  %v1879_v54 = vld [vmem:[#allocation2 + $0x1900] sm:$0xff] }
  0xd2   : > { %4631 = vmatmul.msk.f32.vlgmr.msra.gmra.mxu1 %vm238_vm0, %v4625_v49  ;;  %4647 = vmatmul.msk.f32.vlgmr.msrb.gmra.mxu3 %vm238_vm0, %v4641_v4  ;;  %v1911_v49 = vld [vmem:[#allocation2 + $0x1a00] sm:$0xff] }
  0xd3   : > { %1024 = vmatpush.msra.mxu1 %v976_v5  ;;  %v1751_v5 = vld [vmem:[#allocation2 + $0x1500] sm:$0xff] }
  0xd4   : > { %4635 = vmatmul.msk.f32.vlgmr.msrb.gmra.mxu2 %vm238_vm0, %v4633_v60  ;;  %4639 = vmatmul.msk.f32.vlgmr.msrb.gmra.mxu0 %vm238_vm0, %v4633_v60  ;;  %v1815_v60 = vld [vmem:[#allocation2 + $0x1700] sm:$0xff] }
  0xd5   : > { %1047 = vmatpush.msrb.mxu2 %v973_v2  ;;  %2261 = vmatpush.msrb.mxu0 %v2071_v31  ;;  %v1913_v2 = vld [vmem:[#allocation2 + $0x1a10] sm:$0xff]  ;;  %v2135_v31 = vld [vmem:[#allocation2 + $0x2100] sm:$0xff] }
  0xd7   : > { %2262 = vmatpush.msrb.mxu0 %v2039_v36  ;;  %v1623_v36 = vld [vmem:[#allocation2 + $0x1100] sm:$0xff] }
  0xd9   : > { %2263 = vmatpush.msrb.mxu0 %v2007_v39  ;;  %v2103_v39 = vld [vmem:[#allocation2 + $0x2000] sm:$0xff] }
  0xda   : > { %4632 = vmatmul.msk.f32.gmra.mxu1 %vm238_vm0, %v4626_v53  ;;  %4648 = vmatmul.msk.f32.gmra.mxu3 %vm238_vm0, %v4642_v6  ;;  %v1495_v53 = vld [vmem:[#allocation2 + $0xd00] sm:$0xff] }
  0xdb   : > { %2264 = vmatpush.msrb.mxu0 %v1975_v41  ;;  %2240 = vmatpush.msra.mxu3 %v1495_v53  ;;  %v1591_v41 = vld [vmem:[#allocation2 + $0x1000] sm:$0xff] }
  0xdc   : > { %4636 = vmatmul.msk.f32.gmra.mxu2 %vm238_vm0, %v4634_v0  ;;  %4640 = vmatmul.msk.f32.gmra.mxu0 %vm238_vm0, %v4634_v0  ;;  %v1399_v0 = vld [vmem:[#allocation2 + $0xa00] sm:$0xff] }
  0xdd   : > { %2265 = vmatpush.msrb.mxu0 %v1943_v44  ;;  %2241 = vmatpush.msra.mxu3 %v1463_v56  ;;  %v1561_v44 = vld [vmem:[#allocation2 + $0xf10] sm:$0xff]  ;;  %v1143_v56 = vld [vmem:[#allocation2 + $0x200] sm:$0xff] }
  0xdf   : > { %2266 = vmatpush.msrb.mxu0 %v1911_v49  ;;  %2242 = vmatpush.msra.mxu3 %v1431_v59  ;;  %v2040_v49 = vld [vmem:[#allocation2 + $0x1e08] sm:$0xff] }
  0xe1   : > { %2267 = vmatpush.msrb.mxu0 %v1879_v54  ;;  %2243 = vmatpush.msra.mxu3 %v1399_v0  ;;  %v1976_v0 = vld [vmem:[#allocation2 + $0x1c08] sm:$0xff] }
  0xe2   : > { %4643 = vmatmul.msk.f32.vlgmr.msrb.gmra.mxu1 %vm238_vm0, %v4641_v4 }
  0xe3   : > { %2268 = vmatpush.msrb.mxu0 %v1847_v57  ;;  %v2008_v57 = vld [vmem:[#allocation2 + $0x1d08] sm:$0xff] }
  0xe4   : > { %4645 = vmatmul.msk.f32.vlgmr.msra.gmra.mxu2 %vm238_vm0, %v4641_v4  ;;  %4651 = vmatmul.msk.f32.vlgmr.msra.gmra.mxu0 %vm238_vm0, %v4649_v7  ;;  %v1367_v4 = vld [vmem:[#allocation2 + $0x900] sm:$0xff] }
  0xe5   : > { %2307 = vmatpush.msra.mxu2 %v1560_v10  ;;  %2269 = vmatpush.msrb.mxu0 %v1815_v60  ;;  %v1849_v10 = vld [vmem:[#allocation2 + $0x1810] sm:$0xff] }
  0xe6   : > { %2244 = vmatpush.msra.mxu3 %v1367_v4  ;;  %v1497_v60 = vld [vmem:[#allocation2 + $0xd10] sm:$0xff]  ;;  %v1079_v4 = vld [vmem:[#allocation2] sm:$0xff] }
  0xe7   : > { %2308 = vmatpush.msra.mxu2 %v1528_v12  ;;  %2270 = vmatpush.msrb.mxu0 %v1783_v1  ;;  %v2199_v12 = vld [vmem:[#allocation2 + $0x2300] sm:$0xff]  ;;  %v1625_v1 = vld [vmem:[#allocation2 + $0x1110] sm:$0xff] }
  0xe8   : > { %2296 = vmatpush.msrb.mxu1 %v2199_v12  ;;  %v1912_v12 = vld [vmem:[#allocation2 + $0x1a08] sm:$0xff] }
  0xe9   : > { %2309 = vmatpush.msra.mxu2 %v1496_v13  ;;  %2271 = vmatpush.msrb.mxu0 %v1751_v5  ;;  %v1303_v13 = vld [vmem:[#allocation2 + $0x700] sm:$0xff]  ;;  %v1944_v5 = vld [vmem:[#allocation2 + $0x1b08] sm:$0xff] }
  0xea   : > { %4644 = vmatmul.msk.f32.gmra.mxu1 %vm238_vm0, %v4642_v6 }
  0xeb   : > { %2310 = vmatpush.msra.mxu2 %v1464_v15  ;;  %2272 = vmatpush.msrb.mxu0 %v1719_v9  ;;  %v1687_v15 = vld [vmem:[#allocation2 + $0x1300] sm:$0xff] }
  0xec   : > { %4646 = vmatmul.msk.f32.gmra.mxu2 %vm238_vm0, %v4642_v6  ;;  %4652 = vmatmul.msk.f32.gmra.mxu0 %vm238_vm0, %v4650_v8  ;;  %v1881_v6 = vld [vmem:[#allocation2 + $0x1910] sm:$0xff] }
  0xed   : > { %2311 = vmatpush.msra.mxu2 %v1432_v18  ;;  %v1817_v18 = vld [vmem:[#allocation2 + $0x1710] sm:$0xff]  ;;  %2273 = vmatpush.msrb.mxu0 %v1687_v15 }
  0xee   : > { %v1401_v15 = vld [vmem:[#allocation2 + $0xa10] sm:$0xff] }
  0xef   : > { %2312 = vmatpush.msra.mxu2 %v1400_v20 }
  0xf1   : > { %2313 = vmatpush.msra.mxu2 %v1368_v21 }
  0xf2   : > { %4653 = vmatmul.msk.f32.vlgmr.msra.gmra.mxu1 %vm238_vm0, %v4649_v7 }
  0xf3   : > { %2314 = vmatpush.msra.mxu2 %v1336_v22  ;;  %v2167_v22 = vld [vmem:[#allocation2 + $0x2200] sm:$0xff] }
  0xf4   : > { %4655 = vmatmul.msk.f32.vlgmr.msrb.gmra.mxu2 %vm238_vm0, %v4649_v7  ;;  %2297 = vmatpush.msrb.mxu1 %v2167_v22  ;;  %v1880_v22 = vld [vmem:[#allocation2 + $0x1908] sm:$0xff] }
  0xf5   : > { %2315 = vmatpush.msra.mxu2 %v1304_v26  ;;  %v1271_v26 = vld [vmem:[#allocation2 + $0x600] sm:$0xff] }
  0xf6   : > { %2298 = vmatpush.msrb.mxu1 %v2135_v31  ;;  %v1816_v31 = vld [vmem:[#allocation2 + $0x1708] sm:$0xff] }
  0xf7   : > { %2316 = vmatpush.msra.mxu2 %v1272_v28  ;;  %v1655_v28 = vld [vmem:[#allocation2 + $0x1200] sm:$0xff] }
  0xf8   : > { %2274 = vmatpush.msrb.mxu0 %v1655_v28  ;;  %2299 = vmatpush.msrb.mxu1 %v2103_v39  ;;  %v1848_v28 = vld [vmem:[#allocation2 + $0x1808] sm:$0xff] }
  0xf9   : > { %2317 = vmatpush.msra.mxu2 %v1240_v29  ;;  %v1785_v29 = vld [vmem:[#allocation2 + $0x1610] sm:$0xff] }
  0xfa   : > { %4654 = vmatmul.msk.f32.gmra.mxu1 %vm238_vm0, %v4650_v8  ;;  %2275 = vmatpush.msrb.mxu0 %v1623_v36  ;;  %v1305_v36 = vld [vmem:[#allocation2 + $0x710] sm:$0xff] }
  0xfb   : > { %2318 = vmatpush.msra.mxu2 %v1208_v30 }
  0xfc   : > { %4656 = vmatmul.msk.f32.gmra.mxu2 %vm238_vm0, %v4650_v8  ;;  %v1335_v8 = vld [vmem:[#allocation2 + $0x800] sm:$0xff]  ;;  %2276 = vmatpush.msrb.mxu0 %v1591_v41  ;;  %v2168_v41 = vld [vmem:[#allocation2 + $0x2208] sm:$0xff] }
  0xfd   : > { %2319 = vmatpush.msra.mxu2 %v1176_v34  ;;  %2245 = vmatpush.msra.mxu3 %v1335_v8  ;;  %v1239_v34 = vld [vmem:[#allocation2 + $0x500] sm:$0xff]  ;;  %v1433_v8 = vld [vmem:[#allocation2 + $0xb10] sm:$0xff] }
  0xfe   : > { %2376 = vmatpush.msra.mxu0 %v1561_v44  ;;  %v1752_v44 = vld [vmem:[#allocation2 + $0x1508] sm:$0xff] }
  0xff   : > { %2320 = vmatpush.msra.mxu2 %v1144_v38  ;;  %2246 = vmatpush.msra.mxu3 %v1303_v13  ;;  %v1753_v38 = vld [vmem:[#allocation2 + $0x1510] sm:$0xff] }
 0x101   : > { %2321 = vmatpush.msra.mxu2 %v1112_v40  ;;  %2247 = vmatpush.msra.mxu3 %v1271_v26  ;;  %v1207_v40 = vld [vmem:[#allocation2 + $0x400] sm:$0xff]  ;;  %v1369_v26 = vld [vmem:[#allocation2 + $0x910] sm:$0xff] }
 0x103   : > { %2322 = vmatpush.msra.mxu2 %v1080_v42  ;;  %2248 = vmatpush.msra.mxu3 %v1239_v34  ;;  %v2072_v42 = vld [vmem:[#allocation2 + $0x1f08] sm:$0xff] }
 0x104   : > { %2330 = vmatpush.msra.mxu1 %v2072_v42  ;;  %v2200_v34 = vld [vmem:[#allocation2 + $0x2308] sm:$0xff]  ;;  %v1273_v42 = vld [vmem:[#allocation2 + $0x610] sm:$0xff] }
 0x105   : > { %2399 = vmatpush.msrb.mxu2 %v2073_v45  ;;  %2249 = vmatpush.msra.mxu3 %v1207_v40  ;;  %v1784_v40 = vld [vmem:[#allocation2 + $0x1608] sm:$0xff] }
 0x106   : > { %2331 = vmatpush.msra.mxu1 %v2040_v49 }
 0x107   : > { %2400 = vmatpush.msrb.mxu2 %v2041_v50  ;;  %v1689_v50 = vld [vmem:[#allocation2 + $0x1310] sm:$0xff]  ;;  %2250 = vmatpush.msra.mxu3 %v1175_v48 }
 0x108   : > { %2332 = vmatpush.msra.mxu1 %v2008_v57 }
 0x109   : > { %v5038_v11 = vpop.f32.mrf.mxu0  ;;  %2401 = vmatpush.msrb.mxu2 %v2009_v55  ;;  %v1529_v55 = vld [vmem:[#allocation2 + $0xe10] sm:$0xff]  ;;  %2251 = vmatpush.msra.mxu3 %v1143_v56  ;;  %v1720_v56 = vld [vmem:[#allocation2 + $0x1408] sm:$0xff] }
 0x10a   : > { %2377 = vmatpush.msra.mxu0 %v1529_v55  ;;  %2333 = vmatpush.msra.mxu1 %v1976_v0  ;;  %v338_v48 = vadd.f32 %v5040_v14, %v5038_v11  ;;  %v1241_v55 = vld [vmem:[#allocation2 + $0x510] sm:$0xff] }
 0x10b   : > { %2402 = vmatpush.msrb.mxu2 %v1977_v58  ;;  %v1657_v58 = vld [vmem:[#allocation2 + $0x1210] sm:$0xff] }
 0x10c   : > { %2378 = vmatpush.msra.mxu0 %v1497_v60  ;;  %2334 = vmatpush.msra.mxu1 %v1944_v5  ;;  %v1209_v60 = vld [vmem:[#allocation2 + $0x410] sm:$0xff] }
 0x10d   : > { %2403 = vmatpush.msrb.mxu2 %v1945_v61  ;;  %v1111_v61 = vld [vmem:[#allocation2 + $0x100] sm:$0xff]  ;;  %v1177_v0 = vld [vmem:[#allocation2 + $0x310] sm:$0xff] }
 0x10e   : > { %2252 = vmatpush.msra.mxu3 %v1111_v61  ;;  %2335 = vmatpush.msra.mxu1 %v1912_v12  ;;  %v1688_v61 = vld [vmem:[#allocation2 + $0x1308] sm:$0xff]  ;;  %v1113_v12 = vld [vmem:[#allocation2 + $0x110] sm:$0xff] }
 0x10f   : > { %v5042_v16 = vpop.f32.mrf.mxu2  ;;  %v5044_v17 = vpop.f32.mrf.mxu1  ;;  %2404 = vmatpush.msrb.mxu2 %v1913_v2  ;;  %v1465_v2 = vld [vmem:[#allocation2 + $0xc10] sm:$0xff] }
 0x110   : > { %2379 = vmatpush.msra.mxu0 %v1465_v2  ;;  %2253 = vmatpush.msra.mxu3 %v1079_v4  ;;  %v1656_v2 = vld [vmem:[#allocation2 + $0x1208] sm:$0xff]  ;;  %v1145_v4 = vld [vmem:[#allocation2 + $0x210] sm:$0xff] }
 0x111   : > { %v5046_v19 = vpop.f32.mrf.mxu0  ;;  %2405 = vmatpush.msrb.mxu2 %v1881_v6  ;;  %v1593_v6 = vld [vmem:[#allocation2 + $0x1010] sm:$0xff]  ;;  %2336 = vmatpush.msra.mxu1 %v1880_v22 }
 0x112   : > { %2380 = vmatpush.msra.mxu0 %v1433_v8  ;;  %2365 = vmatpush.msrb.mxu3 %v2200_v34 }
 0x113   : > { %2406 = vmatpush.msrb.mxu2 %v1849_v10  ;;  %2337 = vmatpush.msra.mxu1 %v1848_v28  ;;  %v1081_v28 = vld [vmem:[#allocation2 + $0x10] sm:$0xff] }
 0x114   : > { %2381 = vmatpush.msra.mxu0 %v1401_v15  ;;  %2366 = vmatpush.msrb.mxu3 %v2168_v41 }
 0x115   : > { %v5060_v35 = vpop.f32.mrf.mxu3  ;;  %2407 = vmatpush.msrb.mxu2 %v1817_v18  ;;  %2338 = vmatpush.msra.mxu1 %v1816_v31 }
 0x116   : > { %2382 = vmatpush.msra.mxu0 %v1369_v26 }
 0x117   : > { %v5050_v24 = vpop.f32.mrf.mxu1  ;;  %v5052_v25 = vpop.f32.mrf.mxu2  ;;  %2408 = vmatpush.msrb.mxu2 %v1785_v29  ;;  %v1337_v29 = vld [vmem:[#allocation2 + $0x810] sm:$0xff]  ;;  %2339 = vmatpush.msra.mxu1 %v1784_v40 }
 0x118   : > { %2383 = vmatpush.msra.mxu0 %v1337_v29  ;;  %v361_v29 = vadd.f32 %v5046_v19, %v5044_v17  ;;  %v5124_v40 = vpop.permute.xlu1 %1065  ;;  %v1563_v17 = vld [vmem:[#allocation2 + $0xf20] sm:$0xff]  ;;  %v2201_v19 = vld [vmem:[#allocation2 + $0x2310] sm:$0xff] }
 0x119   : > { %v5054_v27 = vpop.f32.mrf.mxu0  ;;  %2409 = vmatpush.msrb.mxu2 %v1753_v38  ;;  %2340 = vmatpush.msra.mxu1 %v1752_v44 }
 0x11a   : > { %2384 = vmatpush.msra.mxu0 %v1305_v36 }
 0x11b   : > { %2410 = vmatpush.msrb.mxu2 %v1721_v43  ;;  %2341 = vmatpush.msra.mxu1 %v1720_v56 }
 0x11c   : > { %2385 = vmatpush.msra.mxu0 %v1273_v42 }
 0x11d   : > { %v5070_v52 = vpop.f32.mrf.mxu3  ;;  %2411 = vmatpush.msrb.mxu2 %v1689_v50  ;;  %v2136_v50 = vld [vmem:[#allocation2 + $0x2108] sm:$0xff]  ;;  %2342 = vmatpush.msra.mxu1 %v1688_v61 }
 0x11e   : > { %2367 = vmatpush.msrb.mxu3 %v2136_v50  ;;  %2386 = vmatpush.msra.mxu0 %v1241_v55 }
 0x11f   : > { %v5056_v32 = vpop.f32.mrf.mxu2  ;;  %v5058_v33 = vpop.f32.mrf.mxu1  ;;  %2412 = vmatpush.msrb.mxu2 %v1657_v58  ;;  %v2104_v58 = vld [vmem:[#allocation2 + $0x2008] sm:$0xff]  ;;  %2343 = vmatpush.msra.mxu1 %v1656_v2 }
 0x120   : > { %2368 = vmatpush.msrb.mxu3 %v2104_v58  ;;  %2387 = vmatpush.msra.mxu0 %v1209_v60  ;;  %v384_v50 = vadd.f32 %v5058_v33, %v5052_v25  ;;  %v1499_v60 = vld [vmem:[#allocation2 + $0xd20] sm:$0xff]  ;;  %v5139_v25 = vpop.permute.xlu2 %1070 }
 0x121   : > { %v5062_v37 = vpop.f32.mrf.mxu0  ;;  %2413 = vmatpush.msrb.mxu2 %v1625_v1 }
 0x122   : > { %2388 = vmatpush.msra.mxu0 %v1177_v0 }
 0x123   : > { %2414 = vmatpush.msrb.mxu2 %v1593_v6  ;;  %v341_v6 = vadd.f32 %v5048_v23, %v5042_v16 }
 0x124   : > { %2389 = vmatpush.msra.mxu0 %v1145_v4 }
 0x125   : > { %v5078_v7 = vpop.f32.mrf.mxu3 }
 0x126   : > { %2390 = vmatpush.msra.mxu0 %v1113_v12 }
 0x127   : > { %v5064_v46 = vpop.f32.mrf.mxu1  ;;  %v5066_v47 = vpop.f32.mrf.mxu2 }
 0x128   : > { %v479_v57 = vadd.f32 %v5066_v47, %v338_v48  ;;  %v1624_v47 = vld [vmem:[#allocation2 + $0x1108] sm:$0xff]  ;;  %2391 = vmatpush.msra.mxu0 %v1081_v28  ;;  %v1339_v28 = vld [vmem:[#allocation2 + $0x820] sm:$0xff] }
 0x129   : > { %v5068_v51 = vpop.f32.mrf.mxu0  ;;  %2344 = vmatpush.msra.mxu1 %v1624_v47 }
 0x12d   : > { %v5086_v45 = vpop.f32.mrf.mxu3 }
 0x12f   : > { %v5072_v62 = vpop.f32.mrf.mxu2  ;;  %v5074_v63 = vpop.f32.mrf.mxu1 }
 0x130   : > { %v575_v1 = vadd.f32 %v5074_v63, %v479_v57  ;;  %v1592_v63 = vld [vmem:[#allocation2 + $0x1008] sm:$0xff]  ;;  %v482_v15 = vadd.f32 %v5072_v62, %v341_v6  ;;  %v480_v62 = vadd.f32 %v5060_v35, %v361_v29  ;;  %v2202_v29 = vld [vmem:[#allocation2 + $0x2318] sm:$0xff] }
 0x131   : > { %v5076_v3 = vpop.f32.mrf.mxu0  ;;  %2345 = vmatpush.msra.mxu1 %v1592_v63 }
 0x132   : > { %v671_v8 = vadd.f32 %v5076_v3, %v575_v1  ;;  %v1467_v1 = vld [vmem:[#allocation2 + $0xc20] sm:$0xff] }
 0x135   : > { %v5098_v13 = vpop.f32.mrf.mxu3 }
 0x136   : > { %v767_v22 = vadd.f32 %v5098_v13, %v671_v8  ;;  %v1435_v8 = vld [vmem:[#allocation2 + $0xb20] sm:$0xff] }
 0x137   : > { %v5080_v20 = vpop.f32.mrf.mxu1  ;;  %v5082_v21 = vpop.f32.mrf.mxu2 }
 0x138   : > { %v578_v31 = vadd.f32 %v5080_v20, %v482_v15  ;;  %v576_v42 = vadd.f32 %v5082_v21, %v480_v62  ;;  %v364_v20 = vadd.f32 %v5054_v27, %v5050_v24  ;;  %v1531_v21 = vld [vmem:[#allocation2 + $0xe20] sm:$0xff]  ;;  %v2137_v24 = vld [vmem:[#allocation2 + $0x2110] sm:$0xff]  ;;  %v2138_v62 = vld [vmem:[#allocation2 + $0x2118] sm:$0xff] }
 0x139   : > { %v5084_v30 = vpop.f32.mrf.mxu0 }
 0x13a   : > { %v674_v13 = vadd.f32 %v5084_v30, %v578_v31  ;;  %v2169_v30 = vld [vmem:[#allocation2 + $0x2210] sm:$0xff]  ;;  %v483_v33 = vadd.f32 %v5070_v52, %v364_v20  ;;  %v387_v52 = vadd.f32 %v5064_v46, %v5056_v32  ;;  %v1562_v20 = vld [vmem:[#allocation2 + $0xf18] sm:$0xff] }
 0x13c   : > { %v484_v46 = vadd.f32 %v5068_v51, %v387_v52  ;;  %v1370_v52 = vld [vmem:[#allocation2 + $0x918] sm:$0xff] }
 0x13d   : > { %v718_v49 = vpop.f32.mrf.mxu3 }
 0x13e   : > { %v770_v44 = vadd.f32 %v718_v49, %v674_v13  ;;  %v580_v31 = vadd.f32 %v5086_v45, %v484_v46  ;;  %v2077_v46 = vld [vmem:[#allocation2 + $0x1f30] sm:$0xff] }
 0x13f   : > { %v5088_v53 = vpop.f32.mrf.mxu2  ;;  %v5090_v54 = vpop.f32.mrf.mxu1 }
 0x140   : > { %v672_v55 = vadd.f32 %v5090_v54, %v576_v42  ;;  %v481_v54 = vadd.f32 %v5062_v37, %v384_v50  ;;  %v579_v4 = vadd.f32 %v5088_v53, %v483_v33  ;;  %v1115_v33 = vld [vmem:[#allocation2 + $0x120] sm:$0xff] }
 0x141   : > { %v5092_v59 = vpop.f32.mrf.mxu0 }
 0x142   : > { %v768_v61 = vadd.f32 %v5092_v59, %v672_v55  ;;  %v577_v2 = vadd.f32 %v5078_v7, %v481_v54  ;;  %v1403_v7 = vld [vmem:[#allocation2 + $0xa20] sm:$0xff]  ;;  %v2074_v55 = vld [vmem:[#allocation2 + $0x1f18] sm:$0xff] }
 0x145   : > { %v834_v26 = vpop.f32.mrf.mxu3 }
 0x146   : > { %v864_v47 = vadd.f32 %v834_v26, %v768_v61  ;;  %v1371_v26 = vld [vmem:[#allocation2 + $0x920] sm:$0xff]  ;;  %v1434_v61 = vld [vmem:[#allocation2 + $0xb18] sm:$0xff] }
 0x147   : > { %v5094_v9 = vpop.f32.mrf.mxu1  ;;  %v5096_v10 = vpop.f32.mrf.mxu2 }
 0x148   : > { %v675_v37 = vadd.f32 %v5094_v9, %v579_v4  ;;  %v673_v59 = vadd.f32 %v5096_v10, %v577_v2  ;;  %v2204_v2 = vld [vmem:[#allocation2 + $0x2328] sm:$0xff]  ;;  %v1914_v4 = vld [vmem:[#allocation2 + $0x1a18] sm:$0xff] }
 0x149   : > { %v5100_v18 = vpop.f32.mrf.mxu0 }
 0x14a   : > { %v771_v9 = vadd.f32 %v5100_v18, %v675_v37  ;;  %v1882_v37 = vld [vmem:[#allocation2 + $0x1918] sm:$0xff] }
 0x14d   : > { %v837_v35 = vpop.f32.mrf.mxu3 }
 0x14f   : > { %v5102_v38 = vpop.f32.mrf.mxu2  ;;  %v5104_v39 = vpop.f32.mrf.mxu1 }
 0x150   : > { %v769_v15 = vadd.f32 %v5104_v39, %v673_v59  ;;  %v1307_v39 = vld [vmem:[#allocation2 + $0x720] sm:$0xff]  ;;  %v676_v51 = vadd.f32 %v5102_v38, %v580_v31  ;;  %v2045_v31 = vld [vmem:[#allocation2 + $0x1e30] sm:$0xff] }
 0x151   : > { %v5106_v43 = vpop.f32.mrf.mxu0  ;;  %v2011_v59 = vld [vmem:[#allocation2 + $0x1d20] sm:$0xff] }
 0x155   : > { %v953_v32 = vpop.f32.mrf.mxu3 }
 0x157   : > { %v5112_v11 = vpop.f32.mrf.mxu1  ;;  %v811_v14 = vpop.f32.mrf.mxu2 }
 0x158   : > { %v863_v16 = vadd.f32 %v811_v14, %v767_v22  ;;  %v2105_v14 = vld [vmem:[#allocation2 + $0x2010] sm:$0xff] }
 0x159   : > { %v5114_v5 = vpop.f32.mrf.mxu0 }
 0x15d   : > { %v956_v50 = vpop.f32.mrf.mxu3 }
 0x15f   : > { %v814_v23 = vpop.f32.mrf.mxu2  ;;  %v907_v3 = vpop.f32.mrf.mxu1 }
 0x160   : > { %v959_v34 = vadd.f32 %v907_v3, %v863_v16  ;;  %v866_v56 = vadd.f32 %v814_v23, %v770_v44  ;;  %v867_v16 = vadd.f32 %v837_v35, %v771_v9  ;;  %v865_v23 = vadd.f32 %v5106_v43, %v769_v15  ;;  %v2170_v3 = vld [vmem:[#allocation2 + $0x2218] sm:$0xff]  ;;  %v1243_v44 = vld [vmem:[#allocation2 + $0x520] sm:$0xff]  ;;  %v2108_v15 = vld [vmem:[#allocation2 + $0x2028] sm:$0xff] }
 0x161   : > { %v1003_v36 = vpop.f32.mrf.mxu0  ;;  %v772_v43 = vadd.f32 %v5112_v11, %v676_v51  ;;  %v1211_v35 = vld [vmem:[#allocation2 + $0x420] sm:$0xff]  ;;  %v1274_v9 = vld [vmem:[#allocation2 + $0x618] sm:$0xff] }
 0x162   : > { %v1055_v41 = vadd.f32 %v1003_v36, %v959_v34  ;;  %v961_v18 = vadd.f32 %v953_v32, %v865_v23  ;;  %v1275_v36 = vld [vmem:[#allocation2 + $0x620] sm:$0xff]  ;;  %v1754_v23 = vld [vmem:[#allocation2 + $0x1518] sm:$0xff] }
 0x163   : > { %v868_v11 = vadd.f32 %v5114_v5, %v772_v43  ;;  %v1947_v32 = vld [vmem:[#allocation2 + $0x1b20] sm:$0xff]  ;;  %v1210_v51 = vld [vmem:[#allocation2 + $0x418] sm:$0xff]  ;;  %v1949_v43 = vld [vmem:[#allocation2 + $0x1b30] sm:$0xff] }
 0x164   : > { %v5130_v48 = vadd.f32 %v5124_v40, %v1055_v41 }
 0x166   : > { %2254 = vmatmul.f32.vlgmr.msra.gmra.mxu3 %v5130_v48  ;;  %2323 = vmatmul.f32.vlgmr.msra.gmra.mxu2 %v5130_v48 }
 0x167   : > { %2514 = vmatpush.msra.mxu2 %v1563_v17  ;;  %v910_v49 = vpop.f32.mrf.mxu1  ;;  %v930_v57 = vpop.f32.mrf.mxu2  ;;  %2434 = vmatpush.msra.mxu3 %v2201_v19  ;;  %v2106_v17 = vld [vmem:[#allocation2 + $0x2018] sm:$0xff] }
 0x168   : > { %v962_v58 = vadd.f32 %v910_v49, %v866_v56  ;;  %v960_v12 = vadd.f32 %v930_v57, %v864_v47  ;;  %v1530_v56 = vld [vmem:[#allocation2 + $0xe18] sm:$0xff]  ;;  %v2043_v47 = vld [vmem:[#allocation2 + $0x1e20] sm:$0xff] }
 0x169   : > { %2515 = vmatpush.msra.mxu2 %v1531_v21  ;;  %v1006_v27 = vpop.f32.mrf.mxu0  ;;  %2435 = vmatpush.msra.mxu3 %v2169_v30  ;;  %v1179_v21 = vld [vmem:[#allocation2 + $0x320] sm:$0xff]  ;;  %v964_v30 = vadd.f32 %v956_v50, %v868_v11  ;;  %v1498_v49 = vld [vmem:[#allocation2 + $0xd18] sm:$0xff] }
 0x16a   : > { %v1058_v0 = vadd.f32 %v1006_v27, %v962_v58  ;;  %v2010_v57 = vld [vmem:[#allocation2 + $0x1d18] sm:$0xff]  ;;  %v1147_v58 = vld [vmem:[#allocation2 + $0x220] sm:$0xff] }
 0x16b   : > { %2516 = vmatpush.msra.mxu2 %v1499_v60  ;;  %2436 = vmatpush.msra.mxu3 %v2137_v24  ;;  %v1466_v24 = vld [vmem:[#allocation2 + $0xc18] sm:$0xff] }
 0x16c   : > { %v5147_v6 = vadd.f32 %v5139_v25, %v1058_v0  ;;  %v1978_v27 = vld [vmem:[#allocation2 + $0x1c18] sm:$0xff] }
 0x16d   : > { %2517 = vmatpush.msra.mxu2 %v1467_v1  ;;  %2437 = vmatpush.msra.mxu3 %v2105_v14  ;;  %v1946_v0 = vld [vmem:[#allocation2 + $0x1b18] sm:$0xff]  ;;  %v1083_v1 = vld [vmem:[#allocation2 + $0x20] sm:$0xff] }
 0x16e   : > { %2257 = vmatmul.f32.gmra.mxu3 %v5147_v6  ;;  %2326 = vmatmul.f32.gmra.mxu2 %v5147_v6  ;;  %v2075_v14 = vld [vmem:[#allocation2 + $0x1f20] sm:$0xff]  ;;  %v1626_v50 = vld [vmem:[#allocation2 + $0x1118] sm:$0xff] }
 0x16f   : > { %2518 = vmatpush.msra.mxu2 %v1435_v8  ;;  %v933_v53 = vpop.f32.mrf.mxu2  ;;  %v1026_v63 = vpop.f32.mrf.mxu1  ;;  %v2172_v8 = vld [vmem:[#allocation2 + $0x2228] sm:$0xff]  ;;  %v1082_v11 = vld [vmem:[#allocation2 + $0x18] sm:$0xff] }
 0x170   : > { %v1056_v22 = vadd.f32 %v1026_v63, %v960_v12  ;;  %v963_v34 = vadd.f32 %v933_v53, %v867_v16  ;;  %v2140_v12 = vld [vmem:[#allocation2 + $0x2128] sm:$0xff]  ;;  %v1850_v53 = vld [vmem:[#allocation2 + $0x1818] sm:$0xff]  ;;  %v1979_v63 = vld [vmem:[#allocation2 + $0x1c20] sm:$0xff] }
 0x171   : > { %2519 = vmatpush.msra.mxu2 %v1403_v7  ;;  %v1338_v7 = vld [vmem:[#allocation2 + $0x818] sm:$0xff] }
 0x172   : > { %v5159_v10 = vadd.f32 %v5124_v40, %v1056_v22  ;;  %v1306_v22 = vld [vmem:[#allocation2 + $0x718] sm:$0xff] }
 0x173   : > { %2520 = vmatpush.msra.mxu2 %v1371_v26  ;;  %v1818_v26 = vld [vmem:[#allocation2 + $0x1718] sm:$0xff] }
 0x174   : > { %2277 = vmatmul.f32.vlgmr.msrb.gmra.mxu0 %v5159_v10  ;;  %v1242_v16 = vld [vmem:[#allocation2 + $0x518] sm:$0xff] }
 0x175   : > { %2521 = vmatpush.msra.mxu2 %v1339_v28  ;;  %2503 = vmatpush.msrb.mxu0 %v2202_v29  ;;  %v1786_v28 = vld [vmem:[#allocation2 + $0x1618] sm:$0xff]  ;;  %v1915_v29 = vld [vmem:[#allocation2 + $0x1a20] sm:$0xff] }
 0x176   : > { %2415 = vmatmul.f32.vlgmr.msrb.gmra.mxu2 %v5159_v10 }
 0x177   : > { %2522 = vmatpush.msra.mxu2 %v1307_v39  ;;  %v1029_v13 = vpop.f32.mrf.mxu1  ;;  %v1049_v45 = vpop.f32.mrf.mxu2  ;;  %2504 = vmatpush.msrb.mxu0 %v2170_v3  ;;  %v1883_v39 = vld [vmem:[#allocation2 + $0x1920] sm:$0xff]  ;;  %v2013_v3 = vld [vmem:[#allocation2 + $0x1d30] sm:$0xff] }
 0x178   : > { %v1059_v41 = vadd.f32 %v1029_v13, %v963_v34  ;;  %v1057_v42 = vadd.f32 %v1049_v45, %v961_v18  ;;  %v1722_v18 = vld [vmem:[#allocation2 + $0x1418] sm:$0xff]  ;;  %v1851_v34 = vld [vmem:[#allocation2 + $0x1820] sm:$0xff] }
 0x179   : > { %2523 = vmatpush.msra.mxu2 %v1275_v36  ;;  %2505 = vmatpush.msrb.mxu0 %v2138_v62  ;;  %v1981_v36 = vld [vmem:[#allocation2 + $0x1c30] sm:$0xff]  ;;  %v1178_v62 = vld [vmem:[#allocation2 + $0x318] sm:$0xff]  ;;  %v1819_v45 = vld [vmem:[#allocation2 + $0x1720] sm:$0xff] }
 0x17a   : > { %v5168_v38 = vadd.f32 %v5139_v25, %v1059_v41  ;;  %v5171_v19 = vadd.f32 %v5124_v40, %v1057_v42  ;;  %v2042_v40 = vld [vmem:[#allocation2 + $0x1e18] sm:$0xff] }
 0x17b   : > { %2524 = vmatpush.msra.mxu2 %v1243_v44  ;;  %2506 = vmatpush.msrb.mxu0 %v2106_v17  ;;  %v1690_v13 = vld [vmem:[#allocation2 + $0x1318] sm:$0xff]  ;;  %v1787_v44 = vld [vmem:[#allocation2 + $0x1620] sm:$0xff]  ;;  %v1917_v17 = vld [vmem:[#allocation2 + $0x1a30] sm:$0xff] }
 0x17c   : > { %2280 = vmatmul.f32.gmra.mxu0 %v5168_v38  ;;  %4657 = vmatmul.msk.f32.vlgmr.msrb.gmra.mxu1 %vm2231_vm9, %v5171_v19  ;;  %v1146_v41 = vld [vmem:[#allocation2 + $0x218] sm:$0xff] }
 0x17d   : > { %4659 = vmatmul.msk.f32.vlgmr.msrb.gmra.mxu3 %vm2231_vm9, %v5171_v19  ;;  %2445 = vmatpush.msrb.mxu1 %v1562_v20  ;;  %v1658_v42 = vld [vmem:[#allocation2 + $0x1218] sm:$0xff] }
 0x17e   : > { %2468 = vmatpush.msrb.mxu3 %v2074_v55  ;;  %2525 = vmatpush.msra.mxu2 %v1211_v35  ;;  %v1114_v20 = vld [vmem:[#allocation2 + $0x118] sm:$0xff]  ;;  %v1755_v55 = vld [vmem:[#allocation2 + $0x1520] sm:$0xff]  ;;  %v1885_v35 = vld [vmem:[#allocation2 + $0x1930] sm:$0xff] }
 0x17f   : > { %2418 = vmatmul.f32.gmra.mxu2 %v5168_v38  ;;  %2446 = vmatpush.msrb.mxu1 %v1530_v56  ;;  %v1052_v5 = vpop.f32.mrf.mxu2  ;;  %v1594_v56 = vld [vmem:[#allocation2 + $0x1018] sm:$0xff] }
 0x180   : > { %2469 = vmatpush.msrb.mxu3 %v2042_v40  ;;  %2526 = vmatpush.msra.mxu2 %v1179_v21  ;;  %v1060_v60 = vadd.f32 %v1052_v5, %v964_v30  ;;  %v1723_v40 = vld [vmem:[#allocation2 + $0x1420] sm:$0xff]  ;;  %v1853_v21 = vld [vmem:[#allocation2 + $0x1830] sm:$0xff] }
 0x181   : > { %2447 = vmatpush.msrb.mxu1 %v1498_v49  ;;  %v2203_v30 = vld [vmem:[#allocation2 + $0x2320] sm:$0xff]  ;;  %v1564_v49 = vld [vmem:[#allocation2 + $0xf28] sm:$0xff] }
 0x182   : > { %v5181_v54 = vadd.f32 %v5139_v25, %v1060_v60  ;;  %2470 = vmatpush.msrb.mxu3 %v2010_v57  ;;  %2527 = vmatpush.msra.mxu2 %v1147_v58  ;;  %v1402_v25 = vld [vmem:[#allocation2 + $0xa18] sm:$0xff]  ;;  %v1691_v5 = vld [vmem:[#allocation2 + $0x1320] sm:$0xff]  ;;  %v1821_v57 = vld [vmem:[#allocation2 + $0x1730] sm:$0xff] }
 0x183   : > { %2448 = vmatpush.msrb.mxu1 %v1466_v24  ;;  %v2171_v58 = vld [vmem:[#allocation2 + $0x2220] sm:$0xff]  ;;  %v1532_v60 = vld [vmem:[#allocation2 + $0xe28] sm:$0xff] }
 0x184   : > { %2471 = vmatpush.msrb.mxu3 %v1978_v27  ;;  %2528 = vmatpush.msra.mxu2 %v1115_v33  ;;  %v1659_v24 = vld [vmem:[#allocation2 + $0x1220] sm:$0xff]  ;;  %v1789_v27 = vld [vmem:[#allocation2 + $0x1630] sm:$0xff] }
 0x185   : > { %4658 = vmatmul.msk.f32.gmra.mxu1 %vm2231_vm9, %v5181_v54  ;;  %4660 = vmatmul.msk.f32.gmra.mxu3 %vm2231_vm9, %v5181_v54  ;;  %v2139_v33 = vld [vmem:[#allocation2 + $0x2120] sm:$0xff] }
 0x186   : > { %2392 = vmatmul.f32.vlgmr.msra.gmra.mxu0 %v5130_v48  ;;  %2449 = vmatpush.msrb.mxu1 %v1434_v61  ;;  %v1500_v61 = vld [vmem:[#allocation2 + $0xd28] sm:$0xff] }
 0x187   : > { %2472 = vmatpush.msrb.mxu3 %v1946_v0  ;;  %2529 = vmatpush.msra.mxu2 %v1083_v1  ;;  %v1627_v0 = vld [vmem:[#allocation2 + $0x1120] sm:$0xff]  ;;  %v1757_v1 = vld [vmem:[#allocation2 + $0x1530] sm:$0xff] }
 0x188   : > { %2537 = vmatpush.msra.mxu0 %v2075_v14  ;;  %2450 = vmatpush.msrb.mxu1 %v1402_v25  ;;  %v2107_v14 = vld [vmem:[#allocation2 + $0x2020] sm:$0xff] }
 0x189   : > { %2641 = vmatpush.msrb.mxu2 %v2204_v2  ;;  %2473 = vmatpush.msrb.mxu3 %v1914_v4  ;;  %v1468_v2 = vld [vmem:[#allocation2 + $0xc28] sm:$0xff]  ;;  %v1595_v25 = vld [vmem:[#allocation2 + $0x1020] sm:$0xff] }
 0x18a   : > { %2530 = vmatmul.f32.vlgmr.msra.gmra.mxu2 %v5130_v48  ;;  %2538 = vmatpush.msra.mxu0 %v2043_v47  ;;  %v2076_v4 = vld [vmem:[#allocation2 + $0x1f28] sm:$0xff]  ;;  %v1725_v47 = vld [vmem:[#allocation2 + $0x1430] sm:$0xff] }
 0x18b   : > { %2642 = vmatpush.msrb.mxu2 %v2172_v8  ;;  %2451 = vmatpush.msrb.mxu1 %v1370_v52  ;;  %v1436_v8 = vld [vmem:[#allocation2 + $0xb28] sm:$0xff]  ;;  %v1565_v52 = vld [vmem:[#allocation2 + $0xf30] sm:$0xff] }
 0x18c   : > { %2474 = vmatpush.msrb.mxu3 %v1882_v37  ;;  %2539 = vmatpush.msra.mxu0 %v2011_v59  ;;  %v2044_v37 = vld [vmem:[#allocation2 + $0x1e28] sm:$0xff]  ;;  %v1693_v59 = vld [vmem:[#allocation2 + $0x1330] sm:$0xff] }
 0x18d   : > { %2643 = vmatpush.msrb.mxu2 %v2140_v12  ;;  %2452 = vmatpush.msrb.mxu1 %v1338_v7  ;;  %v1404_v12 = vld [vmem:[#allocation2 + $0xa28] sm:$0xff]  ;;  %v1533_v7 = vld [vmem:[#allocation2 + $0xe30] sm:$0xff] }
 0x18e   : > { %2475 = vmatpush.msrb.mxu3 %v1850_v53  ;;  %2540 = vmatpush.msra.mxu0 %v1979_v63  ;;  %v2012_v53 = vld [vmem:[#allocation2 + $0x1d28] sm:$0xff]  ;;  %v1661_v63 = vld [vmem:[#allocation2 + $0x1230] sm:$0xff] }
 0x18f   : > { %2644 = vmatpush.msrb.mxu2 %v2108_v15  ;;  %2346 = vmatmul.f32.vlgmr.msra.gmra.mxu1 %v5159_v10  ;;  %v1372_v15 = vld [vmem:[#allocation2 + $0x928] sm:$0xff] }
 0x190   : > { %2395 = vmatmul.f32.gmra.mxu0 %v5147_v6  ;;  %4661 = vmatmul.msk.f32.vlgmr.msra.gmra.mxu3 %vm2231_vm9, %v5171_v19 }
 0x191   : > { %2453 = vmatpush.msrb.mxu1 %v1306_v22  ;;  %2476 = vmatpush.msrb.mxu3 %v1818_v26  ;;  %v1501_v22 = vld [vmem:[#allocation2 + $0xd30] sm:$0xff]  ;;  %v1980_v26 = vld [vmem:[#allocation2 + $0x1c28] sm:$0xff] }
 0x192   : > { %2541 = vmatpush.msra.mxu0 %v1947_v32  ;;  %2675 = vmatpush.msra.mxu2 %v2077_v46  ;;  %v1629_v32 = vld [vmem:[#allocation2 + $0x1130] sm:$0xff]  ;;  %v1340_v46 = vld [vmem:[#allocation2 + $0x828] sm:$0xff] }
 0x193   : > { %2454 = vmatpush.msrb.mxu1 %v1274_v9  ;;  %2477 = vmatpush.msrb.mxu3 %v1786_v28  ;;  %v1469_v9 = vld [vmem:[#allocation2 + $0xc30] sm:$0xff]  ;;  %v1948_v28 = vld [vmem:[#allocation2 + $0x1b28] sm:$0xff] }
 0x194   : > { %2533 = vmatmul.f32.gmra.mxu2 %v5147_v6  ;;  %2542 = vmatpush.msra.mxu0 %v1915_v29  ;;  %v1597_v29 = vld [vmem:[#allocation2 + $0x1030] sm:$0xff] }
 0x195   : > { %2676 = vmatpush.msra.mxu2 %v2045_v31  ;;  %2455 = vmatpush.msrb.mxu1 %v1242_v16  ;;  %v1308_v31 = vld [vmem:[#allocation2 + $0x728] sm:$0xff]  ;;  %v1437_v16 = vld [vmem:[#allocation2 + $0xb30] sm:$0xff] }
 0x196   : > { %2478 = vmatpush.msrb.mxu3 %v1754_v23  ;;  %2543 = vmatpush.msra.mxu0 %v1883_v39  ;;  %v1567_v23 = vld [vmem:[#allocation2 + $0xf40] sm:$0xff]  ;;  %v1276_v39 = vld [vmem:[#allocation2 + $0x628] sm:$0xff] }
 0x197   : > { %2677 = vmatpush.msra.mxu2 %v2013_v3  ;;  %2456 = vmatpush.msrb.mxu1 %v1210_v51  ;;  %v1916_v3 = vld [vmem:[#allocation2 + $0x1a28] sm:$0xff]  ;;  %v1405_v51 = vld [vmem:[#allocation2 + $0xa30] sm:$0xff] }
 0x198   : > { %2479 = vmatpush.msrb.mxu3 %v1722_v18  ;;  %2544 = vmatpush.msra.mxu0 %v1851_v34  ;;  %v1535_v18 = vld [vmem:[#allocation2 + $0xe40] sm:$0xff]  ;;  %v1244_v34 = vld [vmem:[#allocation2 + $0x528] sm:$0xff] }
 0x199   : > { %2678 = vmatpush.msra.mxu2 %v1981_v36  ;;  %2349 = vmatmul.f32.gmra.mxu1 %v5168_v38  ;;  %v1884_v36 = vld [vmem:[#allocation2 + $0x1928] sm:$0xff] }
 0x19a   : > { %4662 = vmatmul.msk.f32.gmra.mxu3 %vm2231_vm9, %v5181_v54  ;;  %2457 = vmatpush.msrb.mxu1 %v1178_v62  ;;  %v1373_v62 = vld [vmem:[#allocation2 + $0x930] sm:$0xff] }
 0x19b   : > { %2480 = vmatpush.msrb.mxu3 %v1690_v13  ;;  %4663 = vmatmul.msk.f32.vlgmr.msrb.gmra.mxu0 %vm2231_vm9, %v5171_v19  ;;  %v1503_v13 = vld [vmem:[#allocation2 + $0xd40] sm:$0xff] }
 0x19c   : > { %2545 = vmatpush.msra.mxu0 %v1819_v45  ;;  %2679 = vmatpush.msra.mxu2 %v1949_v43  ;;  %v1212_v45 = vld [vmem:[#allocation2 + $0x428] sm:$0xff] }
 0x19d   : > { %2458 = vmatpush.msrb.mxu1 %v1146_v41  ;;  %2481 = vmatpush.msrb.mxu3 %v1658_v42  ;;  %v1852_v43 = vld [vmem:[#allocation2 + $0x1828] sm:$0xff]  ;;  %v1341_v41 = vld [vmem:[#allocation2 + $0x830] sm:$0xff]  ;;  %v1471_v42 = vld [vmem:[#allocation2 + $0xc40] sm:$0xff] }
 0x19e   : > { %2546 = vmatpush.msra.mxu0 %v1787_v44  ;;  %4667 = vmatmul.msk.f32.vlgmr.msrb.gmra.mxu2 %vm2231_vm9, %v5171_v19  ;;  %v1180_v44 = vld [vmem:[#allocation2 + $0x328] sm:$0xff] }
 0x19f   : > { %2680 = vmatpush.msra.mxu2 %v1917_v17  ;;  %2459 = vmatpush.msrb.mxu1 %v1114_v20  ;;  %v1820_v17 = vld [vmem:[#allocation2 + $0x1728] sm:$0xff]  ;;  %v1309_v20 = vld [vmem:[#allocation2 + $0x730] sm:$0xff] }
 0x1a0   : > { %2482 = vmatpush.msrb.mxu3 %v1626_v50  ;;  %2547 = vmatpush.msra.mxu0 %v1755_v55  ;;  %v1439_v50 = vld [vmem:[#allocation2 + $0xb40] sm:$0xff]  ;;  %v1788_v55 = vld [vmem:[#allocation2 + $0x1628] sm:$0xff] }
 0x1a1   : > { %2681 = vmatpush.msra.mxu2 %v1885_v35  ;;  %2460 = vmatpush.msrb.mxu1 %v1082_v11  ;;  %v1148_v35 = vld [vmem:[#allocation2 + $0x228] sm:$0xff]  ;;  %v1277_v11 = vld [vmem:[#allocation2 + $0x630] sm:$0xff] }
 0x1a2   : > { %2483 = vmatpush.msrb.mxu3 %v1594_v56  ;;  %2548 = vmatpush.msra.mxu0 %v1723_v40  ;;  %v1407_v56 = vld [vmem:[#allocation2 + $0xa40] sm:$0xff]  ;;  %v1756_v40 = vld [vmem:[#allocation2 + $0x1528] sm:$0xff] }
 0x1a3   : > { %2682 = vmatpush.msra.mxu2 %v1853_v21  ;;  %2572 = vmatpush.msra.mxu1 %v2203_v30  ;;  %v1116_v21 = vld [vmem:[#allocation2 + $0x128] sm:$0xff]  ;;  %v1245_v30 = vld [vmem:[#allocation2 + $0x530] sm:$0xff] }
 0x1a4   : > { %2583 = vmatpush.msra.mxu3 %v1564_v49  ;;  %2461 = vmatmul.f32.vlgmr.msrb.gmra.mxu1 %v5130_v48  ;;  %v1375_v49 = vld [vmem:[#allocation2 + $0x940] sm:$0xff] }
 0x1a5   : > { %2484 = vmatmul.f32.vlgmr.msrb.gmra.mxu3 %v5159_v10  ;;  %4664 = vmatmul.msk.f32.gmra.mxu0 %vm2231_vm9, %v5181_v54 }
 0x1a6   : > { %2549 = vmatpush.msra.mxu0 %v1691_v5  ;;  %2683 = vmatpush.msra.mxu2 %v1821_v57  ;;  %v1724_v5 = vld [vmem:[#allocation2 + $0x1428] sm:$0xff] }
 0x1a7   : > { %2573 = vmatpush.msra.mxu1 %v2171_v58  ;;  %2584 = vmatpush.msra.mxu3 %v1532_v60  ;;  %v1084_v57 = vld [vmem:[#allocation2 + $0x28] sm:$0xff]  ;;  %v1213_v58 = vld [vmem:[#allocation2 + $0x430] sm:$0xff]  ;;  %v1343_v60 = vld [vmem:[#allocation2 + $0x840] sm:$0xff] }
 0x1a8   : > { %2550 = vmatpush.msra.mxu0 %v1659_v24  ;;  %4668 = vmatmul.msk.f32.gmra.mxu2 %vm2231_vm9, %v5181_v54  ;;  %v1692_v24 = vld [vmem:[#allocation2 + $0x1328] sm:$0xff] }
 0x1a9   : > { %2684 = vmatpush.msra.mxu2 %v1789_v27  ;;  %2574 = vmatpush.msra.mxu1 %v2139_v33  ;;  %v2205_v27 = vld [vmem:[#allocation2 + $0x2330] sm:$0xff] }
 0x1aa   : > { %2585 = vmatpush.msra.mxu3 %v1500_v61  ;;  %2551 = vmatpush.msra.mxu0 %v1627_v0  ;;  %v1181_v33 = vld [vmem:[#allocation2 + $0x330] sm:$0xff]  ;;  %v1311_v61 = vld [vmem:[#allocation2 + $0x740] sm:$0xff]  ;;  %v1660_v0 = vld [vmem:[#allocation2 + $0x1228] sm:$0xff] }
 0x1ab   : > { %2685 = vmatpush.msra.mxu2 %v1757_v1  ;;  %2575 = vmatpush.msra.mxu1 %v2107_v14  ;;  %v2173_v1 = vld [vmem:[#allocation2 + $0x2230] sm:$0xff] }
 0x1ac   : > { %2586 = vmatpush.msra.mxu3 %v1468_v2  ;;  %2552 = vmatpush.msra.mxu0 %v1595_v25  ;;  %v1149_v14 = vld [vmem:[#allocation2 + $0x230] sm:$0xff]  ;;  %v1279_v2 = vld [vmem:[#allocation2 + $0x640] sm:$0xff]  ;;  %v1628_v25 = vld [vmem:[#allocation2 + $0x1128] sm:$0xff] }
 0x1ad   : > { %2606 = vmatpush.msrb.mxu1 %v2076_v4  ;;  %2686 = vmatpush.msra.mxu2 %v1725_v47  ;;  %v2141_v4 = vld [vmem:[#allocation2 + $0x2130] sm:$0xff] }
 0x1ae   : > { %2587 = vmatpush.msra.mxu3 %v1436_v8  ;;  %2652 = vmatpush.msrb.mxu0 %v1565_v52  ;;  %v1117_v47 = vld [vmem:[#allocation2 + $0x130] sm:$0xff]  ;;  %v1247_v8 = vld [vmem:[#allocation2 + $0x540] sm:$0xff]  ;;  %v1596_v52 = vld [vmem:[#allocation2 + $0x1028] sm:$0xff] }
 0x1af   : > { %2464 = vmatmul.f32.gmra.mxu1 %v5147_v6  ;;  %2487 = vmatmul.f32.gmra.mxu3 %v5168_v38 }
 0x1b0   : > { %2553 = vmatmul.f32.vlgmr.msra.gmra.mxu0 %v5159_v10  ;;  %2607 = vmatpush.msrb.mxu1 %v2044_v37  ;;  %v2109_v37 = vld [vmem:[#allocation2 + $0x2030] sm:$0xff] }
 0x1b1   : > { %2687 = vmatpush.msra.mxu2 %v1693_v59  ;;  %2588 = vmatpush.msra.mxu3 %v1404_v12  ;;  %v1085_v59 = vld [vmem:[#allocation2 + $0x30] sm:$0xff]  ;;  %v1566_v12 = vld [vmem:[#allocation2 + $0xf38] sm:$0xff] }
 0x1b2   : > { %2653 = vmatpush.msrb.mxu0 %v1533_v7  ;;  %2608 = vmatpush.msrb.mxu1 %v2012_v53  ;;  %v2078_v7 = vld [vmem:[#allocation2 + $0x1f38] sm:$0xff]  ;;  %v1215_v53 = vld [vmem:[#allocation2 + $0x440] sm:$0xff] }
 0x1b3   : > { %2688 = vmatpush.msra.mxu2 %v1661_v63  ;;  %2589 = vmatpush.msra.mxu3 %v1372_v15  ;;  %v1534_v63 = vld [vmem:[#allocation2 + $0xe38] sm:$0xff] }
 0x1b4   : > { %2654 = vmatpush.msrb.mxu0 %v1501_v22  ;;  %2609 = vmatpush.msrb.mxu1 %v1980_v26  ;;  %v2206_v15 = vld [vmem:[#allocation2 + $0x2338] sm:$0xff]  ;;  %v1183_v26 = vld [vmem:[#allocation2 + $0x340] sm:$0xff] }
 0x1b5   : > { %2689 = vmatpush.msra.mxu2 %v1629_v32  ;;  %2590 = vmatpush.msra.mxu3 %v1340_v46  ;;  %v2046_v22 = vld [vmem:[#allocation2 + $0x1e38] sm:$0xff] }
 0x1b6   : > { %2655 = vmatpush.msrb.mxu0 %v1469_v9  ;;  %2610 = vmatpush.msrb.mxu1 %v1948_v28  ;;  %v1502_v32 = vld [vmem:[#allocation2 + $0xd38] sm:$0xff]  ;;  %v1151_v28 = vld [vmem:[#allocation2 + $0x240] sm:$0xff] }
 0x1b7   : > { %2690 = vmatpush.msra.mxu2 %v1597_v29  ;;  %2591 = vmatpush.msra.mxu3 %v1308_v31  ;;  %v2174_v46 = vld [vmem:[#allocation2 + $0x2238] sm:$0xff] }
 0x1b8   : > { %2656 = vmatpush.msrb.mxu0 %v1437_v16  ;;  %2691 = vmatmul.f32.vlgmr.msra.gmra.mxu2 %v5159_v10  ;;  %v2014_v9 = vld [vmem:[#allocation2 + $0x1d38] sm:$0xff] }
 0x1b9   : > { %2790 = vmatpush.msrb.mxu2 %v1567_v23  ;;  %2556 = vmatmul.f32.gmra.mxu0 %v5168_v38  ;;  %v1470_v29 = vld [vmem:[#allocation2 + $0xc38] sm:$0xff]  ;;  %v1119_v23 = vld [vmem:[#allocation2 + $0x140] sm:$0xff] }
 0x1ba   : > { %4665 = vmatmul.msk.f32.vlgmr.msra.gmra.mxu1 %vm2231_vm9, %v5171_v19  ;;  %2592 = vmatpush.msra.mxu3 %v1276_v39  ;;  %v2142_v31 = vld [vmem:[#allocation2 + $0x2138] sm:$0xff] }
 0x1bb   : > { %2611 = vmatpush.msrb.mxu1 %v1916_v3  ;;  %2657 = vmatpush.msrb.mxu0 %v1405_v51  ;;  %v1982_v16 = vld [vmem:[#allocation2 + $0x1c38] sm:$0xff] }
 0x1bc   : > { %2791 = vmatpush.msrb.mxu2 %v1535_v18  ;;  %2593 = vmatpush.msra.mxu3 %v1244_v34  ;;  %v2110_v39 = vld [vmem:[#allocation2 + $0x2038] sm:$0xff]  ;;  %v1087_v18 = vld [vmem:[#allocation2 + $0x40] sm:$0xff] }
 0x1bd   : > { %2612 = vmatpush.msrb.mxu1 %v1884_v36  ;;  %2658 = vmatpush.msrb.mxu0 %v1373_v62  ;;  %v1438_v3 = vld [vmem:[#allocation2 + $0xb38] sm:$0xff]  ;;  %v2079_v34 = vld [vmem:[#allocation2 + $0x1f40] sm:$0xff]  ;;  %v2208_v36 = vld [vmem:[#allocation2 + $0x2348] sm:$0xff] }
 0x1be   : > { %2792 = vmatpush.msrb.mxu2 %v1503_v13  ;;  %2594 = vmatpush.msra.mxu3 %v1212_v45  ;;  %v1950_v51 = vld [vmem:[#allocation2 + $0x1b38] sm:$0xff]  ;;  %v2047_v45 = vld [vmem:[#allocation2 + $0x1e40] sm:$0xff] }
 0x1bf   : > { %2613 = vmatpush.msrb.mxu1 %v1852_v43  ;;  %2659 = vmatpush.msrb.mxu0 %v1341_v41  ;;  %v1406_v62 = vld [vmem:[#allocation2 + $0xa38] sm:$0xff]  ;;  %v2176_v43 = vld [vmem:[#allocation2 + $0x2248] sm:$0xff] }
 0x1c0   : > { %2793 = vmatpush.msrb.mxu2 %v1471_v42  ;;  %2595 = vmatpush.msra.mxu3 %v1180_v44  ;;  %v1918_v13 = vld [vmem:[#allocation2 + $0x1a38] sm:$0xff]  ;;  %v2015_v44 = vld [vmem:[#allocation2 + $0x1d40] sm:$0xff] }
 0x1c1   : > { %2614 = vmatpush.msrb.mxu1 %v1820_v17  ;;  %2660 = vmatpush.msrb.mxu0 %v1309_v20  ;;  %v1374_v41 = vld [vmem:[#allocation2 + $0x938] sm:$0xff]  ;;  %v2144_v17 = vld [vmem:[#allocation2 + $0x2148] sm:$0xff] }
 0x1c2   : > { %2694 = vmatmul.f32.gmra.mxu2 %v5168_v38  ;;  %4666 = vmatmul.msk.f32.gmra.mxu1 %vm2231_vm9, %v5181_v54  ;;  %v1886_v42 = vld [vmem:[#allocation2 + $0x1938] sm:$0xff] }
 0x1c3   : > { %2794 = vmatpush.msrb.mxu2 %v1439_v50  ;;  %2615 = vmatpush.msrb.mxu1 %v1788_v55  ;;  %v1342_v20 = vld [vmem:[#allocation2 + $0x838] sm:$0xff]  ;;  %v1983_v55 = vld [vmem:[#allocation2 + $0x1c40] sm:$0xff] }
 0x1c4   : > { %2596 = vmatpush.msra.mxu3 %v1148_v35  ;;  %2661 = vmatpush.msrb.mxu0 %v1277_v11  ;;  %v1854_v50 = vld [vmem:[#allocation2 + $0x1838] sm:$0xff]  ;;  %v2112_v35 = vld [vmem:[#allocation2 + $0x2048] sm:$0xff] }
 0x1c5   : > { %2795 = vmatpush.msrb.mxu2 %v1407_v56  ;;  %2616 = vmatpush.msrb.mxu1 %v1756_v40  ;;  %v1310_v11 = vld [vmem:[#allocation2 + $0x738] sm:$0xff]  ;;  %v1951_v40 = vld [vmem:[#allocation2 + $0x1b40] sm:$0xff] }
 0x1c6   : > { %2597 = vmatpush.msra.mxu3 %v1116_v21  ;;  %2662 = vmatpush.msrb.mxu0 %v1245_v30  ;;  %v1822_v56 = vld [vmem:[#allocation2 + $0x1738] sm:$0xff]  ;;  %v2081_v21 = vld [vmem:[#allocation2 + $0x1f50] sm:$0xff] }
 0x1c7   : > { %2796 = vmatpush.msrb.mxu2 %v1375_v49  ;;  %2617 = vmatpush.msrb.mxu1 %v1724_v5  ;;  %v1278_v30 = vld [vmem:[#allocation2 + $0x638] sm:$0xff]  ;;  %v1919_v5 = vld [vmem:[#allocation2 + $0x1a40] sm:$0xff] }
 0x1c8   : > { %2598 = vmatpush.msra.mxu3 %v1084_v57  ;;  %2663 = vmatpush.msrb.mxu0 %v1213_v58  ;;  %v1790_v49 = vld [vmem:[#allocation2 + $0x1638] sm:$0xff]  ;;  %v2049_v57 = vld [vmem:[#allocation2 + $0x1e50] sm:$0xff] }
 0x1c9   : > { %2797 = vmatpush.msrb.mxu2 %v1343_v60  ;;  %2599 = vmatmul.f32.vlgmr.msra.gmra.mxu3 %v5130_v48  ;;  %v1246_v58 = vld [vmem:[#allocation2 + $0x538] sm:$0xff] }
 0x1ca   : > { %2618 = vmatpush.msrb.mxu1 %v1692_v24  ;;  %2710 = vmatpush.msrb.mxu3 %v2205_v27  ;;  %v1758_v60 = vld [vmem:[#allocation2 + $0x1538] sm:$0xff]  ;;  %v1887_v24 = vld [vmem:[#allocation2 + $0x1940] sm:$0xff]  ;;  %v2017_v27 = vld [vmem:[#allocation2 + $0x1d50] sm:$0xff] }
 0x1cb   : > { %2664 = vmatpush.msrb.mxu0 %v1181_v33  ;;  %2798 = vmatpush.msrb.mxu2 %v1311_v61  ;;  %v1214_v33 = vld [vmem:[#allocation2 + $0x438] sm:$0xff] }
 0x1cc   : > { %2619 = vmatpush.msrb.mxu1 %v1660_v0  ;;  %2711 = vmatpush.msrb.mxu3 %v2173_v1  ;;  %v1726_v61 = vld [vmem:[#allocation2 + $0x1438] sm:$0xff]  ;;  %v1855_v0 = vld [vmem:[#allocation2 + $0x1840] sm:$0xff]  ;;  %v1985_v1 = vld [vmem:[#allocation2 + $0x1c50] sm:$0xff] }
 0x1cd   : > { %2665 = vmatpush.msrb.mxu0 %v1149_v14  ;;  %2799 = vmatpush.msrb.mxu2 %v1279_v2  ;;  %v1182_v14 = vld [vmem:[#allocation2 + $0x338] sm:$0xff] }
 0x1ce   : > { %2620 = vmatpush.msrb.mxu1 %v1628_v25  ;;  %2712 = vmatpush.msrb.mxu3 %v2141_v4  ;;  %v1694_v2 = vld [vmem:[#allocation2 + $0x1338] sm:$0xff]  ;;  %v1823_v25 = vld [vmem:[#allocation2 + $0x1740] sm:$0xff]  ;;  %v1953_v4 = vld [vmem:[#allocation2 + $0x1b50] sm:$0xff] }
 0x1cf   : > { %2666 = vmatpush.msrb.mxu0 %v1117_v47  ;;  %2800 = vmatpush.msrb.mxu2 %v1247_v8  ;;  %v1150_v8 = vld [vmem:[#allocation2 + $0x238] sm:$0xff] }
 0x1d0   : > { %2621 = vmatpush.msrb.mxu1 %v1596_v52  ;;  %2713 = vmatpush.msrb.mxu3 %v2109_v37  ;;  %v1662_v52 = vld [vmem:[#allocation2 + $0x1238] sm:$0xff]  ;;  %v1791_v37 = vld [vmem:[#allocation2 + $0x1640] sm:$0xff] }
 0x1d1   : > { %2622 = vmatmul.f32.vlgmr.msrb.gmra.mxu1 %v5159_v10  ;;  %2667 = vmatpush.msrb.mxu0 %v1085_v59  ;;  %v1921_v59 = vld [vmem:[#allocation2 + $0x1a50] sm:$0xff] }
 0x1d2   : > { %2721 = vmatpush.msra.mxu1 %v1566_v12  ;;  %2744 = vmatpush.msra.mxu3 %v2078_v7  ;;  %v1118_v12 = vld [vmem:[#allocation2 + $0x138] sm:$0xff] }
 0x1d3   : > { %2801 = vmatpush.msrb.mxu2 %v1215_v53  ;;  %2602 = vmatmul.f32.gmra.mxu3 %v5147_v6  ;;  %v1630_v7 = vld [vmem:[#allocation2 + $0x1138] sm:$0xff]  ;;  %v1759_v53 = vld [vmem:[#allocation2 + $0x1540] sm:$0xff] }
 0x1d4   : > { %2668 = vmatmul.f32.vlgmr.msrb.gmra.mxu0 %v5130_v48  ;;  %2722 = vmatpush.msra.mxu1 %v1534_v63  ;;  %v1889_v63 = vld [vmem:[#allocation2 + $0x1950] sm:$0xff] }
 0x1d5   : > { %2779 = vmatpush.msra.mxu0 %v2206_v15  ;;  %2745 = vmatpush.msra.mxu3 %v2046_v22  ;;  %v1086_v15 = vld [vmem:[#allocation2 + $0x38] sm:$0xff] }
 0x1d6   : > { %2802 = vmatpush.msrb.mxu2 %v1183_v26  ;;  %2723 = vmatpush.msra.mxu1 %v1502_v32  ;;  %v1598_v22 = vld [vmem:[#allocation2 + $0x1038] sm:$0xff]  ;;  %v1727_v26 = vld [vmem:[#allocation2 + $0x1440] sm:$0xff]  ;;  %v1857_v32 = vld [vmem:[#allocation2 + $0x1850] sm:$0xff] }
 0x1d7   : > { %2780 = vmatpush.msra.mxu0 %v2174_v46  ;;  %2746 = vmatpush.msra.mxu3 %v2014_v9  ;;  %v2207_v9 = vld [vmem:[#allocation2 + $0x2340] sm:$0xff] }
 0x1d8   : > { %2803 = vmatpush.msrb.mxu2 %v1151_v28  ;;  %2724 = vmatpush.msra.mxu1 %v1470_v29  ;;  %v1568_v28 = vld [vmem:[#allocation2 + $0xf48] sm:$0xff]  ;;  %v1695_v29 = vld [vmem:[#allocation2 + $0x1340] sm:$0xff] }
 0x1d9   : > { %2781 = vmatpush.msra.mxu0 %v2142_v31  ;;  %2747 = vmatpush.msra.mxu3 %v1982_v16  ;;  %v1825_v31 = vld [vmem:[#allocation2 + $0x1750] sm:$0xff]  ;;  %v2175_v16 = vld [vmem:[#allocation2 + $0x2240] sm:$0xff] }
 0x1da   : > { %2804 = vmatpush.msrb.mxu2 %v1119_v23  ;;  %2625 = vmatmul.f32.gmra.mxu1 %v5168_v38  ;;  %v1536_v23 = vld [vmem:[#allocation2 + $0xe48] sm:$0xff] }
 0x1db   : > { %2782 = vmatpush.msra.mxu0 %v2110_v39  ;;  %2725 = vmatpush.msra.mxu1 %v1438_v3 }
 0x1dc   : > { %2748 = vmatpush.msra.mxu3 %v1950_v51  ;;  %2805 = vmatpush.msrb.mxu2 %v1087_v18  ;;  %v1663_v51 = vld [vmem:[#allocation2 + $0x1240] sm:$0xff] }
 0x1dd   : > { %2813 = vmatpush.msrb.mxu0 %v2079_v34  ;;  %4669 = vmatmul.msk.f32.vlgmr.msrb.gmra.mxu3 %vm2231_vm9, %v5171_v19  ;;  %v1793_v34 = vld [vmem:[#allocation2 + $0x1650] sm:$0xff] }
 0x1de   : > { %2671 = vmatmul.f32.gmra.mxu0 %v5147_v6  ;;  %2806 = vmatmul.f32.vlgmr.msrb.gmra.mxu2 %v5130_v48 }
 0x1df   : > { %2917 = vmatpush.msra.mxu2 %v2208_v36  ;;  %2726 = vmatpush.msra.mxu1 %v1406_v62  ;;  %v2143_v36 = vld [vmem:[#allocation2 + $0x2140] sm:$0xff] }
 0x1e0   : > { %2749 = vmatpush.msra.mxu3 %v1918_v13  ;;  %2814 = vmatpush.msrb.mxu0 %v2047_v45  ;;  %v1504_v13 = vld [vmem:[#allocation2 + $0xd48] sm:$0xff]  ;;  %v1631_v45 = vld [vmem:[#allocation2 + $0x1140] sm:$0xff] }
 0x1e1   : > { %2918 = vmatpush.msra.mxu2 %v2176_v43  ;;  %2727 = vmatpush.msra.mxu1 %v1374_v41  ;;  %v1761_v43 = vld [vmem:[#allocation2 + $0x1550] sm:$0xff]  ;;  %v2111_v41 = vld [vmem:[#allocation2 + $0x2040] sm:$0xff] }
 0x1e2   : > { %2750 = vmatpush.msra.mxu3 %v1886_v42  ;;  %2815 = vmatpush.msrb.mxu0 %v2015_v44  ;;  %v1472_v42 = vld [vmem:[#allocation2 + $0xc48] sm:$0xff]  ;;  %v1599_v44 = vld [vmem:[#allocation2 + $0x1040] sm:$0xff] }
 0x1e3   : > { %2919 = vmatpush.msra.mxu2 %v2144_v17  ;;  %2728 = vmatpush.msra.mxu1 %v1342_v20  ;;  %v2080_v20 = vld [vmem:[#allocation2 + $0x1f48] sm:$0xff] }
 0x1e4   : > { %2751 = vmatpush.msra.mxu3 %v1854_v50  ;;  %2816 = vmatpush.msrb.mxu0 %v1983_v55  ;;  %v1729_v50 = vld [vmem:[#allocation2 + $0x1450] sm:$0xff] }
 0x1e5   : > { %2920 = vmatpush.msra.mxu2 %v2112_v35  ;;  %2729 = vmatpush.msra.mxu1 %v1310_v11  ;;  %v1440_v35 = vld [vmem:[#allocation2 + $0xb48] sm:$0xff] }
 0x1e6   : > { %2752 = vmatpush.msra.mxu3 %v1822_v56  ;;  %2817 = vmatpush.msrb.mxu0 %v1951_v40  ;;  %v1569_v56 = vld [vmem:[#allocation2 + $0xf50] sm:$0xff]  ;;  %v2048_v40 = vld [vmem:[#allocation2 + $0x1e48] sm:$0xff] }
 0x1e7   : > { %2951 = vmatpush.msrb.mxu2 %v2081_v21  ;;  %4670 = vmatmul.msk.f32.gmra.mxu3 %vm2231_vm9, %v5181_v54 }
 0x1e8   : > { %4671 = vmatmul.msk.f32.vlgmr.msra.gmra.mxu0 %vm2231_vm9, %v5171_v19  ;;  %2809 = vmatmul.f32.gmra.mxu2 %v5147_v6 }
 0x1e9   : > { %2730 = vmatpush.msra.mxu1 %v1278_v30  ;;  %2753 = vmatpush.msra.mxu3 %v1790_v49  ;;  %v2255_v47 = vpop.f32.mrf.mxu3  ;;  %v5246_v17 = vpop.f32.mrf.mxu2  ;;  %v1697_v30 = vld [vmem:[#allocation2 + $0x1350] sm:$0xff]  ;;  %v1408_v49 = vld [vmem:[#allocation2 + $0xa48] sm:$0xff] }
 0x1ea   : > { %2818 = vmatpush.msrb.mxu0 %v1919_v5  ;;  %2952 = vmatpush.msrb.mxu2 %v2049_v57  ;;  %v1537_v57 = vld [vmem:[#allocation2 + $0xe50] sm:$0xff] }
 0x1eb   : > { %2731 = vmatpush.msra.mxu1 %v1246_v58  ;;  %2754 = vmatpush.msra.mxu3 %v1758_v60  ;;  %v2016_v58 = vld [vmem:[#allocation2 + $0x1d48] sm:$0xff] }
 0x1ec   : > { %2819 = vmatpush.msrb.mxu0 %v1887_v24  ;;  %2953 = vmatpush.msrb.mxu2 %v2017_v27  ;;  %v1665_v24 = vld [vmem:[#allocation2 + $0x1250] sm:$0xff]  ;;  %v1376_v27 = vld [vmem:[#allocation2 + $0x948] sm:$0xff] }
 0x1ed   : > { %2732 = vmatpush.msra.mxu1 %v1214_v33  ;;  %2755 = vmatpush.msra.mxu3 %v1726_v61  ;;  %v1505_v33 = vld [vmem:[#allocation2 + $0xd50] sm:$0xff]  ;;  %v1984_v61 = vld [vmem:[#allocation2 + $0x1c48] sm:$0xff] }
 0x1ee   : > { %2820 = vmatpush.msrb.mxu0 %v1855_v0  ;;  %2954 = vmatpush.msrb.mxu2 %v1985_v1  ;;  %v1633_v0 = vld [vmem:[#allocation2 + $0x1150] sm:$0xff]  ;;  %v1344_v1 = vld [vmem:[#allocation2 + $0x848] sm:$0xff] }
 0x1ef   : > { %2733 = vmatpush.msra.mxu1 %v1182_v14  ;;  %2756 = vmatpush.msra.mxu3 %v1694_v2  ;;  %v1473_v14 = vld [vmem:[#allocation2 + $0xc50] sm:$0xff]  ;;  %v1952_v2 = vld [vmem:[#allocation2 + $0x1b48] sm:$0xff] }
 0x1f0   : > { %2821 = vmatpush.msrb.mxu0 %v1823_v25  ;;  %2955 = vmatpush.msrb.mxu2 %v1953_v4  ;;  %v1601_v4 = vld [vmem:[#allocation2 + $0x1050] sm:$0xff] }
 0x1f1   : > { %4672 = vmatmul.msk.f32.gmra.mxu0 %vm2231_vm9, %v5181_v54  ;;  %4675 = vmatmul.msk.f32.vlgmr.msra.gmra.mxu2 %vm2231_vm9, %v5171_v19  ;;  %v2278_v46 = vpop.f32.mrf.mxu0  ;;  %v2258_v39 = vpop.f32.mrf.mxu3 }
 0x1f2   : > { %2734 = vmatpush.msra.mxu1 %v1150_v8  ;;  %2757 = vmatpush.msra.mxu3 %v1662_v52  ;;  %v2279_v3 = vadd.f32 %v2278_v46, %v2255_v47  ;;  %v5254_v25 = vpop.f32.mrf.mxu2  ;;  %v1312_v47 = vld [vmem:[#allocation2 + $0x748] sm:$0xff]  ;;  %v1377_v46 = vld [vmem:[#allocation2 + $0x950] sm:$0xff] }
 0x1f3   : > { %2822 = vmatpush.msrb.mxu0 %v1791_v37  ;;  %2956 = vmatpush.msrb.mxu2 %v1921_v59  ;;  %v1441_v37 = vld [vmem:[#allocation2 + $0xb50] sm:$0xff]  ;;  %v1571_v59 = vld [vmem:[#allocation2 + $0xf60] sm:$0xff] }
 0x1f4   : > { %2735 = vmatpush.msra.mxu1 %v1118_v12  ;;  %2758 = vmatpush.msra.mxu3 %v1630_v7  ;;  %v1920_v12 = vld [vmem:[#allocation2 + $0x1a48] sm:$0xff] }
 0x1f5   : > { %2823 = vmatpush.msrb.mxu0 %v1759_v53  ;;  %2957 = vmatpush.msrb.mxu2 %v1889_v63  ;;  %v1280_v7 = vld [vmem:[#allocation2 + $0x648] sm:$0xff]  ;;  %v1409_v53 = vld [vmem:[#allocation2 + $0xa50] sm:$0xff] }
 0x1f6   : > { %2736 = vmatpush.msra.mxu1 %v1086_v15  ;;  %2759 = vmatpush.msra.mxu3 %v1598_v22  ;;  %v1539_v15 = vld [vmem:[#allocation2 + $0xe60] sm:$0xff]  ;;  %v1888_v22 = vld [vmem:[#allocation2 + $0x1948] sm:$0xff] }
 0x1f7   : > { %2824 = vmatpush.msrb.mxu0 %v1727_v26  ;;  %2958 = vmatpush.msrb.mxu2 %v1857_v32  ;;  %v1248_v32 = vld [vmem:[#allocation2 + $0x548] sm:$0xff] }
 0x1f8   : > { %2737 = vmatmul.f32.vlgmr.msra.gmra.mxu1 %v5130_v48  ;;  %2760 = vmatmul.f32.vlgmr.msra.gmra.mxu3 %v5159_v10 }
 0x1f9   : > { %2848 = vmatpush.msrb.mxu1 %v2207_v9  ;;  %2859 = vmatpush.msrb.mxu3 %v1568_v28  ;;  %v2301_v18 = vpop.f32.mrf.mxu1  ;;  %v2281_v55 = vpop.f32.mrf.mxu0  ;;  %v1507_v9 = vld [vmem:[#allocation2 + $0xd60] sm:$0xff]  ;;  %v1856_v28 = vld [vmem:[#allocation2 + $0x1848] sm:$0xff] }
 0x1fa   : > { %2825 = vmatpush.msrb.mxu0 %v1695_v29  ;;  %2959 = vmatpush.msrb.mxu2 %v1825_v31  ;;  %v2302_v62 = vadd.f32 %v2301_v18, %v2279_v3  ;;  %v2282_v21 = vadd.f32 %v2281_v55, %v2258_v39  ;;  %v1216_v31 = vld [vmem:[#allocation2 + $0x448] sm:$0xff]  ;;  %v2416_v3 = vpop.f32.mrf.mxu2  ;;  %v1249_v55 = vld [vmem:[#allocation2 + $0x550] sm:$0xff] }
 0x1fb   : > { %2849 = vmatpush.msrb.mxu1 %v2175_v16  ;;  %2860 = vmatpush.msrb.mxu3 %v1536_v23  ;;  %v1345_v16 = vld [vmem:[#allocation2 + $0x850] sm:$0xff]  ;;  %v1475_v23 = vld [vmem:[#allocation2 + $0xc60] sm:$0xff]  ;;  %v1824_v39 = vld [vmem:[#allocation2 + $0x1748] sm:$0xff] }
 0x1fc   : > { %4676 = vmatmul.msk.f32.gmra.mxu2 %vm2231_vm9, %v5181_v54  ;;  %2826 = vmatpush.msrb.mxu0 %v1663_v51  ;;  %4446 = vst [vmem:[%s5241_s19] sm:$0xff] %v2302_v62  ;;  %v1184_v51 = vld [vmem:[#allocation2 + $0x348] sm:$0xff] }
 0x1fd   : > { %2960 = vmatpush.msrb.mxu2 %v1793_v34  ;;  %2850 = vmatpush.msrb.mxu1 %v2143_v36  ;;  %v1313_v34 = vld [vmem:[#allocation2 + $0x750] sm:$0xff] }
 0x1fe   : > { %2861 = vmatpush.msrb.mxu3 %v1504_v13  ;;  %2827 = vmatpush.msrb.mxu0 %v1631_v45  ;;  %v1443_v13 = vld [vmem:[#allocation2 + $0xb60] sm:$0xff]  ;;  %v1792_v45 = vld [vmem:[#allocation2 + $0x1648] sm:$0xff] }
 0x1ff   : > { %2961 = vmatpush.msrb.mxu2 %v1761_v43  ;;  %2851 = vmatpush.msrb.mxu1 %v2111_v41  ;;  %v1152_v41 = vld [vmem:[#allocation2 + $0x248] sm:$0xff] }
 0x200   : > { %2862 = vmatpush.msrb.mxu3 %v1472_v42  ;;  %2828 = vmatpush.msrb.mxu0 %v1599_v44  ;;  %v5248_v11 = vpop.f32.mrf.mxu3  ;;  %v1281_v42 = vld [vmem:[#allocation2 + $0x650] sm:$0xff]  ;;  %v1411_v44 = vld [vmem:[#allocation2 + $0xa60] sm:$0xff] }
 0x201   : > { %2882 = vmatpush.msra.mxu1 %v2080_v20  ;;  %2962 = vmatpush.msrb.mxu2 %v1729_v50  ;;  %v1120_v50 = vld [vmem:[#allocation2 + $0x148] sm:$0xff] }
 0x202   : > { %2740 = vmatmul.f32.gmra.mxu1 %v5147_v6  ;;  %2763 = vmatmul.f32.gmra.mxu3 %v5168_v38  ;;  %v2304_v5 = vpop.f32.mrf.mxu1 }
 0x203   : > { %2829 = vmatmul.f32.vlgmr.msrb.gmra.mxu0 %v5159_v10  ;;  %2863 = vmatpush.msrb.mxu3 %v1440_v35  ;;  %v2305_v60 = vadd.f32 %v2304_v5, %v2282_v21  ;;  %v2393_v8 = vpop.f32.mrf.mxu0  ;;  %v1217_v21 = vld [vmem:[#allocation2 + $0x450] sm:$0xff]  ;;  %v1696_v5 = vld [vmem:[#allocation2 + $0x1348] sm:$0xff] }
 0x204   : > { %2928 = vmatpush.msra.mxu0 %v1569_v56  ;;  %2883 = vmatpush.msra.mxu1 %v2048_v40  ;;  %v2417_v18 = vadd.f32 %v2416_v3, %v2393_v8  ;;  %v1728_v56 = vld [vmem:[#allocation2 + $0x1448] sm:$0xff]  ;;  %v1121_v8 = vld [vmem:[#allocation2 + $0x150] sm:$0xff] }
 0x205   : > { %2963 = vmatpush.msrb.mxu2 %v1697_v30  ;;  %2864 = vmatpush.msrb.mxu3 %v1408_v49  ;;  %4478 = vst [vmem:[%s5241_s19 + $0x100] sm:$0xff] %v2305_v60  ;;  %v1088_v40 = vld [vmem:[#allocation2 + $0x48] sm:$0xff]  ;;  %v1347_v49 = vld [vmem:[#allocation2 + $0x860] sm:$0xff]  ;;  %v1185_v60 = vld [vmem:[#allocation2 + $0x350] sm:$0xff] }
 0x206   : > { %2929 = vmatpush.msra.mxu0 %v1537_v57  ;;  %2884 = vmatpush.msra.mxu1 %v2016_v58  ;;  %v2209_v57 = vld [vmem:[#allocation2 + $0x2350] sm:$0xff]  ;;  %v2419_v58 = vpop.f32.mrf.mxu2 }
 0x207   : > { %2964 = vmatpush.msrb.mxu2 %v1665_v24  ;;  %2865 = vmatpush.msrb.mxu3 %v1376_v27  ;;  %v1315_v24 = vld [vmem:[#allocation2 + $0x760] sm:$0xff] }
 0x208   : > { %2930 = vmatpush.msra.mxu0 %v1505_v33  ;;  %2885 = vmatpush.msra.mxu1 %v1984_v61  ;;  %v5256_v52 = vpop.f32.mrf.mxu3  ;;  %v1664_v33 = vld [vmem:[#allocation2 + $0x1248] sm:$0xff]  ;;  %v2177_v61 = vld [vmem:[#allocation2 + $0x2250] sm:$0xff] }
 0x209   : > { %2965 = vmatpush.msrb.mxu2 %v1633_v0  ;;  %2866 = vmatpush.msrb.mxu3 %v1344_v1 }
 0x20a   : > { %2931 = vmatpush.msra.mxu0 %v1473_v14  ;;  %2886 = vmatpush.msra.mxu1 %v1952_v2  ;;  %v1153_v14 = vld [vmem:[#allocation2 + $0x250] sm:$0xff]  ;;  %v1283_v2 = vld [vmem:[#allocation2 + $0x660] sm:$0xff] }
 0x20b   : > { %2966 = vmatpush.msrb.mxu2 %v1601_v4  ;;  %2832 = vmatmul.f32.gmra.mxu0 %v5168_v38  ;;  %v1632_v4 = vld [vmem:[#allocation2 + $0x1148] sm:$0xff] }
 0x20c   : > { %4673 = vmatmul.msk.f32.vlgmr.msrb.gmra.mxu1 %vm2231_vm9, %v5171_v19  ;;  %2867 = vmatpush.msrb.mxu3 %v1312_v47  ;;  %v2347_v63 = vpop.f32.mrf.mxu1  ;;  %v2145_v47 = vld [vmem:[#allocation2 + $0x2150] sm:$0xff] }
 0x20d   : > { %2932 = vmatpush.msra.mxu0 %v1441_v37  ;;  %2967 = vmatmul.f32.vlgmr.msrb.gmra.mxu2 %v5159_v10  ;;  %v2348_v26 = vadd.f32 %v2347_v63, %v5246_v17  ;;  %v2396_v36 = vpop.f32.mrf.mxu0  ;;  %v1760_v17 = vld [vmem:[#allocation2 + $0x1548] sm:$0xff] }
 0x20e   : > { %3066 = vmatpush.msra.mxu2 %v1571_v59  ;;  %2887 = vmatpush.msra.mxu1 %v1920_v12  ;;  %v2420_v27 = vadd.f32 %v2419_v58, %v2396_v36  ;;  %v1600_v37 = vld [vmem:[#allocation2 + $0x1048] sm:$0xff]  ;;  %v2113_v59 = vld [vmem:[#allocation2 + $0x2050] sm:$0xff]  ;;  %v1858_v58 = vld [vmem:[#allocation2 + $0x1858] sm:$0xff] }
 0x20f   : > { %2868 = vmatpush.msrb.mxu3 %v1280_v7  ;;  %2933 = vmatpush.msra.mxu0 %v1409_v53  ;;  %v2371_v29 = vadd.f32 %v5248_v11, %v2348_v26  ;;  %v1379_v11 = vld [vmem:[#allocation2 + $0x960] sm:$0xff]  ;;  %v1089_v12 = vld [vmem:[#allocation2 + $0x50] sm:$0xff]  ;;  %v1570_v7 = vld [vmem:[#allocation2 + $0xf58] sm:$0xff] }
 0x210   : > { %3067 = vmatpush.msra.mxu2 %v1539_v15  ;;  %2888 = vmatpush.msra.mxu1 %v1888_v22  ;;  %v2082_v53 = vld [vmem:[#allocation2 + $0x1f58] sm:$0xff]  ;;  %v1219_v15 = vld [vmem:[#allocation2 + $0x460] sm:$0xff] }
 0x211   : > { %2869 = vmatpush.msrb.mxu3 %v1248_v32  ;;  %2934 = vmatpush.msra.mxu0 %v1377_v46  ;;  %4447 = vst [vmem:[%s5241_s19 + $0x8] sm:$0xff] %v2371_v29  ;;  %v1538_v22 = vld [vmem:[#allocation2 + $0xe58] sm:$0xff]  ;;  %v1187_v46 = vld [vmem:[#allocation2 + $0x360] sm:$0xff] }
 0x212   : > { %3068 = vmatpush.msra.mxu2 %v1507_v9  ;;  %2889 = vmatpush.msra.mxu1 %v1856_v28  ;;  %v2210_v26 = vld [vmem:[#allocation2 + $0x2358] sm:$0xff] }
 0x213   : > { %2870 = vmatpush.msrb.mxu3 %v1216_v31  ;;  %2935 = vmatpush.msra.mxu0 %v1345_v16  ;;  %v2439_v62 = vpop.f32.mrf.mxu3  ;;  %v2050_v32 = vld [vmem:[#allocation2 + $0x1e58] sm:$0xff] }
 0x214   : > { %3069 = vmatpush.msra.mxu2 %v1475_v23  ;;  %2890 = vmatpush.msra.mxu1 %v1824_v39  ;;  %v2440_v43 = vadd.f32 %v2439_v62, %v2417_v18  ;;  %v1506_v9 = vld [vmem:[#allocation2 + $0xd58] sm:$0xff]  ;;  %v1155_v23 = vld [vmem:[#allocation2 + $0x260] sm:$0xff] }
 0x215   : > { %4674 = vmatmul.msk.f32.gmra.mxu1 %vm2231_vm9, %v5181_v54  ;;  %2871 = vmatpush.msrb.mxu3 %v1184_v51  ;;  %v2178_v29 = vld [vmem:[#allocation2 + $0x2258] sm:$0xff] }
 0x216   : > { %2936 = vmatpush.msra.mxu0 %v1313_v34  ;;  %2970 = vmatmul.f32.gmra.mxu2 %v5168_v38  ;;  %4448 = vst [vmem:[%s5241_s19 + $0x10] sm:$0xff] %v2440_v43  ;;  %v2350_v20 = vpop.f32.mrf.mxu1  ;;  %v2018_v31 = vld [vmem:[#allocation2 + $0x1d58] sm:$0xff]  ;;  %v1123_v34 = vld [vmem:[#allocation2 + $0x160] sm:$0xff] }
 0x217   : > { %3070 = vmatpush.msra.mxu2 %v1443_v13  ;;  %2891 = vmatpush.msra.mxu1 %v1792_v45  ;;  %v2351_v35 = vadd.f32 %v2350_v20, %v5254_v25  ;;  %v1474_v39 = vld [vmem:[#allocation2 + $0xc58] sm:$0xff]  ;;  %v1091_v43 = vld [vmem:[#allocation2 + $0x60] sm:$0xff] }
 0x218   : > { %2872 = vmatpush.msrb.mxu3 %v1152_v41  ;;  %2937 = vmatpush.msra.mxu0 %v1281_v42  ;;  %v2508_v0 = vpop.f32.mrf.mxu0  ;;  %v2146_v51 = vld [vmem:[#allocation2 + $0x2158] sm:$0xff]  ;;  %v2083_v42 = vld [vmem:[#allocation2 + $0x1f60] sm:$0xff] }
 0x219   : > { %3071 = vmatpush.msra.mxu2 %v1411_v44  ;;  %2892 = vmatpush.msra.mxu1 %v1760_v17  ;;  %v2374_v30 = vadd.f32 %v5256_v52, %v2351_v35  ;;  %v1251_v52 = vld [vmem:[#allocation2 + $0x560] sm:$0xff]  ;;  %v1986_v18 = vld [vmem:[#allocation2 + $0x1c58] sm:$0xff]  ;;  %v2212_v44 = vld [vmem:[#allocation2 + $0x2368] sm:$0xff] }
 0x21a   : > { %2873 = vmatpush.msrb.mxu3 %v1120_v50  ;;  %2938 = vmatpush.msra.mxu0 %v1249_v55  ;;  %v2114_v62 = vld [vmem:[#allocation2 + $0x2058] sm:$0xff]  ;;  %v2051_v50 = vld [vmem:[#allocation2 + $0x1e60] sm:$0xff]  ;;  %v2180_v35 = vld [vmem:[#allocation2 + $0x2268] sm:$0xff] }
 0x21b   : > { %3072 = vmatpush.msra.mxu2 %v1379_v11  ;;  %2893 = vmatpush.msra.mxu1 %v1728_v56  ;;  %4479 = vst [vmem:[%s5241_s19 + $0x108] sm:$0xff] %v2374_v30  ;;  %v1442_v13 = vld [vmem:[#allocation2 + $0xb58] sm:$0xff]  ;;  %v2019_v30 = vld [vmem:[#allocation2 + $0x1d60] sm:$0xff] }
 0x21c   : > { %2874 = vmatpush.msrb.mxu3 %v1088_v40  ;;  %2939 = vmatpush.msra.mxu0 %v1217_v21  ;;  %v1954_v45 = vld [vmem:[#allocation2 + $0x1b58] sm:$0xff]  ;;  %v2531_v40 = vpop.f32.mrf.mxu2 }
 0x21d   : > { %3073 = vmatpush.msra.mxu2 %v1347_v49  ;;  %2875 = vmatmul.f32.vlgmr.msrb.gmra.mxu3 %v5130_v48  ;;  %v2442_v1 = vpop.f32.mrf.mxu3  ;;  %v1410_v17 = vld [vmem:[#allocation2 + $0xa58] sm:$0xff] }
 0x21e   : > { %2894 = vmatpush.msra.mxu1 %v1696_v5  ;;  %2986 = vmatpush.msra.mxu3 %v2209_v57  ;;  %v2443_v25 = vadd.f32 %v2442_v1, %v2420_v27  ;;  %v1922_v20 = vld [vmem:[#allocation2 + $0x1a58] sm:$0xff]  ;;  %v2148_v5 = vld [vmem:[#allocation2 + $0x2168] sm:$0xff]  ;;  %v1955_v1 = vld [vmem:[#allocation2 + $0x1b60] sm:$0xff] }
 0x21f   : > { %2940 = vmatpush.msra.mxu0 %v1185_v60  ;;  %3074 = vmatpush.msra.mxu2 %v1315_v24  ;;  %v1378_v11 = vld [vmem:[#allocation2 + $0x958] sm:$0xff]  ;;  %v1987_v60 = vld [vmem:[#allocation2 + $0x1c60] sm:$0xff]  ;;  %v2116_v27 = vld [vmem:[#allocation2 + $0x2068] sm:$0xff] }
 0x220   : > { %2895 = vmatpush.msra.mxu1 %v1664_v33  ;;  %2987 = vmatpush.msra.mxu3 %v2177_v61  ;;  %4480 = vst [vmem:[%s5241_s19 + $0x110] sm:$0xff] %v2443_v25  ;;  %v1890_v21 = vld [vmem:[#allocation2 + $0x1958] sm:$0xff] }
 0x221   : > { %2941 = vmatpush.msra.mxu0 %v1153_v14  ;;  %3075 = vmatpush.msra.mxu2 %v1283_v2  ;;  %v2462_v63 = vpop.f32.mrf.mxu1  ;;  %v1346_v57 = vld [vmem:[#allocation2 + $0x858] sm:$0xff]  ;;  %v2085_v2 = vld [vmem:[#allocation2 + $0x1f70] sm:$0xff] }
 0x222   : > { %2896 = vmatpush.msra.mxu1 %v1632_v4  ;;  %2988 = vmatpush.msra.mxu3 %v2145_v47  ;;  %v2511_v28 = vpop.f32.mrf.mxu0  ;;  %v1314_v33 = vld [vmem:[#allocation2 + $0x758] sm:$0xff] }
 0x223   : > { %2942 = vmatpush.msra.mxu0 %v1121_v8  ;;  %3076 = vmatpush.msra.mxu2 %v1251_v52  ;;  %v1282_v4 = vld [vmem:[#allocation2 + $0x658] sm:$0xff]  ;;  %v1923_v8 = vld [vmem:[#allocation2 + $0x1a60] sm:$0xff]  ;;  %v2053_v52 = vld [vmem:[#allocation2 + $0x1e70] sm:$0xff] }
 0x224   : > { %2897 = vmatpush.msra.mxu1 %v1600_v37  ;;  %2989 = vmatpush.msra.mxu3 %v2113_v59  ;;  %v1794_v47 = vld [vmem:[#allocation2 + $0x1658] sm:$0xff] }
 0x225   : > { %2898 = vmatmul.f32.vlgmr.msra.gmra.mxu1 %v5159_v10  ;;  %2943 = vmatpush.msra.mxu0 %v1089_v12  ;;  %v1250_v59 = vld [vmem:[#allocation2 + $0x558] sm:$0xff] }
 0x226   : > { %2997 = vmatpush.msrb.mxu1 %v1570_v7  ;;  %3020 = vmatpush.msrb.mxu3 %v2082_v53  ;;  %v1762_v12 = vld [vmem:[#allocation2 + $0x1558] sm:$0xff]  ;;  %v2534_v7 = vpop.f32.mrf.mxu2  ;;  %v1891_v53 = vld [vmem:[#allocation2 + $0x1960] sm:$0xff] }
 0x227   : > { %3077 = vmatpush.msra.mxu2 %v1219_v15  ;;  %2878 = vmatmul.f32.gmra.mxu3 %v5147_v6  ;;  %v1218_v15 = vld [vmem:[#allocation2 + $0x458] sm:$0xff] }
 0x228   : > { %2944 = vmatmul.f32.vlgmr.msra.gmra.mxu0 %v5130_v48  ;;  %2998 = vmatpush.msrb.mxu1 %v1538_v22  ;;  %v2485_v16 = vpop.f32.mrf.mxu3  ;;  %v1730_v22 = vld [vmem:[#allocation2 + $0x1458] sm:$0xff] }
 0x229   : > { %3055 = vmatpush.msrb.mxu0 %v2210_v26  ;;  %3021 = vmatpush.msrb.mxu3 %v2050_v32  ;;  %v2486_v3 = vadd.f32 %v2485_v16, %v2462_v63  ;;  %v2021_v63 = vld [vmem:[#allocation2 + $0x1d70] sm:$0xff]  ;;  %v1859_v32 = vld [vmem:[#allocation2 + $0x1860] sm:$0xff] }
 0x22a   : > { %3078 = vmatpush.msra.mxu2 %v1187_v46  ;;  %2999 = vmatpush.msrb.mxu1 %v1506_v9  ;;  %v1989_v46 = vld [vmem:[#allocation2 + $0x1c70] sm:$0xff]  ;;  %v1827_v16 = vld [vmem:[#allocation2 + $0x1760] sm:$0xff] }
 0x22b   : > { %3056 = vmatpush.msrb.mxu0 %v2178_v29  ;;  %3022 = vmatpush.msrb.mxu3 %v2018_v31  ;;  %v2509_v36 = vadd.f32 %v2508_v0, %v2486_v3  ;;  %v1826_v0 = vld [vmem:[#allocation2 + $0x1758] sm:$0xff] }
 0x22c   : > { %3079 = vmatpush.msra.mxu2 %v1155_v23  ;;  %3000 = vmatpush.msrb.mxu1 %v1474_v39  ;;  %v2465_v41 = vpop.f32.mrf.mxu1  ;;  %v1698_v29 = vld [vmem:[#allocation2 + $0x1358] sm:$0xff]  ;;  %v1957_v23 = vld [vmem:[#allocation2 + $0x1b70] sm:$0xff] }
 0x22d   : > { %3057 = vmatpush.msrb.mxu0 %v2146_v51  ;;  %3023 = vmatpush.msrb.mxu3 %v1986_v18  ;;  %4449 = vst [vmem:[%s5241_s19 + $0x18] sm:$0xff] %v2509_v36  ;;  %v2554_v55 = vpop.f32.mrf.mxu0  ;;  %v1154_v39 = vld [vmem:[#allocation2 + $0x258] sm:$0xff]  ;;  %v1795_v51 = vld [vmem:[#allocation2 + $0x1660] sm:$0xff]  ;;  %v1925_v18 = vld [vmem:[#allocation2 + $0x1a70] sm:$0xff] }
 0x22e   : > { %3080 = vmatpush.msra.mxu2 %v1123_v34  ;;  %2901 = vmatmul.f32.gmra.mxu1 %v5168_v38  ;;  %v2555_v61 = vadd.f32 %v2554_v55, %v2531_v40  ;;  %v1666_v3 = vld [vmem:[#allocation2 + $0x1258] sm:$0xff]  ;;  %v2646_v55 = vpop.f32.mrf.mxu2  ;;  %v1667_v40 = vld [vmem:[#allocation2 + $0x1260] sm:$0xff] }
 0x22f   : > { %3058 = vmatpush.msrb.mxu0 %v2114_v62  ;;  %3001 = vmatpush.msrb.mxu1 %v1442_v13  ;;  %v1122_v34 = vld [vmem:[#allocation2 + $0x158] sm:$0xff]  ;;  %v1763_v62 = vld [vmem:[#allocation2 + $0x1560] sm:$0xff]  ;;  %v1893_v13 = vld [vmem:[#allocation2 + $0x1970] sm:$0xff] }
 0x230   : > { %3024 = vmatpush.msrb.mxu3 %v1954_v45  ;;  %3081 = vmatpush.msra.mxu2 %v1091_v43  ;;  %v1634_v36 = vld [vmem:[#allocation2 + $0x1158] sm:$0xff] }
 0x231   : > { %3089 = vmatpush.msra.mxu0 %v2083_v42  ;;  %4677 = vmatmul.msk.f32.vlgmr.msra.gmra.mxu3 %vm2231_vm9, %v5171_v19  ;;  %v1090_v45 = vld [vmem:[#allocation2 + $0x58] sm:$0xff]  ;;  %v1861_v42 = vld [vmem:[#allocation2 + $0x1870] sm:$0xff] }
 0x232   : > { %2947 = vmatmul.f32.gmra.mxu0 %v5147_v6  ;;  %3082 = vmatmul.f32.vlgmr.msra.gmra.mxu2 %v5130_v48  ;;  %v2488_v56 = vpop.f32.mrf.mxu3  ;;  %v1602_v43 = vld [vmem:[#allocation2 + $0x1058] sm:$0xff] }
 0x233   : > { %3193 = vmatpush.msrb.mxu2 %v2212_v44  ;;  %3002 = vmatpush.msrb.mxu1 %v1410_v17  ;;  %v2489_v49 = vadd.f32 %v2488_v56, %v2465_v41  ;;  %v1731_v41 = vld [vmem:[#allocation2 + $0x1460] sm:$0xff]  ;;  %v1572_v17 = vld [vmem:[#allocation2 + $0xf68] sm:$0xff] }
 0x234   : > { %3025 = vmatpush.msrb.mxu3 %v1922_v20  ;;  %3090 = vmatpush.msra.mxu0 %v2051_v50  ;;  %v2211_v44 = vld [vmem:[#allocation2 + $0x2360] sm:$0xff]  ;;  %v1829_v50 = vld [vmem:[#allocation2 + $0x1770] sm:$0xff] }
 0x235   : > { %3194 = vmatpush.msrb.mxu2 %v2180_v35  ;;  %3003 = vmatpush.msrb.mxu1 %v1378_v11  ;;  %v2512_v24 = vadd.f32 %v2511_v28, %v2489_v49  ;;  %v1186_v28 = vld [vmem:[#allocation2 + $0x358] sm:$0xff]  ;;  %v1699_v20 = vld [vmem:[#allocation2 + $0x1360] sm:$0xff]  ;;  %v1540_v11 = vld [vmem:[#allocation2 + $0xe68] sm:$0xff] }
 0x236   : > { %3026 = vmatpush.msrb.mxu3 %v1890_v21  ;;  %3091 = vmatpush.msra.mxu0 %v2019_v30  ;;  %v2557_v37 = vpop.f32.mrf.mxu0  ;;  %v2179_v35 = vld [vmem:[#allocation2 + $0x2260] sm:$0xff]  ;;  %v1797_v21 = vld [vmem:[#allocation2 + $0x1670] sm:$0xff] }
 0x237   : > { %3195 = vmatpush.msrb.mxu2 %v2148_v5  ;;  %3004 = vmatpush.msrb.mxu1 %v1346_v57  ;;  %4481 = vst [vmem:[%s5241_s19 + $0x118] sm:$0xff] %v2512_v24  ;;  %v2577_v14 = vpop.f32.mrf.mxu1  ;;  %v2558_v26 = vadd.f32 %v2557_v37, %v2534_v7  ;;  %v2147_v30 = vld [vmem:[#allocation2 + $0x2160] sm:$0xff]  ;;  %v1508_v5 = vld [vmem:[#allocation2 + $0xd68] sm:$0xff]  ;;  %v1541_v37 = vld [vmem:[#allocation2 + $0xe70] sm:$0xff] }
 0x238   : > { %3027 = vmatpush.msrb.mxu3 %v1858_v58  ;;  %3092 = vmatpush.msra.mxu0 %v1987_v60  ;;  %v2578_v25 = vadd.f32 %v2577_v14, %v2555_v61  ;;  %v1635_v57 = vld [vmem:[#allocation2 + $0x1160] sm:$0xff]  ;;  %v1765_v60 = vld [vmem:[#allocation2 + $0x1570] sm:$0xff]  ;;  %v1444_v14 = vld [vmem:[#allocation2 + $0xb68] sm:$0xff] }
 0x239   : > { %3196 = vmatpush.msrb.mxu2 %v2116_v27  ;;  %3005 = vmatpush.msrb.mxu1 %v1314_v33  ;;  %v2115_v24 = vld [vmem:[#allocation2 + $0x2060] sm:$0xff]  ;;  %v1476_v27 = vld [vmem:[#allocation2 + $0xc68] sm:$0xff]  ;;  %v1669_v7 = vld [vmem:[#allocation2 + $0x1270] sm:$0xff] }
 0x23a   : > { %3028 = vmatpush.msrb.mxu3 %v1826_v0  ;;  %3093 = vmatpush.msra.mxu0 %v1955_v1  ;;  %4450 = vst [vmem:[%s5241_s19 + $0x20] sm:$0xff] %v2578_v25  ;;  %v1603_v33 = vld [vmem:[#allocation2 + $0x1060] sm:$0xff]  ;;  %v2084_v0 = vld [vmem:[#allocation2 + $0x1f68] sm:$0xff]  ;;  %v1733_v1 = vld [vmem:[#allocation2 + $0x1470] sm:$0xff] }
 0x23b   : > { %3227 = vmatpush.msra.mxu2 %v2085_v2  ;;  %4678 = vmatmul.msk.f32.gmra.mxu3 %vm2231_vm9, %v5181_v54  ;;  %v1573_v2 = vld [vmem:[#allocation2 + $0xf70] sm:$0xff]  ;;  %v2052_v25 = vld [vmem:[#allocation2 + $0x1e68] sm:$0xff] }
 0x23c   : > { %4679 = vmatmul.msk.f32.vlgmr.msrb.gmra.mxu0 %vm2231_vm9, %v5171_v19  ;;  %3085 = vmatmul.f32.gmra.mxu2 %v5147_v6 }
 0x23d   : > { %3006 = vmatpush.msrb.mxu1 %v1282_v4  ;;  %3029 = vmatpush.msrb.mxu3 %v1794_v47  ;;  %v2649_v4 = vpop.f32.mrf.mxu2  ;;  %v1701_v47 = vld [vmem:[#allocation2 + $0x1370] sm:$0xff] }
 0x23e   : > { %3094 = vmatpush.msra.mxu0 %v1923_v8  ;;  %3228 = vmatpush.msra.mxu2 %v2053_v52  ;;  %v1412_v8 = vld [vmem:[#allocation2 + $0xa68] sm:$0xff] }
 0x23f   : > { %3007 = vmatpush.msrb.mxu1 %v1250_v59  ;;  %3030 = vmatpush.msrb.mxu3 %v1762_v12  ;;  %v2580_v9 = vpop.f32.mrf.mxu1  ;;  %v2020_v59 = vld [vmem:[#allocation2 + $0x1d68] sm:$0xff] }
 0x240   : > { %3095 = vmatpush.msra.mxu0 %v1891_v53  ;;  %3229 = vmatpush.msra.mxu2 %v2021_v63  ;;  %v2581_v31 = vadd.f32 %v2580_v9, %v2558_v26  ;;  %v1380_v53 = vld [vmem:[#allocation2 + $0x968] sm:$0xff]  ;;  %v1637_v26 = vld [vmem:[#allocation2 + $0x1170] sm:$0xff] }
 0x241   : > { %3008 = vmatpush.msrb.mxu1 %v1218_v15  ;;  %3031 = vmatpush.msrb.mxu3 %v1730_v22  ;;  %v1509_v15 = vld [vmem:[#allocation2 + $0xd70] sm:$0xff]  ;;  %v1988_v22 = vld [vmem:[#allocation2 + $0x1c68] sm:$0xff] }
 0x242   : > { %3096 = vmatpush.msra.mxu0 %v1859_v32  ;;  %3230 = vmatpush.msra.mxu2 %v1989_v46  ;;  %4482 = vst [vmem:[%s5241_s19 + $0x120] sm:$0xff] %v2581_v31  ;;  %v1348_v32 = vld [vmem:[#allocation2 + $0x868] sm:$0xff]  ;;  %v1477_v9 = vld [vmem:[#allocation2 + $0xc70] sm:$0xff] }
 0x243   : > { %3009 = vmatpush.msrb.mxu1 %v1186_v28  ;;  %3032 = vmatpush.msrb.mxu3 %v1698_v29  ;;  %v1956_v28 = vld [vmem:[#allocation2 + $0x1b68] sm:$0xff]  ;;  %v1605_v29 = vld [vmem:[#allocation2 + $0x1070] sm:$0xff] }
 0x244   : > { %3097 = vmatpush.msra.mxu0 %v1827_v16  ;;  %3231 = vmatpush.msra.mxu2 %v1957_v23  ;;  %v1316_v16 = vld [vmem:[#allocation2 + $0x768] sm:$0xff] }
 0x245   : > { %4680 = vmatmul.msk.f32.gmra.mxu0 %vm2231_vm9, %v5181_v54  ;;  %4683 = vmatmul.msk.f32.vlgmr.msrb.gmra.mxu2 %vm2231_vm9, %v5171_v19  ;;  %v2692_v23 = vpop.f32.mrf.mxu2 }
 0x246   : > { %3010 = vmatpush.msrb.mxu1 %v1154_v39  ;;  %3033 = vmatpush.msrb.mxu3 %v1666_v3  ;;  %v1445_v39 = vld [vmem:[#allocation2 + $0xb70] sm:$0xff]  ;;  %v1575_v3 = vld [vmem:[#allocation2 + $0xf80] sm:$0xff] }
 0x247   : > { %3098 = vmatpush.msra.mxu0 %v1795_v51  ;;  %3232 = vmatpush.msra.mxu2 %v1925_v18  ;;  %v1924_v51 = vld [vmem:[#allocation2 + $0x1a68] sm:$0xff] }
 0x248   : > { %3011 = vmatpush.msrb.mxu1 %v1122_v34  ;;  %3034 = vmatpush.msrb.mxu3 %v1634_v36  ;;  %v1284_v34 = vld [vmem:[#allocation2 + $0x668] sm:$0xff]  ;;  %v1413_v36 = vld [vmem:[#allocation2 + $0xa70] sm:$0xff] }
 0x249   : > { %3099 = vmatpush.msra.mxu0 %v1763_v62  ;;  %3233 = vmatpush.msra.mxu2 %v1893_v13  ;;  %v1543_v13 = vld [vmem:[#allocation2 + $0xe80] sm:$0xff] }
 0x24a   : > { %3012 = vmatpush.msrb.mxu1 %v1090_v45  ;;  %3035 = vmatpush.msrb.mxu3 %v1602_v43  ;;  %v1892_v45 = vld [vmem:[#allocation2 + $0x1968] sm:$0xff] }
 0x24b   : > { %3100 = vmatpush.msra.mxu0 %v1731_v41  ;;  %3234 = vmatpush.msra.mxu2 %v1861_v42  ;;  %v1252_v41 = vld [vmem:[#allocation2 + $0x568] sm:$0xff]  ;;  %v1381_v42 = vld [vmem:[#allocation2 + $0x970] sm:$0xff] }
 0x24c   : > { %3013 = vmatmul.f32.vlgmr.msrb.gmra.mxu1 %v5130_v48  ;;  %3036 = vmatmul.f32.vlgmr.msrb.gmra.mxu3 %v5159_v10  ;;  %v2600_v56 = vpop.f32.mrf.mxu3 }
 0x24d   : > { %3124 = vmatpush.msra.mxu1 %v2211_v44  ;;  %3135 = vmatpush.msra.mxu3 %v1572_v17  ;;  %v1511_v44 = vld [vmem:[#allocation2 + $0xd80] sm:$0xff]  ;;  %v1860_v17 = vld [vmem:[#allocation2 + $0x1868] sm:$0xff] }
 0x24e   : > { %3101 = vmatpush.msra.mxu0 %v1699_v20  ;;  %3235 = vmatpush.msra.mxu2 %v1829_v50  ;;  %v2623_v49 = vpop.f32.mrf.mxu1  ;;  %v1220_v20 = vld [vmem:[#allocation2 + $0x468] sm:$0xff]  ;;  %v1349_v50 = vld [vmem:[#allocation2 + $0x870] sm:$0xff] }
 0x24f   : > { %3125 = vmatpush.msra.mxu1 %v2179_v35  ;;  %3136 = vmatpush.msra.mxu3 %v1540_v11  ;;  %v2624_v58 = vadd.f32 %v2623_v49, %v2600_v56  ;;  %v1828_v35 = vld [vmem:[#allocation2 + $0x1768] sm:$0xff] }
 0x250   : > { %4684 = vmatmul.msk.f32.gmra.mxu2 %vm2231_vm9, %v5181_v54  ;;  %3102 = vmatpush.msra.mxu0 %v1667_v40  ;;  %v1188_v11 = vld [vmem:[#allocation2 + $0x368] sm:$0xff]  ;;  %v1317_v40 = vld [vmem:[#allocation2 + $0x770] sm:$0xff] }
 0x251   : > { %3236 = vmatpush.msra.mxu2 %v1797_v21  ;;  %3126 = vmatpush.msra.mxu1 %v2147_v30  ;;  %v2647_v61 = vadd.f32 %v2646_v55, %v2624_v58  ;;  %v2669_v31 = vpop.f32.mrf.mxu0  ;;  %v1479_v55 = vld [vmem:[#allocation2 + $0xc80] sm:$0xff]  ;;  %v2695_v21 = vpop.f32.mrf.mxu2  ;;  %v1796_v49 = vld [vmem:[#allocation2 + $0x1668] sm:$0xff] }
 0x252   : > { %3137 = vmatpush.msra.mxu3 %v1508_v5  ;;  %3103 = vmatpush.msra.mxu0 %v1635_v57  ;;  %v2693_v18 = vadd.f32 %v2692_v23, %v2669_v31  ;;  %v1447_v30 = vld [vmem:[#allocation2 + $0xb80] sm:$0xff]  ;;  %v1156_v5 = vld [vmem:[#allocation2 + $0x268] sm:$0xff]  ;;  %v1285_v57 = vld [vmem:[#allocation2 + $0x670] sm:$0xff] }
 0x253   : > { %3237 = vmatpush.msra.mxu2 %v1765_v60  ;;  %3127 = vmatpush.msra.mxu1 %v2115_v24  ;;  %4451 = vst [vmem:[%s5241_s19 + $0x28] sm:$0xff] %v2647_v61  ;;  %v1415_v60 = vld [vmem:[#allocation2 + $0xa80] sm:$0xff]  ;;  %v1764_v24 = vld [vmem:[#allocation2 + $0x1568] sm:$0xff]  ;;  %v1253_v61 = vld [vmem:[#allocation2 + $0x570] sm:$0xff] }
 0x254   : > { %3138 = vmatpush.msra.mxu3 %v1476_v27  ;;  %3104 = vmatpush.msra.mxu0 %v1603_v33  ;;  %v1124_v33 = vld [vmem:[#allocation2 + $0x168] sm:$0xff]  ;;  %v1574_v31 = vld [vmem:[#allocation2 + $0xf78] sm:$0xff]  ;;  %v1223_v23 = vld [vmem:[#allocation2 + $0x480] sm:$0xff] }
 0x255   : > { %3158 = vmatpush.msrb.mxu1 %v2084_v0  ;;  %3238 = vmatpush.msra.mxu2 %v1733_v1  ;;  %v1383_v1 = vld [vmem:[#allocation2 + $0x980] sm:$0xff] }
 0x256   : > { %3016 = vmatmul.f32.gmra.mxu1 %v5147_v6  ;;  %3039 = vmatmul.f32.gmra.mxu3 %v5168_v38  ;;  %v2603_v52 = vpop.f32.mrf.mxu3 }
 0x257   : > { %3105 = vmatmul.f32.vlgmr.msra.gmra.mxu0 %v5159_v10  ;;  %3139 = vmatpush.msra.mxu3 %v1444_v14  ;;  %v2626_v12 = vpop.f32.mrf.mxu1  ;;  %v1732_v14 = vld [vmem:[#allocation2 + $0x1468] sm:$0xff] }
 0x258   : > { %3204 = vmatpush.msrb.mxu0 %v1573_v2  ;;  %3159 = vmatpush.msrb.mxu1 %v2052_v25  ;;  %v2627_v63 = vadd.f32 %v2626_v12, %v2603_v52  ;;  %v1092_v2 = vld [vmem:[#allocation2 + $0x68] sm:$0xff]  ;;  %v1221_v25 = vld [vmem:[#allocation2 + $0x470] sm:$0xff] }
 0x259   : > { %3239 = vmatpush.msra.mxu2 %v1701_v47  ;;  %3140 = vmatpush.msra.mxu3 %v1412_v8  ;;  %v1700_v47 = vld [vmem:[#allocation2 + $0x1368] sm:$0xff]  ;;  %v2213_v8 = vld [vmem:[#allocation2 + $0x2370] sm:$0xff] }
 0x25a   : > { %3205 = vmatpush.msrb.mxu0 %v1541_v37  ;;  %3160 = vmatpush.msrb.mxu1 %v2020_v59  ;;  %v2650_v46 = vadd.f32 %v2649_v4, %v2627_v63  ;;  %v1351_v4 = vld [vmem:[#allocation2 + $0x880] sm:$0xff]  ;;  %v1189_v52 = vld [vmem:[#allocation2 + $0x370] sm:$0xff]  ;;  %v1668_v59 = vld [vmem:[#allocation2 + $0x1268] sm:$0xff] }
 0x25b   : > { %3240 = vmatpush.msra.mxu2 %v1669_v7  ;;  %3141 = vmatpush.msra.mxu3 %v1380_v53  ;;  %v2672_v56 = vpop.f32.mrf.mxu0  ;;  %v1319_v37 = vld [vmem:[#allocation2 + $0x780] sm:$0xff]  ;;  %v2181_v12 = vld [vmem:[#allocation2 + $0x2270] sm:$0xff] }
 0x25c   : > { %3206 = vmatpush.msrb.mxu0 %v1509_v15  ;;  %3161 = vmatpush.msrb.mxu1 %v1988_v22  ;;  %4483 = vst [vmem:[%s5241_s19 + $0x128] sm:$0xff] %v2650_v46  ;;  %v2696_v58 = vadd.f32 %v2695_v21, %v2672_v56  ;;  %v1157_v7 = vld [vmem:[#allocation2 + $0x270] sm:$0xff]  ;;  %v1287_v53 = vld [vmem:[#allocation2 + $0x680] sm:$0xff]  ;;  %v1636_v15 = vld [vmem:[#allocation2 + $0x1168] sm:$0xff] }
 0x25d   : > { %3241 = vmatpush.msra.mxu2 %v1637_v26  ;;  %3142 = vmatpush.msra.mxu3 %v1348_v32  ;;  %v2149_v22 = vld [vmem:[#allocation2 + $0x2170] sm:$0xff]  ;;  %v1255_v32 = vld [vmem:[#allocation2 + $0x580] sm:$0xff]  ;;  %v1604_v46 = vld [vmem:[#allocation2 + $0x1068] sm:$0xff] }
 0x25e   : > { %3207 = vmatpush.msrb.mxu0 %v1477_v9  ;;  %3162 = vmatpush.msrb.mxu1 %v1956_v28  ;;  %v1125_v26 = vld [vmem:[#allocation2 + $0x170] sm:$0xff]  ;;  %v1958_v56 = vld [vmem:[#allocation2 + $0x1b78] sm:$0xff]  ;;  %v2087_v21 = vld [vmem:[#allocation2 + $0x1f80] sm:$0xff] }
 0x25f   : > { %3242 = vmatpush.msra.mxu2 %v1605_v29  ;;  %3108 = vmatmul.f32.gmra.mxu0 %v5168_v38  ;;  %v2117_v9 = vld [vmem:[#allocation2 + $0x2070] sm:$0xff] }
 0x260   : > { %4681 = vmatmul.msk.f32.vlgmr.msra.gmra.mxu1 %vm2231_vm9, %v5171_v19  ;;  %3143 = vmatpush.msra.mxu3 %v1316_v16  ;;  %v2715_v62 = vpop.f32.mrf.mxu3  ;;  %v1093_v29 = vld [vmem:[#allocation2 + $0x70] sm:$0xff]  ;;  %v2086_v16 = vld [vmem:[#allocation2 + $0x1f78] sm:$0xff] }
 0x261   : > { %3208 = vmatpush.msrb.mxu0 %v1445_v39  ;;  %3243 = vmatmul.f32.vlgmr.msra.gmra.mxu2 %v5159_v10  ;;  %v2716_v43 = vadd.f32 %v2715_v62, %v2693_v18  ;;  %v1542_v39 = vld [vmem:[#allocation2 + $0xe78] sm:$0xff]  ;;  %v1191_v18 = vld [vmem:[#allocation2 + $0x380] sm:$0xff] }
 0x262   : > { %3342 = vmatpush.msrb.mxu2 %v1575_v3  ;;  %3163 = vmatpush.msrb.mxu1 %v1924_v51  ;;  %v2214_v3 = vld [vmem:[#allocation2 + $0x2378] sm:$0xff] }
 0x263   : > { %3144 = vmatpush.msra.mxu3 %v1284_v34  ;;  %3209 = vmatpush.msrb.mxu0 %v1413_v36  ;;  %4452 = vst [vmem:[%s5241_s19 + $0x30] sm:$0xff] %v2716_v43  ;;  %v2054_v51 = vld [vmem:[#allocation2 + $0x1e78] sm:$0xff] }
 0x264   : > { %3343 = vmatpush.msrb.mxu2 %v1543_v13  ;;  %3164 = vmatpush.msrb.mxu1 %v1892_v45  ;;  %v1510_v34 = vld [vmem:[#allocation2 + $0xd78] sm:$0xff] }
 0x265   : > { %3145 = vmatpush.msra.mxu3 %v1252_v41  ;;  %3210 = vmatpush.msrb.mxu0 %v1381_v42  ;;  %v2784_v63 = vpop.f32.mrf.mxu0  ;;  %v2182_v62 = vld [vmem:[#allocation2 + $0x2278] sm:$0xff]  ;;  %v1159_v41 = vld [vmem:[#allocation2 + $0x280] sm:$0xff] }
 0x266   : > { %3344 = vmatpush.msrb.mxu2 %v1511_v44  ;;  %3165 = vmatpush.msrb.mxu1 %v1860_v17  ;;  %v2022_v13 = vld [vmem:[#allocation2 + $0x1d78] sm:$0xff] }
 0x267   : > { %3146 = vmatpush.msra.mxu3 %v1220_v20  ;;  %3211 = vmatpush.msrb.mxu0 %v1349_v50  ;;  %v1478_v42 = vld [vmem:[#allocation2 + $0xc78] sm:$0xff]  ;;  %v1127_v50 = vld [vmem:[#allocation2 + $0x180] sm:$0xff] }
 0x268   : > { %3345 = vmatpush.msrb.mxu2 %v1479_v55  ;;  %3166 = vmatpush.msrb.mxu1 %v1828_v35  ;;  %v2150_v44 = vld [vmem:[#allocation2 + $0x2178] sm:$0xff] }
 0x269   : > { %4682 = vmatmul.msk.f32.gmra.mxu1 %vm2231_vm9, %v5181_v54  ;;  %3147 = vmatpush.msra.mxu3 %v1188_v11  ;;  %v1990_v17 = vld [vmem:[#allocation2 + $0x1c78] sm:$0xff] }
 0x26a   : > { %3212 = vmatpush.msrb.mxu0 %v1317_v40  ;;  %3246 = vmatmul.f32.gmra.mxu2 %v5168_v38  ;;  %v2718_v27 = vpop.f32.mrf.mxu3  ;;  %v2118_v35 = vld [vmem:[#allocation2 + $0x2078] sm:$0xff]  ;;  %v1095_v40 = vld [vmem:[#allocation2 + $0x80] sm:$0xff] }
 0x26b   : > { %3346 = vmatpush.msrb.mxu2 %v1447_v30  ;;  %3167 = vmatpush.msrb.mxu1 %v1796_v49  ;;  %v2719_v0 = vadd.f32 %v2718_v27, %v2696_v58  ;;  %v1446_v11 = vld [vmem:[#allocation2 + $0xb78] sm:$0xff]  ;;  %v2216_v30 = vld [vmem:[#allocation2 + $0x2388] sm:$0xff]  ;;  %v2055_v58 = vld [vmem:[#allocation2 + $0x1e80] sm:$0xff] }
 0x26c   : > { %3148 = vmatpush.msra.mxu3 %v1156_v5  ;;  %3213 = vmatpush.msrb.mxu0 %v1285_v57  ;;  %v1414_v49 = vld [vmem:[#allocation2 + $0xa78] sm:$0xff]  ;;  %v2184_v27 = vld [vmem:[#allocation2 + $0x2288] sm:$0xff] }
 0x26d   : > { %3347 = vmatpush.msrb.mxu2 %v1415_v60  ;;  %3168 = vmatpush.msrb.mxu1 %v1764_v24  ;;  %4484 = vst [vmem:[%s5241_s19 + $0x130] sm:$0xff] %v2719_v0  ;;  %v1926_v57 = vld [vmem:[#allocation2 + $0x1a78] sm:$0xff]  ;;  %v2807_v24 = vpop.f32.mrf.mxu2 }
 0x26e   : > { %3149 = vmatpush.msra.mxu3 %v1124_v33  ;;  %3214 = vmatpush.msrb.mxu0 %v1253_v61  ;;  %v2787_v45 = vpop.f32.mrf.mxu0  ;;  %v1382_v33 = vld [vmem:[#allocation2 + $0x978] sm:$0xff] }
 0x26f   : > { %3348 = vmatpush.msrb.mxu2 %v1383_v1  ;;  %3169 = vmatpush.msrb.mxu1 %v1732_v14  ;;  %v1894_v0 = vld [vmem:[#allocation2 + $0x1978] sm:$0xff]  ;;  %v2023_v1 = vld [vmem:[#allocation2 + $0x1d80] sm:$0xff]  ;;  %v2152_v14 = vld [vmem:[#allocation2 + $0x2188] sm:$0xff] }
 0x270   : > { %3150 = vmatpush.msra.mxu3 %v1092_v2  ;;  %3215 = vmatpush.msrb.mxu0 %v1221_v25  ;;  %v1350_v2 = vld [vmem:[#allocation2 + $0x878] sm:$0xff] }
 0x271   : > { %3349 = vmatpush.msrb.mxu2 %v1351_v4  ;;  %3151 = vmatmul.f32.vlgmr.msra.gmra.mxu3 %v5130_v48 }
 0x272   : > { %3170 = vmatpush.msrb.mxu1 %v1700_v47  ;;  %3262 = vmatpush.msrb.mxu3 %v2213_v8  ;;  %v1862_v47 = vld [vmem:[#allocation2 + $0x1878] sm:$0xff]  ;;  %v1991_v8 = vld [vmem:[#allocation2 + $0x1c80] sm:$0xff] }
 0x273   : > { %3216 = vmatpush.msrb.mxu0 %v1189_v52  ;;  %3350 = vmatpush.msrb.mxu2 %v1319_v37  ;;  %v2120_v37 = vld [vmem:[#allocation2 + $0x2088] sm:$0xff] }
 0x274   : > { %3171 = vmatpush.msrb.mxu1 %v1668_v59  ;;  %3263 = vmatpush.msrb.mxu3 %v2181_v12  ;;  %v1318_v59 = vld [vmem:[#allocation2 + $0x778] sm:$0xff] }
 0x275   : > { %3217 = vmatpush.msrb.mxu0 %v1157_v7  ;;  %3351 = vmatpush.msrb.mxu2 %v1287_v53  ;;  %v2738_v28 = vpop.f32.mrf.mxu1  ;;  %v1830_v7 = vld [vmem:[#allocation2 + $0x1778] sm:$0xff]  ;;  %v1959_v53 = vld [vmem:[#allocation2 + $0x1b80] sm:$0xff] }
 0x276   : > { %3172 = vmatpush.msrb.mxu1 %v1636_v15  ;;  %3264 = vmatpush.msrb.mxu3 %v2149_v22  ;;  %v1286_v15 = vld [vmem:[#allocation2 + $0x678] sm:$0xff] }
 0x277   : > { %3218 = vmatpush.msrb.mxu0 %v1125_v26  ;;  %3352 = vmatpush.msrb.mxu2 %v1255_v32  ;;  %v1798_v22 = vld [vmem:[#allocation2 + $0x1678] sm:$0xff]  ;;  %v1927_v32 = vld [vmem:[#allocation2 + $0x1a80] sm:$0xff] }
 0x278   : > { %3173 = vmatpush.msrb.mxu1 %v1604_v46  ;;  %3265 = vmatpush.msrb.mxu3 %v2117_v9  ;;  %v2057_v46 = vld [vmem:[#allocation2 + $0x1e90] sm:$0xff]  ;;  %v2810_v9 = vpop.f32.mrf.mxu2 }
 0x279   : > { %3174 = vmatmul.f32.vlgmr.msrb.gmra.mxu1 %v5159_v10  ;;  %3219 = vmatpush.msrb.mxu0 %v1093_v29  ;;  %v1766_v29 = vld [vmem:[#allocation2 + $0x1578] sm:$0xff] }
 0x27a   : > { %3273 = vmatpush.msra.mxu1 %v1574_v31  ;;  %3296 = vmatpush.msra.mxu3 %v2086_v16  ;;  %v1895_v31 = vld [vmem:[#allocation2 + $0x1980] sm:$0xff]  ;;  %v2025_v16 = vld [vmem:[#allocation2 + $0x1d90] sm:$0xff] }
 0x27b   : > { %3353 = vmatpush.msrb.mxu2 %v1223_v23  ;;  %3154 = vmatmul.f32.gmra.mxu3 %v5147_v6  ;;  %v2761_v36 = vpop.f32.mrf.mxu3 }
 0x27c   : > { %3220 = vmatmul.f32.vlgmr.msrb.gmra.mxu0 %v5130_v48  ;;  %3274 = vmatpush.msra.mxu1 %v1542_v39  ;;  %v2762_v43 = vadd.f32 %v2761_v36, %v2738_v28  ;;  %v1254_v28 = vld [vmem:[#allocation2 + $0x578] sm:$0xff] }
 0x27d   : > { %3331 = vmatpush.msra.mxu0 %v2214_v3  ;;  %3297 = vmatpush.msra.mxu3 %v2054_v51  ;;  %v1222_v39 = vld [vmem:[#allocation2 + $0x478] sm:$0xff] }
 0x27e   : > { %3354 = vmatpush.msrb.mxu2 %v1191_v18  ;;  %3275 = vmatpush.msra.mxu1 %v1510_v34  ;;  %v2785_v20 = vadd.f32 %v2784_v63, %v2762_v43  ;;  %v2089_v63 = vld [vmem:[#allocation2 + $0x1f90] sm:$0xff]  ;;  %v1734_v3 = vld [vmem:[#allocation2 + $0x1478] sm:$0xff]  ;;  %v1863_v18 = vld [vmem:[#allocation2 + $0x1880] sm:$0xff] }
 0x27f   : > { %3332 = vmatpush.msra.mxu0 %v2182_v62  ;;  %3298 = vmatpush.msra.mxu3 %v2022_v13  ;;  %v2741_v55 = vpop.f32.mrf.mxu1  ;;  %v1993_v34 = vld [vmem:[#allocation2 + $0x1c90] sm:$0xff]  ;;  %v1190_v62 = vld [vmem:[#allocation2 + $0x378] sm:$0xff] }
 0x280   : > { %3355 = vmatpush.msrb.mxu2 %v1159_v41  ;;  %3276 = vmatpush.msra.mxu1 %v1478_v42  ;;  %4453 = vst [vmem:[%s5241_s19 + $0x38] sm:$0xff] %v2785_v20  ;;  %v2830_v5 = vpop.f32.mrf.mxu0  ;;  %v1702_v13 = vld [vmem:[#allocation2 + $0x1378] sm:$0xff]  ;;  %v1961_v43 = vld [vmem:[#allocation2 + $0x1b90] sm:$0xff] }
 0x281   : > { %3333 = vmatpush.msra.mxu0 %v2150_v44  ;;  %3299 = vmatpush.msra.mxu3 %v1990_v17  ;;  %v2831_v25 = vadd.f32 %v2830_v5, %v2807_v24  ;;  %v1158_v41 = vld [vmem:[#allocation2 + $0x278] sm:$0xff]  ;;  %v1799_v44 = vld [vmem:[#allocation2 + $0x1680] sm:$0xff]  ;;  %v1929_v17 = vld [vmem:[#allocation2 + $0x1a90] sm:$0xff] }
 0x282   : > { %3356 = vmatpush.msrb.mxu2 %v1127_v50  ;;  %3177 = vmatmul.f32.gmra.mxu1 %v5168_v38  ;;  %v1670_v42 = vld [vmem:[#allocation2 + $0x1278] sm:$0xff]  ;;  %v1703_v5 = vld [vmem:[#allocation2 + $0x1380] sm:$0xff]  ;;  %v1544_v24 = vld [vmem:[#allocation2 + $0xe88] sm:$0xff] }
 0x283   : > { %3334 = vmatpush.msra.mxu0 %v2118_v35  ;;  %3277 = vmatpush.msra.mxu1 %v1446_v11  ;;  %v1126_v20 = vld [vmem:[#allocation2 + $0x178] sm:$0xff]  ;;  %v1897_v35 = vld [vmem:[#allocation2 + $0x1990] sm:$0xff] }
 0x284   : > { %3300 = vmatpush.msra.mxu3 %v1958_v56  ;;  %3357 = vmatpush.msrb.mxu2 %v1095_v40  ;;  %v1638_v50 = vld [vmem:[#allocation2 + $0x1178] sm:$0xff]  ;;  %v1735_v40 = vld [vmem:[#allocation2 + $0x1480] sm:$0xff] }
 0x285   : > { %3365 = vmatpush.msrb.mxu0 %v2087_v21  ;;  %4685 = vmatmul.msk.f32.vlgmr.msrb.gmra.mxu3 %vm2231_vm9, %v5171_v19  ;;  %v2764_v60 = vpop.f32.mrf.mxu3  ;;  %v1094_v11 = vld [vmem:[#allocation2 + $0x78] sm:$0xff]  ;;  %v1865_v21 = vld [vmem:[#allocation2 + $0x1890] sm:$0xff] }
 0x286   : > { %3223 = vmatmul.f32.gmra.mxu0 %v5147_v6  ;;  %3358 = vmatmul.f32.vlgmr.msrb.gmra.mxu2 %v5130_v48  ;;  %v2765_v61 = vadd.f32 %v2764_v60, %v2741_v55  ;;  %v1767_v55 = vld [vmem:[#allocation2 + $0x1580] sm:$0xff]  ;;  %v1606_v56 = vld [vmem:[#allocation2 + $0x1078] sm:$0xff] }
 0x287   : > { %3469 = vmatpush.msra.mxu2 %v2216_v30  ;;  %3278 = vmatpush.msra.mxu1 %v1414_v49  ;;  %v2215_v30 = vld [vmem:[#allocation2 + $0x2380] sm:$0xff]  ;;  %v1576_v49 = vld [vmem:[#allocation2 + $0xf88] sm:$0xff] }
 0x288   : > { %3301 = vmatpush.msra.mxu3 %v1926_v57  ;;  %3366 = vmatpush.msrb.mxu0 %v2055_v58  ;;  %v2788_v4 = vadd.f32 %v2787_v45, %v2765_v61  ;;  %v2833_v26 = vpop.f32.mrf.mxu0  ;;  %v1831_v45 = vld [vmem:[#allocation2 + $0x1780] sm:$0xff]  ;;  %v1833_v57 = vld [vmem:[#allocation2 + $0x1790] sm:$0xff]  ;;  %v2922_v58 = vpop.f32.mrf.mxu2 }
 0x289   : > { %3470 = vmatpush.msra.mxu2 %v2184_v27  ;;  %3279 = vmatpush.msra.mxu1 %v1382_v33  ;;  %v2853_v52 = vpop.f32.mrf.mxu1  ;;  %v2834_v23 = vadd.f32 %v2833_v26, %v2810_v9  ;;  %v2183_v60 = vld [vmem:[#allocation2 + $0x2280] sm:$0xff]  ;;  %v1801_v61 = vld [vmem:[#allocation2 + $0x1690] sm:$0xff]  ;;  %v1416_v26 = vld [vmem:[#allocation2 + $0xa88] sm:$0xff] }
 0x28a   : > { %3302 = vmatpush.msra.mxu3 %v1894_v0  ;;  %3367 = vmatpush.msrb.mxu0 %v2023_v1  ;;  %4485 = vst [vmem:[%s5241_s19 + $0x138] sm:$0xff] %v2788_v4  ;;  %v2854_v12 = vadd.f32 %v2853_v52, %v2831_v25  ;;  %v1671_v33 = vld [vmem:[#allocation2 + $0x1280] sm:$0xff]  ;;  %v1769_v4 = vld [vmem:[#allocation2 + $0x1590] sm:$0xff]  ;;  %v2024_v9 = vld [vmem:[#allocation2 + $0x1d88] sm:$0xff] }
 0x28b   : > { %3471 = vmatpush.msra.mxu2 %v2152_v14  ;;  %3280 = vmatpush.msra.mxu1 %v1350_v2  ;;  %v2151_v0 = vld [vmem:[#allocation2 + $0x2180] sm:$0xff]  ;;  %v1512_v14 = vld [vmem:[#allocation2 + $0xd88] sm:$0xff] }
 0x28c   : > { %3303 = vmatpush.msra.mxu3 %v1862_v47  ;;  %3368 = vmatpush.msrb.mxu0 %v1991_v8  ;;  %4454 = vst [vmem:[%s5241_s19 + $0x40] sm:$0xff] %v2854_v12  ;;  %v1639_v2 = vld [vmem:[#allocation2 + $0x1180] sm:$0xff]  ;;  %v1480_v8 = vld [vmem:[#allocation2 + $0xc88] sm:$0xff]  ;;  %v1737_v12 = vld [vmem:[#allocation2 + $0x1490] sm:$0xff] }
 0x28d   : > { %3472 = vmatpush.msra.mxu2 %v2120_v37  ;;  %3281 = vmatpush.msra.mxu1 %v1318_v59  ;;  %v2119_v47 = vld [vmem:[#allocation2 + $0x2080] sm:$0xff]  ;;  %v2088_v59 = vld [vmem:[#allocation2 + $0x1f88] sm:$0xff] }
 0x28e   : > { %3304 = vmatpush.msra.mxu3 %v1830_v7  ;;  %3369 = vmatpush.msrb.mxu0 %v1959_v53  ;;  %v1607_v52 = vld [vmem:[#allocation2 + $0x1080] sm:$0xff]  ;;  %v1448_v7 = vld [vmem:[#allocation2 + $0xb88] sm:$0xff]  ;;  %v1577_v53 = vld [vmem:[#allocation2 + $0xf90] sm:$0xff] }
 0x28f   : > { %3503 = vmatpush.msrb.mxu2 %v2089_v63  ;;  %4686 = vmatmul.msk.f32.gmra.mxu3 %vm2231_vm9, %v5181_v54  ;;  %v2056_v63 = vld [vmem:[#allocation2 + $0x1e88] sm:$0xff] }
 0x290   : > { %4687 = vmatmul.msk.f32.vlgmr.msra.gmra.mxu0 %vm2231_vm9, %v5171_v19  ;;  %3361 = vmatmul.f32.gmra.mxu2 %v5147_v6 }
 0x291   : > { %3282 = vmatpush.msra.mxu1 %v1286_v15  ;;  %3305 = vmatpush.msra.mxu3 %v1798_v22  ;;  %v2925_v15 = vpop.f32.mrf.mxu2  ;;  %v1705_v22 = vld [vmem:[#allocation2 + $0x1390] sm:$0xff] }
 0x292   : > { %3370 = vmatpush.msrb.mxu0 %v1927_v32  ;;  %3504 = vmatpush.msrb.mxu2 %v2057_v46  ;;  %v2856_v51 = vpop.f32.mrf.mxu1  ;;  %v1545_v46 = vld [vmem:[#allocation2 + $0xe90] sm:$0xff] }
 0x293   : > { %3283 = vmatpush.msra.mxu1 %v1254_v28  ;;  %3306 = vmatpush.msra.mxu3 %v1766_v29  ;;  %v2857_v36 = vadd.f32 %v2856_v51, %v2834_v23  ;;  %v1673_v29 = vld [vmem:[#allocation2 + $0x1290] sm:$0xff]  ;;  %v1352_v51 = vld [vmem:[#allocation2 + $0x888] sm:$0xff] }
 0x294   : > { %3371 = vmatpush.msrb.mxu0 %v1895_v31  ;;  %3505 = vmatpush.msrb.mxu2 %v2025_v16  ;;  %v1384_v31 = vld [vmem:[#allocation2 + $0x988] sm:$0xff]  ;;  %v1513_v23 = vld [vmem:[#allocation2 + $0xd90] sm:$0xff] }
 0x295   : > { %3284 = vmatpush.msra.mxu1 %v1222_v39  ;;  %3307 = vmatpush.msra.mxu3 %v1734_v3  ;;  %4486 = vst [vmem:[%s5241_s19 + $0x140] sm:$0xff] %v2857_v36  ;;  %v1992_v39 = vld [vmem:[#allocation2 + $0x1c88] sm:$0xff]  ;;  %v1641_v3 = vld [vmem:[#allocation2 + $0x1190] sm:$0xff] }
 0x296   : > { %3372 = vmatpush.msrb.mxu0 %v1863_v18  ;;  %3506 = vmatpush.msrb.mxu2 %v1993_v34  ;;  %v1481_v34 = vld [vmem:[#allocation2 + $0xc90] sm:$0xff]  ;;  %v1960_v36 = vld [vmem:[#allocation2 + $0x1b88] sm:$0xff] }
 0x297   : > { %3285 = vmatpush.msra.mxu1 %v1190_v62  ;;  %3308 = vmatpush.msra.mxu3 %v1702_v13  ;;  %v1609_v62 = vld [vmem:[#allocation2 + $0x1090] sm:$0xff] }
 0x298   : > { %3373 = vmatpush.msrb.mxu0 %v1831_v45  ;;  %3507 = vmatpush.msrb.mxu2 %v1961_v43  ;;  %v1320_v45 = vld [vmem:[#allocation2 + $0x788] sm:$0xff] }
 0x299   : > { %4688 = vmatmul.msk.f32.gmra.mxu0 %vm2231_vm9, %v5181_v54  ;;  %4691 = vmatmul.msk.f32.vlgmr.msra.gmra.mxu2 %vm2231_vm9, %v5171_v19  ;;  %v2968_v43 = vpop.f32.mrf.mxu2 }
 0x29a   : > { %3286 = vmatpush.msra.mxu1 %v1158_v41  ;;  %3309 = vmatpush.msra.mxu3 %v1670_v42  ;;  %v1449_v41 = vld [vmem:[#allocation2 + $0xb90] sm:$0xff]  ;;  %v1579_v42 = vld [vmem:[#allocation2 + $0xfa0] sm:$0xff] }
 0x29b   : > { %3374 = vmatpush.msrb.mxu0 %v1799_v44  ;;  %3508 = vmatpush.msrb.mxu2 %v1929_v17  ;;  %v1928_v44 = vld [vmem:[#allocation2 + $0x1a88] sm:$0xff] }
 0x29c   : > { %3287 = vmatpush.msra.mxu1 %v1126_v20  ;;  %3310 = vmatpush.msra.mxu3 %v1638_v50  ;;  %v1288_v20 = vld [vmem:[#allocation2 + $0x688] sm:$0xff]  ;;  %v1417_v50 = vld [vmem:[#allocation2 + $0xa90] sm:$0xff] }
 0x29d   : > { %3375 = vmatpush.msrb.mxu0 %v1767_v55  ;;  %3509 = vmatpush.msrb.mxu2 %v1897_v35  ;;  %v1547_v35 = vld [vmem:[#allocation2 + $0xea0] sm:$0xff] }
 0x29e   : > { %3288 = vmatpush.msra.mxu1 %v1094_v11  ;;  %3311 = vmatpush.msra.mxu3 %v1606_v56  ;;  %v1896_v11 = vld [vmem:[#allocation2 + $0x1988] sm:$0xff] }
 0x29f   : > { %3376 = vmatpush.msrb.mxu0 %v1735_v40  ;;  %3510 = vmatpush.msrb.mxu2 %v1865_v21  ;;  %v1256_v40 = vld [vmem:[#allocation2 + $0x588] sm:$0xff]  ;;  %v1385_v21 = vld [vmem:[#allocation2 + $0x990] sm:$0xff] }
 0x2a0   : > { %3289 = vmatmul.f32.vlgmr.msra.gmra.mxu1 %v5130_v48  ;;  %3312 = vmatmul.f32.vlgmr.msra.gmra.mxu3 %v5159_v10  ;;  %v2876_v27 = vpop.f32.mrf.mxu3 }
 0x2a1   : > { %3400 = vmatpush.msrb.mxu1 %v2215_v30  ;;  %3411 = vmatpush.msrb.mxu3 %v1576_v49  ;;  %v1515_v30 = vld [vmem:[#allocation2 + $0xda0] sm:$0xff]  ;;  %v1864_v49 = vld [vmem:[#allocation2 + $0x1888] sm:$0xff] }
 0x2a2   : > { %3377 = vmatpush.msrb.mxu0 %v1703_v5  ;;  %3511 = vmatpush.msrb.mxu2 %v1833_v57  ;;  %v2899_v1 = vpop.f32.mrf.mxu1  ;;  %v1224_v5 = vld [vmem:[#allocation2 + $0x488] sm:$0xff]  ;;  %v1353_v57 = vld [vmem:[#allocation2 + $0x890] sm:$0xff] }
 0x2a3   : > { %3401 = vmatpush.msrb.mxu1 %v2183_v60  ;;  %3412 = vmatpush.msrb.mxu3 %v1544_v24  ;;  %v2900_v25 = vadd.f32 %v2899_v1, %v2876_v27  ;;  %v1832_v60 = vld [vmem:[#allocation2 + $0x1788] sm:$0xff] }
 0x2a4   : > { %4692 = vmatmul.msk.f32.gmra.mxu2 %vm2231_vm9, %v5181_v54  ;;  %3378 = vmatpush.msrb.mxu0 %v1671_v33  ;;  %v1192_v24 = vld [vmem:[#allocation2 + $0x388] sm:$0xff]  ;;  %v1321_v33 = vld [vmem:[#allocation2 + $0x790] sm:$0xff] }
 0x2a5   : > { %3512 = vmatpush.msrb.mxu2 %v1801_v61  ;;  %3402 = vmatpush.msrb.mxu1 %v2151_v0  ;;  %v2923_v37 = vadd.f32 %v2922_v58, %v2900_v25  ;;  %v2945_v13 = vpop.f32.mrf.mxu0  ;;  %v1483_v58 = vld [vmem:[#allocation2 + $0xca0] sm:$0xff]  ;;  %v2971_v61 = vpop.f32.mrf.mxu2  ;;  %v1800_v1 = vld [vmem:[#allocation2 + $0x1688] sm:$0xff] }
 0x2a6   : > { %3413 = vmatpush.msrb.mxu3 %v1512_v14  ;;  %3379 = vmatpush.msrb.mxu0 %v1639_v2  ;;  %v2969_v17 = vadd.f32 %v2968_v43, %v2945_v13  ;;  %v1451_v0 = vld [vmem:[#allocation2 + $0xba0] sm:$0xff]  ;;  %v1160_v14 = vld [vmem:[#allocation2 + $0x288] sm:$0xff]  ;;  %v1289_v2 = vld [vmem:[#allocation2 + $0x690] sm:$0xff] }
 0x2a7   : > { %3513 = vmatpush.msrb.mxu2 %v1769_v4  ;;  %3403 = vmatpush.msrb.mxu1 %v2119_v47  ;;  %4455 = vst [vmem:[%s5241_s19 + $0x48] sm:$0xff] %v2923_v37  ;;  %v1419_v4 = vld [vmem:[#allocation2 + $0xaa0] sm:$0xff]  ;;  %v1768_v47 = vld [vmem:[#allocation2 + $0x1588] sm:$0xff]  ;;  %v1257_v37 = vld [vmem:[#allocation2 + $0x590] sm:$0xff] }
 0x2a8   : > { %3414 = vmatpush.msrb.mxu3 %v1480_v8  ;;  %3380 = vmatpush.msrb.mxu0 %v1607_v52  ;;  %v1128_v52 = vld [vmem:[#allocation2 + $0x188] sm:$0xff]  ;;  %v1578_v13 = vld [vmem:[#allocation2 + $0xf98] sm:$0xff]  ;;  %v1227_v43 = vld [vmem:[#allocation2 + $0x4a0] sm:$0xff] }
 0x2a9   : > { %3434 = vmatpush.msra.mxu1 %v2088_v59  ;;  %3514 = vmatpush.msrb.mxu2 %v1737_v12  ;;  %v1387_v12 = vld [vmem:[#allocation2 + $0x9a0] sm:$0xff] }
 0x2aa   : > { %3292 = vmatmul.f32.gmra.mxu1 %v5147_v6  ;;  %3315 = vmatmul.f32.gmra.mxu3 %v5168_v38  ;;  %v2879_v32 = vpop.f32.mrf.mxu3 }
 0x2ab   : > { %3381 = vmatmul.f32.vlgmr.msrb.gmra.mxu0 %v5159_v10  ;;  %3415 = vmatpush.msrb.mxu3 %v1448_v7  ;;  %v2902_v28 = vpop.f32.mrf.mxu1  ;;  %v1736_v7 = vld [vmem:[#allocation2 + $0x1488] sm:$0xff] }
 0x2ac   : > { %3480 = vmatpush.msra.mxu0 %v1577_v53  ;;  %3435 = vmatpush.msra.mxu1 %v2056_v63  ;;  %v2903_v16 = vadd.f32 %v2902_v28, %v2879_v32  ;;  %v1096_v53 = vld [vmem:[#allocation2 + $0x88] sm:$0xff]  ;;  %v1225_v63 = vld [vmem:[#allocation2 + $0x490] sm:$0xff] }
 0x2ad   : > { %3515 = vmatpush.msrb.mxu2 %v1705_v22  ;;  %3416 = vmatpush.msrb.mxu3 %v1416_v26  ;;  %v1704_v22 = vld [vmem:[#allocation2 + $0x1388] sm:$0xff]  ;;  %v2217_v26 = vld [vmem:[#allocation2 + $0x2390] sm:$0xff] }
 0x2ae   : > { %3481 = vmatpush.msra.mxu0 %v1545_v46  ;;  %3436 = vmatpush.msra.mxu1 %v2024_v9  ;;  %v2926_v18 = vadd.f32 %v2925_v15, %v2903_v16  ;;  %v1355_v15 = vld [vmem:[#allocation2 + $0x8a0] sm:$0xff]  ;;  %v1193_v32 = vld [vmem:[#allocation2 + $0x390] sm:$0xff]  ;;  %v1672_v9 = vld [vmem:[#allocation2 + $0x1288] sm:$0xff] }
 0x2af   : > { %3516 = vmatpush.msrb.mxu2 %v1673_v29  ;;  %3417 = vmatpush.msrb.mxu3 %v1384_v31  ;;  %v2948_v27 = vpop.f32.mrf.mxu0  ;;  %v1323_v46 = vld [vmem:[#allocation2 + $0x7a0] sm:$0xff]  ;;  %v2185_v28 = vld [vmem:[#allocation2 + $0x2290] sm:$0xff] }
 0x2b0   : > { %3482 = vmatpush.msra.mxu0 %v1513_v23  ;;  %3437 = vmatpush.msra.mxu1 %v1992_v39  ;;  %4487 = vst [vmem:[%s5241_s19 + $0x148] sm:$0xff] %v2926_v18  ;;  %v2972_v25 = vadd.f32 %v2971_v61, %v2948_v27  ;;  %v1161_v29 = vld [vmem:[#allocation2 + $0x290] sm:$0xff]  ;;  %v1291_v31 = vld [vmem:[#allocation2 + $0x6a0] sm:$0xff]  ;;  %v1640_v23 = vld [vmem:[#allocation2 + $0x1188] sm:$0xff] }
 0x2b1   : > { %3517 = vmatpush.msrb.mxu2 %v1641_v3  ;;  %3418 = vmatpush.msrb.mxu3 %v1352_v51  ;;  %v2153_v39 = vld [vmem:[#allocation2 + $0x2190] sm:$0xff]  ;;  %v1259_v51 = vld [vmem:[#allocation2 + $0x5a0] sm:$0xff]  ;;  %v1608_v18 = vld [vmem:[#allocation2 + $0x1088] sm:$0xff] }
 0x2b2   : > { %3483 = vmatpush.msra.mxu0 %v1481_v34  ;;  %3438 = vmatpush.msra.mxu1 %v1960_v36  ;;  %v1129_v3 = vld [vmem:[#allocation2 + $0x190] sm:$0xff]  ;;  %v1962_v27 = vld [vmem:[#allocation2 + $0x1b98] sm:$0xff]  ;;  %v2091_v61 = vld [vmem:[#allocation2 + $0x1fa0] sm:$0xff] }
 0x2b3   : > { %3518 = vmatpush.msrb.mxu2 %v1609_v62  ;;  %3384 = vmatmul.f32.gmra.mxu0 %v5168_v38  ;;  %v2121_v34 = vld [vmem:[#allocation2 + $0x2090] sm:$0xff] }
 0x2b4   : > { %4689 = vmatmul.msk.f32.vlgmr.msrb.gmra.mxu1 %vm2231_vm9, %v5171_v19  ;;  %3419 = vmatpush.msrb.mxu3 %v1320_v45  ;;  %v2991_v55 = vpop.f32.mrf.mxu3  ;;  %v1097_v62 = vld [vmem:[#allocation2 + $0x90] sm:$0xff]  ;;  %v2090_v45 = vld [vmem:[#allocation2 + $0x1f98] sm:$0xff] }
 0x2b5   : > { %3484 = vmatpush.msra.mxu0 %v1449_v41  ;;  %3519 = vmatmul.f32.vlgmr.msrb.gmra.mxu2 %v5159_v10  ;;  %v2992_v56 = vadd.f32 %v2991_v55, %v2969_v17  ;;  %v1546_v41 = vld [vmem:[#allocation2 + $0xe98] sm:$0xff]  ;;  %v1195_v17 = vld [vmem:[#allocation2 + $0x3a0] sm:$0xff] }
 0x2b6   : > { %3618 = vmatpush.msra.mxu2 %v1579_v42  ;;  %3439 = vmatpush.msra.mxu1 %v1928_v44  ;;  %v2218_v42 = vld [vmem:[#allocation2 + $0x2398] sm:$0xff] }
 0x2b7   : > { %3420 = vmatpush.msrb.mxu3 %v1288_v20  ;;  %3485 = vmatpush.msra.mxu0 %v1417_v50  ;;  %4456 = vst [vmem:[%s5241_s19 + $0x50] sm:$0xff] %v2992_v56  ;;  %v2058_v44 = vld [vmem:[#allocation2 + $0x1e98] sm:$0xff] }
 0x2b8   : > { %3619 = vmatpush.msra.mxu2 %v1547_v35  ;;  %3440 = vmatpush.msra.mxu1 %v1896_v11  ;;  %v1514_v20 = vld [vmem:[#allocation2 + $0xd98] sm:$0xff] }
 0x2b9   : > { %3421 = vmatpush.msrb.mxu3 %v1256_v40  ;;  %3486 = vmatpush.msra.mxu0 %v1385_v21  ;;  %v3060_v16 = vpop.f32.mrf.mxu0  ;;  %v2186_v55 = vld [vmem:[#allocation2 + $0x2298] sm:$0xff]  ;;  %v1163_v40 = vld [vmem:[#allocation2 + $0x2a0] sm:$0xff] }
 0x2ba   : > { %3620 = vmatpush.msra.mxu2 %v1515_v30  ;;  %3441 = vmatpush.msra.mxu1 %v1864_v49  ;;  %v2026_v35 = vld [vmem:[#allocation2 + $0x1d98] sm:$0xff] }
 0x2bb   : > { %3422 = vmatpush.msrb.mxu3 %v1224_v5  ;;  %3487 = vmatpush.msra.mxu0 %v1353_v57  ;;  %v1482_v21 = vld [vmem:[#allocation2 + $0xc98] sm:$0xff]  ;;  %v1131_v57 = vld [vmem:[#allocation2 + $0x1a0] sm:$0xff] }
 0x2bc   : > { %3621 = vmatpush.msra.mxu2 %v1483_v58  ;;  %3442 = vmatpush.msra.mxu1 %v1832_v60  ;;  %v2154_v30 = vld [vmem:[#allocation2 + $0x2198] sm:$0xff] }
 0x2bd   : > { %4690 = vmatmul.msk.f32.gmra.mxu1 %vm2231_vm9, %v5181_v54  ;;  %3423 = vmatpush.msrb.mxu3 %v1192_v24  ;;  %v1994_v49 = vld [vmem:[#allocation2 + $0x1c98] sm:$0xff] }
 0x2be   : > { %3488 = vmatpush.msra.mxu0 %v1321_v33  ;;  %3522 = vmatmul.f32.gmra.mxu2 %v5168_v38  ;;  %v2994_v8 = vpop.f32.mrf.mxu3  ;;  %v2122_v60 = vld [vmem:[#allocation2 + $0x2098] sm:$0xff]  ;;  %v1099_v33 = vld [vmem:[#allocation2 + $0xa0] sm:$0xff] }
 0x2bf   : > { %3622 = vmatpush.msra.mxu2 %v1451_v0  ;;  %3443 = vmatpush.msra.mxu1 %v1800_v1  ;;  %v2995_v59 = vadd.f32 %v2994_v8, %v2972_v25  ;;  %v1450_v24 = vld [vmem:[#allocation2 + $0xb98] sm:$0xff]  ;;  %v2220_v0 = vld [vmem:[#allocation2 + $0x23a8] sm:$0xff]  ;;  %v2059_v25 = vld [vmem:[#allocation2 + $0x1ea0] sm:$0xff] }
 0x2c0   : > { %3424 = vmatpush.msrb.mxu3 %v1160_v14  ;;  %3489 = vmatpush.msra.mxu0 %v1289_v2  ;;  %v1418_v1 = vld [vmem:[#allocation2 + $0xa98] sm:$0xff]  ;;  %v2188_v8 = vld [vmem:[#allocation2 + $0x22a8] sm:$0xff] }
 0x2c1   : > { %3623 = vmatpush.msra.mxu2 %v1419_v4  ;;  %3444 = vmatpush.msra.mxu1 %v1768_v47  ;;  %4488 = vst [vmem:[%s5241_s19 + $0x150] sm:$0xff] %v2995_v59  ;;  %v1930_v2 = vld [vmem:[#allocation2 + $0x1a98] sm:$0xff]  ;;  %v3083_v47 = vpop.f32.mrf.mxu2 }
 0x2c2   : > { %3425 = vmatpush.msrb.mxu3 %v1128_v52  ;;  %3490 = vmatpush.msra.mxu0 %v1257_v37  ;;  %v3063_v11 = vpop.f32.mrf.mxu0  ;;  %v1386_v52 = vld [vmem:[#allocation2 + $0x998] sm:$0xff] }
 0x2c3   : > { %3624 = vmatpush.msra.mxu2 %v1387_v12  ;;  %3445 = vmatpush.msra.mxu1 %v1736_v7  ;;  %v1898_v59 = vld [vmem:[#allocation2 + $0x1998] sm:$0xff]  ;;  %v2027_v12 = vld [vmem:[#allocation2 + $0x1da0] sm:$0xff]  ;;  %v2156_v7 = vld [vmem:[#allocation2 + $0x21a8] sm:$0xff] }
 0x2c4   : > { %3426 = vmatpush.msrb.mxu3 %v1096_v53  ;;  %3491 = vmatpush.msra.mxu0 %v1225_v63  ;;  %v1354_v53 = vld [vmem:[#allocation2 + $0x898] sm:$0xff] }
 0x2c5   : > { %3625 = vmatpush.msra.mxu2 %v1355_v15  ;;  %3427 = vmatmul.f32.vlgmr.msrb.gmra.mxu3 %v5130_v48 }
 0x2c6   : > { %3446 = vmatpush.msra.mxu1 %v1704_v22  ;;  %3538 = vmatpush.msra.mxu3 %v2217_v26  ;;  %v1866_v22 = vld [vmem:[#allocation2 + $0x1898] sm:$0xff]  ;;  %v1995_v26 = vld [vmem:[#allocation2 + $0x1ca0] sm:$0xff] }
 0x2c7   : > { %3492 = vmatpush.msra.mxu0 %v1193_v32  ;;  %3626 = vmatpush.msra.mxu2 %v1323_v46  ;;  %v2124_v46 = vld [vmem:[#allocation2 + $0x20a8] sm:$0xff] }
 0x2c8   : > { %3447 = vmatpush.msra.mxu1 %v1672_v9  ;;  %3539 = vmatpush.msra.mxu3 %v2185_v28  ;;  %v1322_v9 = vld [vmem:[#allocation2 + $0x798] sm:$0xff] }
 0x2c9   : > { %3493 = vmatpush.msra.mxu0 %v1161_v29  ;;  %3627 = vmatpush.msra.mxu2 %v1291_v31  ;;  %v3014_v36 = vpop.f32.mrf.mxu1  ;;  %v1834_v29 = vld [vmem:[#allocation2 + $0x1798] sm:$0xff]  ;;  %v1963_v31 = vld [vmem:[#allocation2 + $0x1ba0] sm:$0xff] }
 0x2ca   : > { %3448 = vmatpush.msra.mxu1 %v1640_v23  ;;  %3540 = vmatpush.msra.mxu3 %v2153_v39  ;;  %v1290_v23 = vld [vmem:[#allocation2 + $0x698] sm:$0xff] }
 0x2cb   : > { %3494 = vmatpush.msra.mxu0 %v1129_v3  ;;  %3628 = vmatpush.msra.mxu2 %v1259_v51  ;;  %v1802_v39 = vld [vmem:[#allocation2 + $0x1698] sm:$0xff]  ;;  %v1931_v51 = vld [vmem:[#allocation2 + $0x1aa0] sm:$0xff] }
 0x2cc   : > { %3449 = vmatpush.msra.mxu1 %v1608_v18  ;;  %3541 = vmatpush.msra.mxu3 %v2121_v34  ;;  %v2061_v18 = vld [vmem:[#allocation2 + $0x1eb0] sm:$0xff]  ;;  %v3086_v34 = vpop.f32.mrf.mxu2 }
 0x2cd   : > { %3450 = vmatmul.f32.vlgmr.msra.gmra.mxu1 %v5159_v10  ;;  %3495 = vmatpush.msra.mxu0 %v1097_v62  ;;  %v1770_v62 = vld [vmem:[#allocation2 + $0x1598] sm:$0xff] }
 0x2ce   : > { %3549 = vmatpush.msrb.mxu1 %v1578_v13  ;;  %3572 = vmatpush.msrb.mxu3 %v2090_v45  ;;  %v1899_v13 = vld [vmem:[#allocation2 + $0x19a0] sm:$0xff]  ;;  %v2029_v45 = vld [vmem:[#allocation2 + $0x1db0] sm:$0xff] }
 0x2cf   : > { %3629 = vmatpush.msra.mxu2 %v1227_v43  ;;  %3430 = vmatmul.f32.gmra.mxu3 %v5147_v6  ;;  %v3037_v50 = vpop.f32.mrf.mxu3 }
 0x2d0   : > { %3496 = vmatmul.f32.vlgmr.msra.gmra.mxu0 %v5130_v48  ;;  %3550 = vmatpush.msrb.mxu1 %v1546_v41  ;;  %v3038_v56 = vadd.f32 %v3037_v50, %v3014_v36  ;;  %v1258_v36 = vld [vmem:[#allocation2 + $0x598] sm:$0xff] }
 0x2d1   : > { %3607 = vmatpush.msrb.mxu0 %v2218_v42  ;;  %3573 = vmatpush.msrb.mxu3 %v2058_v44  ;;  %v1226_v41 = vld [vmem:[#allocation2 + $0x498] sm:$0xff] }
 0x2d2   : > { %3630 = vmatpush.msra.mxu2 %v1195_v17  ;;  %3551 = vmatpush.msrb.mxu1 %v1514_v20  ;;  %v3061_v5 = vadd.f32 %v3060_v16, %v3038_v56  ;;  %v2093_v16 = vld [vmem:[#allocation2 + $0x1fb0] sm:$0xff]  ;;  %v1738_v42 = vld [vmem:[#allocation2 + $0x1498] sm:$0xff]  ;;  %v1867_v17 = vld [vmem:[#allocation2 + $0x18a0] sm:$0xff] }
 0x2d3   : > { %3608 = vmatpush.msrb.mxu0 %v2186_v55  ;;  %3574 = vmatpush.msrb.mxu3 %v2026_v35  ;;  %v3017_v58 = vpop.f32.mrf.mxu1  ;;  %v1997_v20 = vld [vmem:[#allocation2 + $0x1cb0] sm:$0xff]  ;;  %v1194_v55 = vld [vmem:[#allocation2 + $0x398] sm:$0xff] }
 0x2d4   : > { %3631 = vmatpush.msra.mxu2 %v1163_v40  ;;  %3552 = vmatpush.msrb.mxu1 %v1482_v21  ;;  %4457 = vst [vmem:[%s5241_s19 + $0x58] sm:$0xff] %v3061_v5  ;;  %v3106_v14 = vpop.f32.mrf.mxu0  ;;  %v1706_v35 = vld [vmem:[#allocation2 + $0x1398] sm:$0xff]  ;;  %v1965_v56 = vld [vmem:[#allocation2 + $0x1bb0] sm:$0xff] }
 0x2d5   : > { %3609 = vmatpush.msrb.mxu0 %v2154_v30  ;;  %3575 = vmatpush.msrb.mxu3 %v1994_v49  ;;  %v3107_v63 = vadd.f32 %v3106_v14, %v3083_v47  ;;  %v1162_v40 = vld [vmem:[#allocation2 + $0x298] sm:$0xff]  ;;  %v1803_v30 = vld [vmem:[#allocation2 + $0x16a0] sm:$0xff]  ;;  %v1933_v49 = vld [vmem:[#allocation2 + $0x1ab0] sm:$0xff] }
 0x2d6   : > { %3632 = vmatpush.msra.mxu2 %v1131_v57  ;;  %3453 = vmatmul.f32.gmra.mxu1 %v5168_v38  ;;  %v1674_v21 = vld [vmem:[#allocation2 + $0x1298] sm:$0xff]  ;;  %v1707_v14 = vld [vmem:[#allocation2 + $0x13a0] sm:$0xff]  ;;  %v1548_v47 = vld [vmem:[#allocation2 + $0xea8] sm:$0xff] }
 0x2d7   : > { %3610 = vmatpush.msrb.mxu0 %v2122_v60  ;;  %3553 = vmatpush.msrb.mxu1 %v1450_v24  ;;  %v1130_v5 = vld [vmem:[#allocation2 + $0x198] sm:$0xff]  ;;  %v1901_v60 = vld [vmem:[#allocation2 + $0x19b0] sm:$0xff] }
 0x2d8   : > { %3576 = vmatpush.msrb.mxu3 %v1962_v27  ;;  %3633 = vmatpush.msra.mxu2 %v1099_v33  ;;  %v1642_v57 = vld [vmem:[#allocation2 + $0x1198] sm:$0xff]  ;;  %v1739_v33 = vld [vmem:[#allocation2 + $0x14a0] sm:$0xff] }
 0x2d9   : > { %3641 = vmatpush.msra.mxu0 %v2091_v61  ;;  %4693 = vmatmul.msk.f32.vlgmr.msra.gmra.mxu3 %vm2231_vm9, %v5171_v19  ;;  %v3040_v4 = vpop.f32.mrf.mxu3  ;;  %v1098_v24 = vld [vmem:[#allocation2 + $0x98] sm:$0xff]  ;;  %v1869_v61 = vld [vmem:[#allocation2 + $0x18b0] sm:$0xff] }
 0x2da   : > { %3499 = vmatmul.f32.gmra.mxu0 %v5147_v6  ;;  %3634 = vmatmul.f32.vlgmr.msra.gmra.mxu2 %v5130_v48  ;;  %v3041_v37 = vadd.f32 %v3040_v4, %v3017_v58  ;;  %v1771_v58 = vld [vmem:[#allocation2 + $0x15a0] sm:$0xff]  ;;  %v1610_v27 = vld [vmem:[#allocation2 + $0x1098] sm:$0xff] }
 0x2db   : > { %3745 = vmatpush.msrb.mxu2 %v2220_v0  ;;  %3554 = vmatpush.msrb.mxu1 %v1418_v1  ;;  %v2219_v0 = vld [vmem:[#allocation2 + $0x23a0] sm:$0xff]  ;;  %v1580_v1 = vld [vmem:[#allocation2 + $0xfa8] sm:$0xff] }
 0x2dc   : > { %3577 = vmatpush.msrb.mxu3 %v1930_v2  ;;  %3642 = vmatpush.msra.mxu0 %v2059_v25  ;;  %v3064_v15 = vadd.f32 %v3063_v11, %v3041_v37  ;;  %v3109_v3 = vpop.f32.mrf.mxu0  ;;  %v1835_v11 = vld [vmem:[#allocation2 + $0x17a0] sm:$0xff]  ;;  %v1837_v2 = vld [vmem:[#allocation2 + $0x17b0] sm:$0xff]  ;;  %v3198_v25 = vpop.f32.mrf.mxu2 }
 0x2dd   : > { %3746 = vmatpush.msrb.mxu2 %v2188_v8  ;;  %3555 = vmatpush.msrb.mxu1 %v1386_v52  ;;  %v3129_v32 = vpop.f32.mrf.mxu1  ;;  %v3110_v43 = vadd.f32 %v3109_v3, %v3086_v34  ;;  %v2187_v4 = vld [vmem:[#allocation2 + $0x22a0] sm:$0xff]  ;;  %v1805_v37 = vld [vmem:[#allocation2 + $0x16b0] sm:$0xff]  ;;  %v1420_v3 = vld [vmem:[#allocation2 + $0xaa8] sm:$0xff] }
 0x2de   : > { %3578 = vmatpush.msrb.mxu3 %v1898_v59  ;;  %3643 = vmatpush.msra.mxu0 %v2027_v12  ;;  %4489 = vst [vmem:[%s5241_s19 + $0x158] sm:$0xff] %v3064_v15  ;;  %v3130_v28 = vadd.f32 %v3129_v32, %v3107_v63  ;;  %v1675_v52 = vld [vmem:[#allocation2 + $0x12a0] sm:$0xff]  ;;  %v1773_v15 = vld [vmem:[#allocation2 + $0x15b0] sm:$0xff]  ;;  %v2028_v34 = vld [vmem:[#allocation2 + $0x1da8] sm:$0xff] }
 0x2df   : > { %3747 = vmatpush.msrb.mxu2 %v2156_v7  ;;  %3556 = vmatpush.msrb.mxu1 %v1354_v53  ;;  %v2155_v59 = vld [vmem:[#allocation2 + $0x21a0] sm:$0xff]  ;;  %v1516_v7 = vld [vmem:[#allocation2 + $0xda8] sm:$0xff] }
 0x2e0   : > { %3579 = vmatpush.msrb.mxu3 %v1866_v22  ;;  %3644 = vmatpush.msra.mxu0 %v1995_v26  ;;  %4458 = vst [vmem:[%s5241_s19 + $0x60] sm:$0xff] %v3130_v28  ;;  %v1643_v53 = vld [vmem:[#allocation2 + $0x11a0] sm:$0xff]  ;;  %v1484_v26 = vld [vmem:[#allocation2 + $0xca8] sm:$0xff]  ;;  %v1741_v28 = vld [vmem:[#allocation2 + $0x14b0] sm:$0xff] }
 0x2e1   : > { %3748 = vmatpush.msrb.mxu2 %v2124_v46  ;;  %3557 = vmatpush.msrb.mxu1 %v1322_v9  ;;  %v2123_v22 = vld [vmem:[#allocation2 + $0x20a0] sm:$0xff]  ;;  %v2092_v9 = vld [vmem:[#allocation2 + $0x1fa8] sm:$0xff] }
 0x2e2   : > { %3580 = vmatpush.msrb.mxu3 %v1834_v29  ;;  %3645 = vmatpush.msra.mxu0 %v1963_v31  ;;  %v1611_v32 = vld [vmem:[#allocation2 + $0x10a0] sm:$0xff]  ;;  %v1452_v29 = vld [vmem:[#allocation2 + $0xba8] sm:$0xff]  ;;  %v1581_v31 = vld [vmem:[#allocation2 + $0xfb0] sm:$0xff] }
 0x2e3   : > { %3779 = vmatpush.msra.mxu2 %v2093_v16  ;;  %4694 = vmatmul.msk.f32.gmra.mxu3 %vm2231_vm9, %v5181_v54  ;;  %v2060_v16 = vld [vmem:[#allocation2 + $0x1ea8] sm:$0xff] }
 0x2e4   : > { %4695 = vmatmul.msk.f32.vlgmr.msrb.gmra.mxu0 %vm2231_vm9, %v5171_v19  ;;  %3637 = vmatmul.f32.gmra.mxu2 %v5147_v6 }
 0x2e5   : > { %3558 = vmatpush.msrb.mxu1 %v1290_v23  ;;  %3581 = vmatpush.msrb.mxu3 %v1802_v39  ;;  %v3201_v23 = vpop.f32.mrf.mxu2  ;;  %v1709_v39 = vld [vmem:[#allocation2 + $0x13b0] sm:$0xff] }
 0x2e6   : > { %3646 = vmatpush.msra.mxu0 %v1931_v51  ;;  %3780 = vmatpush.msra.mxu2 %v2061_v18  ;;  %v3132_v44 = vpop.f32.mrf.mxu1  ;;  %v1549_v18 = vld [vmem:[#allocation2 + $0xeb0] sm:$0xff] }
 0x2e7   : > { %3559 = vmatpush.msrb.mxu1 %v1258_v36  ;;  %3582 = vmatpush.msrb.mxu3 %v1770_v62  ;;  %v3133_v50 = vadd.f32 %v3132_v44, %v3110_v43  ;;  %v1677_v62 = vld [vmem:[#allocation2 + $0x12b0] sm:$0xff]  ;;  %v1356_v44 = vld [vmem:[#allocation2 + $0x8a8] sm:$0xff] }
 0x2e8   : > { %3647 = vmatpush.msra.mxu0 %v1899_v13  ;;  %3781 = vmatpush.msra.mxu2 %v2029_v45  ;;  %v1388_v13 = vld [vmem:[#allocation2 + $0x9a8] sm:$0xff]  ;;  %v1517_v43 = vld [vmem:[#allocation2 + $0xdb0] sm:$0xff] }
 0x2e9   : > { %3560 = vmatpush.msrb.mxu1 %v1226_v41  ;;  %3583 = vmatpush.msrb.mxu3 %v1738_v42  ;;  %4490 = vst [vmem:[%s5241_s19 + $0x160] sm:$0xff] %v3133_v50  ;;  %v1996_v41 = vld [vmem:[#allocation2 + $0x1ca8] sm:$0xff]  ;;  %v1645_v42 = vld [vmem:[#allocation2 + $0x11b0] sm:$0xff] }
 0x2ea   : > { %3648 = vmatpush.msra.mxu0 %v1867_v17  ;;  %3782 = vmatpush.msra.mxu2 %v1997_v20  ;;  %v1485_v20 = vld [vmem:[#allocation2 + $0xcb0] sm:$0xff]  ;;  %v1964_v50 = vld [vmem:[#allocation2 + $0x1ba8] sm:$0xff] }
 0x2eb   : > { %3561 = vmatpush.msrb.mxu1 %v1194_v55  ;;  %3584 = vmatpush.msrb.mxu3 %v1706_v35  ;;  %v1613_v55 = vld [vmem:[#allocation2 + $0x10b0] sm:$0xff] }
 0x2ec   : > { %3649 = vmatpush.msra.mxu0 %v1835_v11  ;;  %3783 = vmatpush.msra.mxu2 %v1965_v56  ;;  %v1324_v11 = vld [vmem:[#allocation2 + $0x7a8] sm:$0xff] }
 0x2ed   : > { %4696 = vmatmul.msk.f32.gmra.mxu0 %vm2231_vm9, %v5181_v54  ;;  %4699 = vmatmul.msk.f32.vlgmr.msrb.gmra.mxu2 %vm2231_vm9, %v5171_v19  ;;  %v3244_v56 = vpop.f32.mrf.mxu2 }
 0x2ee   : > { %3562 = vmatpush.msrb.mxu1 %v1162_v40  ;;  %3585 = vmatpush.msrb.mxu3 %v1674_v21  ;;  %v1453_v40 = vld [vmem:[#allocation2 + $0xbb0] sm:$0xff]  ;;  %v1583_v21 = vld [vmem:[#allocation2 + $0xfc0] sm:$0xff] }
 0x2ef   : > { %3650 = vmatpush.msra.mxu0 %v1803_v30  ;;  %3784 = vmatpush.msra.mxu2 %v1933_v49  ;;  %v1932_v30 = vld [vmem:[#allocation2 + $0x1aa8] sm:$0xff] }
 0x2f0   : > { %3563 = vmatpush.msrb.mxu1 %v1130_v5  ;;  %3586 = vmatpush.msrb.mxu3 %v1642_v57  ;;  %v1292_v5 = vld [vmem:[#allocation2 + $0x6a8] sm:$0xff]  ;;  %v1421_v57 = vld [vmem:[#allocation2 + $0xab0] sm:$0xff] }
 0x2f1   : > { %3651 = vmatpush.msra.mxu0 %v1771_v58  ;;  %3785 = vmatpush.msra.mxu2 %v1901_v60  ;;  %v1551_v60 = vld [vmem:[#allocation2 + $0xec0] sm:$0xff] }
 0x2f2   : > { %3564 = vmatpush.msrb.mxu1 %v1098_v24  ;;  %3587 = vmatpush.msrb.mxu3 %v1610_v27  ;;  %v1900_v24 = vld [vmem:[#allocation2 + $0x19a8] sm:$0xff] }
 0x2f3   : > { %3652 = vmatpush.msra.mxu0 %v1739_v33  ;;  %3786 = vmatpush.msra.mxu2 %v1869_v61  ;;  %v1260_v33 = vld [vmem:[#allocation2 + $0x5a8] sm:$0xff]  ;;  %v1389_v61 = vld [vmem:[#allocation2 + $0x9b0] sm:$0xff] }
 0x2f4   : > { %3565 = vmatmul.f32.vlgmr.msrb.gmra.mxu1 %v5130_v48  ;;  %3588 = vmatmul.f32.vlgmr.msrb.gmra.mxu3 %v5159_v10  ;;  %v3152_v8 = vpop.f32.mrf.mxu3 }
 0x2f5   : > { %3676 = vmatpush.msra.mxu1 %v2219_v0  ;;  %3687 = vmatpush.msra.mxu3 %v1580_v1  ;;  %v1519_v0 = vld [vmem:[#allocation2 + $0xdc0] sm:$0xff]  ;;  %v1868_v1 = vld [vmem:[#allocation2 + $0x18a8] sm:$0xff] }
 0x2f6   : > { %3653 = vmatpush.msra.mxu0 %v1707_v14  ;;  %3787 = vmatpush.msra.mxu2 %v1837_v2  ;;  %v3175_v12 = vpop.f32.mrf.mxu1  ;;  %v1228_v14 = vld [vmem:[#allocation2 + $0x4a8] sm:$0xff]  ;;  %v1357_v2 = vld [vmem:[#allocation2 + $0x8b0] sm:$0xff] }
 0x2f7   : > { %3677 = vmatpush.msra.mxu1 %v2187_v4  ;;  %3688 = vmatpush.msra.mxu3 %v1548_v47  ;;  %v3176_v63 = vadd.f32 %v3175_v12, %v3152_v8  ;;  %v1836_v4 = vld [vmem:[#allocation2 + $0x17a8] sm:$0xff] }
 0x2f8   : > { %4700 = vmatmul.msk.f32.gmra.mxu2 %vm2231_vm9, %v5181_v54  ;;  %3654 = vmatpush.msra.mxu0 %v1675_v52  ;;  %v1196_v47 = vld [vmem:[#allocation2 + $0x3a8] sm:$0xff]  ;;  %v1325_v52 = vld [vmem:[#allocation2 + $0x7b0] sm:$0xff] }
 0x2f9   : > { %3788 = vmatpush.msra.mxu2 %v1805_v37  ;;  %3678 = vmatpush.msra.mxu1 %v2155_v59  ;;  %v3199_v46 = vadd.f32 %v3198_v25, %v3176_v63  ;;  %v3221_v35 = vpop.f32.mrf.mxu0  ;;  %v1487_v25 = vld [vmem:[#allocation2 + $0xcc0] sm:$0xff]  ;;  %v3247_v37 = vpop.f32.mrf.mxu2  ;;  %v1804_v12 = vld [vmem:[#allocation2 + $0x16a8] sm:$0xff] }
 0x2fa   : > { %3689 = vmatpush.msra.mxu3 %v1516_v7  ;;  %3655 = vmatpush.msra.mxu0 %v1643_v53  ;;  %v3245_v49 = vadd.f32 %v3244_v56, %v3221_v35  ;;  %v1455_v59 = vld [vmem:[#allocation2 + $0xbc0] sm:$0xff]  ;;  %v1164_v7 = vld [vmem:[#allocation2 + $0x2a8] sm:$0xff]  ;;  %v1293_v53 = vld [vmem:[#allocation2 + $0x6b0] sm:$0xff] }
 0x2fb   : > { %3789 = vmatpush.msra.mxu2 %v1773_v15  ;;  %3679 = vmatpush.msra.mxu1 %v2123_v22  ;;  %4459 = vst [vmem:[%s5241_s19 + $0x68] sm:$0xff] %v3199_v46  ;;  %v1423_v15 = vld [vmem:[#allocation2 + $0xac0] sm:$0xff]  ;;  %v1772_v22 = vld [vmem:[#allocation2 + $0x15a8] sm:$0xff]  ;;  %v1261_v46 = vld [vmem:[#allocation2 + $0x5b0] sm:$0xff] }
 0x2fc   : > { %3690 = vmatpush.msra.mxu3 %v1484_v26  ;;  %3656 = vmatpush.msra.mxu0 %v1611_v32  ;;  %v1132_v32 = vld [vmem:[#allocation2 + $0x1a8] sm:$0xff]  ;;  %v1582_v35 = vld [vmem:[#allocation2 + $0xfb8] sm:$0xff]  ;;  %v1231_v56 = vld [vmem:[#allocation2 + $0x4c0] sm:$0xff] }
 0x2fd   : > { %3710 = vmatpush.msrb.mxu1 %v2092_v9  ;;  %3790 = vmatpush.msra.mxu2 %v1741_v28  ;;  %v1391_v28 = vld [vmem:[#allocation2 + $0x9c0] sm:$0xff] }
 0x2fe   : > { %3568 = vmatmul.f32.gmra.mxu1 %v5147_v6  ;;  %3591 = vmatmul.f32.gmra.mxu3 %v5168_v38  ;;  %v3155_v51 = vpop.f32.mrf.mxu3 }
 0x2ff   : > { %3657 = vmatmul.f32.vlgmr.msra.gmra.mxu0 %v5159_v10  ;;  %3691 = vmatpush.msra.mxu3 %v1452_v29  ;;  %v3178_v36 = vpop.f32.mrf.mxu1  ;;  %v1740_v29 = vld [vmem:[#allocation2 + $0x14a8] sm:$0xff] }
 0x300   : > { %3756 = vmatpush.msrb.mxu0 %v1581_v31  ;;  %3711 = vmatpush.msrb.mxu1 %v2060_v16  ;;  %v3179_v45 = vadd.f32 %v3178_v36, %v3155_v51  ;;  %v1100_v31 = vld [vmem:[#allocation2 + $0xa8] sm:$0xff]  ;;  %v1229_v16 = vld [vmem:[#allocation2 + $0x4b0] sm:$0xff] }
 0x301   : > { %3791 = vmatpush.msra.mxu2 %v1709_v39  ;;  %3692 = vmatpush.msra.mxu3 %v1420_v3  ;;  %v1708_v39 = vld [vmem:[#allocation2 + $0x13a8] sm:$0xff]  ;;  %v2221_v3 = vld [vmem:[#allocation2 + $0x23b0] sm:$0xff] }
 0x302   : > { %3757 = vmatpush.msrb.mxu0 %v1549_v18  ;;  %3712 = vmatpush.msrb.mxu1 %v2028_v34  ;;  %v3202_v17 = vadd.f32 %v3201_v23, %v3179_v45  ;;  %v1359_v23 = vld [vmem:[#allocation2 + $0x8c0] sm:$0xff]  ;;  %v1197_v51 = vld [vmem:[#allocation2 + $0x3b0] sm:$0xff]  ;;  %v1676_v34 = vld [vmem:[#allocation2 + $0x12a8] sm:$0xff] }
 0x303   : > { %3792 = vmatpush.msra.mxu2 %v1677_v62  ;;  %3693 = vmatpush.msra.mxu3 %v1388_v13  ;;  %v3224_v8 = vpop.f32.mrf.mxu0  ;;  %v1327_v18 = vld [vmem:[#allocation2 + $0x7c0] sm:$0xff]  ;;  %v2189_v36 = vld [vmem:[#allocation2 + $0x22b0] sm:$0xff] }
 0x304   : > { %3758 = vmatpush.msrb.mxu0 %v1517_v43  ;;  %3713 = vmatpush.msrb.mxu1 %v1996_v41  ;;  %4491 = vst [vmem:[%s5241_s19 + $0x168] sm:$0xff] %v3202_v17  ;;  %v3248_v63 = vadd.f32 %v3247_v37, %v3224_v8  ;;  %v1165_v62 = vld [vmem:[#allocation2 + $0x2b0] sm:$0xff]  ;;  %v1295_v13 = vld [vmem:[#allocation2 + $0x6c0] sm:$0xff]  ;;  %v1644_v43 = vld [vmem:[#allocation2 + $0x11a8] sm:$0xff] }
 0x305   : > { %3793 = vmatpush.msra.mxu2 %v1645_v42  ;;  %3694 = vmatpush.msra.mxu3 %v1356_v44  ;;  %v2157_v41 = vld [vmem:[#allocation2 + $0x21b0] sm:$0xff]  ;;  %v1263_v44 = vld [vmem:[#allocation2 + $0x5c0] sm:$0xff]  ;;  %v1612_v17 = vld [vmem:[#allocation2 + $0x10a8] sm:$0xff] }
 0x306   : > { %3759 = vmatpush.msrb.mxu0 %v1485_v20  ;;  %3714 = vmatpush.msrb.mxu1 %v1964_v50  ;;  %v1133_v42 = vld [vmem:[#allocation2 + $0x1b0] sm:$0xff]  ;;  %v1966_v8 = vld [vmem:[#allocation2 + $0x1bb8] sm:$0xff]  ;;  %v2095_v37 = vld [vmem:[#allocation2 + $0x1fc0] sm:$0xff] }
 0x307   : > { %3794 = vmatpush.msra.mxu2 %v1613_v55  ;;  %3660 = vmatmul.f32.gmra.mxu0 %v5168_v38  ;;  %v2125_v20 = vld [vmem:[#allocation2 + $0x20b0] sm:$0xff] }
 0x308   : > { %4697 = vmatmul.msk.f32.vlgmr.msra.gmra.mxu1 %vm2231_vm9, %v5171_v19  ;;  %3695 = vmatpush.msra.mxu3 %v1324_v11  ;;  %v3267_v58 = vpop.f32.mrf.mxu3  ;;  %v1101_v55 = vld [vmem:[#allocation2 + $0xb0] sm:$0xff]  ;;  %v2094_v11 = vld [vmem:[#allocation2 + $0x1fb8] sm:$0xff] }
 0x309   : > { %3760 = vmatpush.msrb.mxu0 %v1453_v40  ;;  %3795 = vmatmul.f32.vlgmr.msra.gmra.mxu2 %v5159_v10  ;;  %v3268_v27 = vadd.f32 %v3267_v58, %v3245_v49  ;;  %v1550_v40 = vld [vmem:[#allocation2 + $0xeb8] sm:$0xff]  ;;  %v1199_v49 = vld [vmem:[#allocation2 + $0x3c0] sm:$0xff] }
 0x30a   : > { %3894 = vmatpush.msrb.mxu2 %v1583_v21  ;;  %3715 = vmatpush.msrb.mxu1 %v1932_v30  ;;  %v2222_v21 = vld [vmem:[#allocation2 + $0x23b8] sm:$0xff] }
 0x30b   : > { %3696 = vmatpush.msra.mxu3 %v1292_v5  ;;  %3761 = vmatpush.msrb.mxu0 %v1421_v57  ;;  %4460 = vst [vmem:[%s5241_s19 + $0x70] sm:$0xff] %v3268_v27  ;;  %v2062_v30 = vld [vmem:[#allocation2 + $0x1eb8] sm:$0xff] }
 0x30c   : > { %3895 = vmatpush.msrb.mxu2 %v1551_v60  ;;  %3716 = vmatpush.msrb.mxu1 %v1900_v24  ;;  %v1518_v5 = vld [vmem:[#allocation2 + $0xdb8] sm:$0xff] }
 0x30d   : > { %3697 = vmatpush.msra.mxu3 %v1260_v33  ;;  %3762 = vmatpush.msrb.mxu0 %v1389_v61  ;;  %v3336_v45 = vpop.f32.mrf.mxu0  ;;  %v2190_v58 = vld [vmem:[#allocation2 + $0x22b8] sm:$0xff]  ;;  %v1167_v33 = vld [vmem:[#allocation2 + $0x2c0] sm:$0xff] }
 0x30e   : > { %3896 = vmatpush.msrb.mxu2 %v1519_v0  ;;  %3717 = vmatpush.msrb.mxu1 %v1868_v1  ;;  %v2030_v60 = vld [vmem:[#allocation2 + $0x1db8] sm:$0xff] }
 0x30f   : > { %3698 = vmatpush.msra.mxu3 %v1228_v14  ;;  %3763 = vmatpush.msrb.mxu0 %v1357_v2  ;;  %v1486_v61 = vld [vmem:[#allocation2 + $0xcb8] sm:$0xff]  ;;  %v1135_v2 = vld [vmem:[#allocation2 + $0x1c0] sm:$0xff] }
 0x310   : > { %3897 = vmatpush.msrb.mxu2 %v1487_v25  ;;  %3718 = vmatpush.msrb.mxu1 %v1836_v4  ;;  %v2158_v0 = vld [vmem:[#allocation2 + $0x21b8] sm:$0xff] }
 0x311   : > { %4698 = vmatmul.msk.f32.gmra.mxu1 %vm2231_vm9, %v5181_v54  ;;  %3699 = vmatpush.msra.mxu3 %v1196_v47  ;;  %v1998_v1 = vld [vmem:[#allocation2 + $0x1cb8] sm:$0xff] }
 0x312   : > { %3764 = vmatpush.msrb.mxu0 %v1325_v52  ;;  %3798 = vmatmul.f32.gmra.mxu2 %v5168_v38  ;;  %v3270_v26 = vpop.f32.mrf.mxu3  ;;  %v2126_v4 = vld [vmem:[#allocation2 + $0x20b8] sm:$0xff]  ;;  %v1103_v52 = vld [vmem:[#allocation2 + $0xc0] sm:$0xff] }
 0x313   : > { %3898 = vmatpush.msrb.mxu2 %v1455_v59  ;;  %3719 = vmatpush.msrb.mxu1 %v1804_v12  ;;  %v3271_v9 = vadd.f32 %v3270_v26, %v3248_v63  ;;  %v1454_v47 = vld [vmem:[#allocation2 + $0xbb8] sm:$0xff]  ;;  %v2224_v59 = vld [vmem:[#allocation2 + $0x23c8] sm:$0xff]  ;;  %v2063_v63 = vld [vmem:[#allocation2 + $0x1ec0] sm:$0xff] }
 0x314   : > { %3700 = vmatpush.msra.mxu3 %v1164_v7  ;;  %3765 = vmatpush.msrb.mxu0 %v1293_v53  ;;  %v1422_v12 = vld [vmem:[#allocation2 + $0xab8] sm:$0xff]  ;;  %v2192_v26 = vld [vmem:[#allocation2 + $0x22c8] sm:$0xff] }
 0x315   : > { %3899 = vmatpush.msrb.mxu2 %v1423_v15  ;;  %3720 = vmatpush.msrb.mxu1 %v1772_v22  ;;  %4492 = vst [vmem:[%s5241_s19 + $0x170] sm:$0xff] %v3271_v9  ;;  %v1934_v53 = vld [vmem:[#allocation2 + $0x1ab8] sm:$0xff]  ;;  %v3359_v22 = vpop.f32.mrf.mxu2 }
 0x316   : > { %3701 = vmatpush.msra.mxu3 %v1132_v32  ;;  %3766 = vmatpush.msrb.mxu0 %v1261_v46  ;;  %v3339_v24 = vpop.f32.mrf.mxu0  ;;  %v1390_v32 = vld [vmem:[#allocation2 + $0x9b8] sm:$0xff] }
 0x317   : > { %3900 = vmatpush.msrb.mxu2 %v1391_v28  ;;  %3721 = vmatpush.msrb.mxu1 %v1740_v29  ;;  %v1902_v9 = vld [vmem:[#allocation2 + $0x19b8] sm:$0xff]  ;;  %v2031_v28 = vld [vmem:[#allocation2 + $0x1dc0] sm:$0xff]  ;;  %v2160_v29 = vld [vmem:[#allocation2 + $0x21c8] sm:$0xff] }
 0x318   : > { %3702 = vmatpush.msra.mxu3 %v1100_v31  ;;  %3767 = vmatpush.msrb.mxu0 %v1229_v16  ;;  %v1358_v31 = vld [vmem:[#allocation2 + $0x8b8] sm:$0xff] }
 0x319   : > { %3901 = vmatpush.msrb.mxu2 %v1359_v23  ;;  %3703 = vmatmul.f32.vlgmr.msra.gmra.mxu3 %v5130_v48 }
 0x31a   : > { %3722 = vmatpush.msrb.mxu1 %v1708_v39  ;;  %3814 = vmatpush.msrb.mxu3 %v2221_v3  ;;  %v1870_v39 = vld [vmem:[#allocation2 + $0x18b8] sm:$0xff]  ;;  %v1999_v3 = vld [vmem:[#allocation2 + $0x1cc0] sm:$0xff] }
 0x31b   : > { %3768 = vmatpush.msrb.mxu0 %v1197_v51  ;;  %3902 = vmatpush.msrb.mxu2 %v1327_v18  ;;  %v2128_v18 = vld [vmem:[#allocation2 + $0x20c8] sm:$0xff] }
 0x31c   : > { %3723 = vmatpush.msrb.mxu1 %v1676_v34  ;;  %3815 = vmatpush.msrb.mxu3 %v2189_v36  ;;  %v1326_v34 = vld [vmem:[#allocation2 + $0x7b8] sm:$0xff] }
 0x31d   : > { %3769 = vmatpush.msrb.mxu0 %v1165_v62  ;;  %3903 = vmatpush.msrb.mxu2 %v1295_v13  ;;  %v3290_v50 = vpop.f32.mrf.mxu1  ;;  %v1838_v62 = vld [vmem:[#allocation2 + $0x17b8] sm:$0xff]  ;;  %v1967_v13 = vld [vmem:[#allocation2 + $0x1bc0] sm:$0xff] }
 0x31e   : > { %3724 = vmatpush.msrb.mxu1 %v1644_v43  ;;  %3816 = vmatpush.msrb.mxu3 %v2157_v41  ;;  %v1294_v43 = vld [vmem:[#allocation2 + $0x6b8] sm:$0xff] }
 0x31f   : > { %3770 = vmatpush.msrb.mxu0 %v1133_v42  ;;  %3904 = vmatpush.msrb.mxu2 %v1263_v44  ;;  %v1806_v41 = vld [vmem:[#allocation2 + $0x16b8] sm:$0xff]  ;;  %v1935_v44 = vld [vmem:[#allocation2 + $0x1ac0] sm:$0xff] }
 0x320   : > { %3725 = vmatpush.msrb.mxu1 %v1612_v17  ;;  %3817 = vmatpush.msrb.mxu3 %v2125_v20  ;;  %v2065_v17 = vld [vmem:[#allocation2 + $0x1ed0] sm:$0xff]  ;;  %v3362_v20 = vpop.f32.mrf.mxu2 }
 0x321   : > { %3726 = vmatmul.f32.vlgmr.msrb.gmra.mxu1 %v5159_v10  ;;  %3771 = vmatpush.msrb.mxu0 %v1101_v55  ;;  %v1774_v55 = vld [vmem:[#allocation2 + $0x15b8] sm:$0xff] }
 0x322   : > { %3825 = vmatpush.msra.mxu1 %v1582_v35  ;;  %3848 = vmatpush.msra.mxu3 %v2094_v11  ;;  %v1903_v35 = vld [vmem:[#allocation2 + $0x19c0] sm:$0xff]  ;;  %v2033_v11 = vld [vmem:[#allocation2 + $0x1dd0] sm:$0xff] }
 0x323   : > { %3905 = vmatpush.msrb.mxu2 %v1231_v56  ;;  %3706 = vmatmul.f32.gmra.mxu3 %v5147_v6  ;;  %v3313_v57 = vpop.f32.mrf.mxu3 }
 0x324   : > { %3772 = vmatmul.f32.vlgmr.msrb.gmra.mxu0 %v5130_v48  ;;  %3826 = vmatpush.msra.mxu1 %v1550_v40  ;;  %v3314_v27 = vadd.f32 %v3313_v57, %v3290_v50  ;;  %v1262_v50 = vld [vmem:[#allocation2 + $0x5b8] sm:$0xff] }
 0x325   : > { %3883 = vmatpush.msra.mxu0 %v2222_v21  ;;  %3849 = vmatpush.msra.mxu3 %v2062_v30  ;;  %v1230_v40 = vld [vmem:[#allocation2 + $0x4b8] sm:$0xff] }
 0x326   : > { %3906 = vmatpush.msrb.mxu2 %v1199_v49  ;;  %3827 = vmatpush.msra.mxu1 %v1518_v5  ;;  %v3337_v14 = vadd.f32 %v3336_v45, %v3314_v27  ;;  %v2097_v45 = vld [vmem:[#allocation2 + $0x1fd0] sm:$0xff]  ;;  %v1742_v21 = vld [vmem:[#allocation2 + $0x14b8] sm:$0xff]  ;;  %v1871_v49 = vld [vmem:[#allocation2 + $0x18c0] sm:$0xff] }
 0x327   : > { %3884 = vmatpush.msra.mxu0 %v2190_v58  ;;  %3850 = vmatpush.msra.mxu3 %v2030_v60  ;;  %v3293_v25 = vpop.f32.mrf.mxu1  ;;  %v2001_v5 = vld [vmem:[#allocation2 + $0x1cd0] sm:$0xff]  ;;  %v1198_v58 = vld [vmem:[#allocation2 + $0x3b8] sm:$0xff] }
 0x328   : > { %3907 = vmatpush.msrb.mxu2 %v1167_v33  ;;  %3828 = vmatpush.msra.mxu1 %v1486_v61  ;;  %4461 = vst [vmem:[%s5241_s19 + $0x78] sm:$0xff] %v3337_v14  ;;  %v3382_v7 = vpop.f32.mrf.mxu0  ;;  %v1710_v60 = vld [vmem:[#allocation2 + $0x13b8] sm:$0xff]  ;;  %v1969_v27 = vld [vmem:[#allocation2 + $0x1bd0] sm:$0xff] }
 0x329   : > { %3885 = vmatpush.msra.mxu0 %v2158_v0  ;;  %3851 = vmatpush.msra.mxu3 %v1998_v1  ;;  %v3383_v16 = vadd.f32 %v3382_v7, %v3359_v22  ;;  %v1166_v33 = vld [vmem:[#allocation2 + $0x2b8] sm:$0xff]  ;;  %v1807_v0 = vld [vmem:[#allocation2 + $0x16c0] sm:$0xff]  ;;  %v1937_v1 = vld [vmem:[#allocation2 + $0x1ad0] sm:$0xff] }
 0x32a   : > { %3908 = vmatpush.msrb.mxu2 %v1135_v2  ;;  %3729 = vmatmul.f32.gmra.mxu1 %v5168_v38  ;;  %v1678_v61 = vld [vmem:[#allocation2 + $0x12b8] sm:$0xff]  ;;  %v1711_v7 = vld [vmem:[#allocation2 + $0x13c0] sm:$0xff]  ;;  %v1552_v22 = vld [vmem:[#allocation2 + $0xec8] sm:$0xff] }
 0x32b   : > { %3886 = vmatpush.msra.mxu0 %v2126_v4  ;;  %3829 = vmatpush.msra.mxu1 %v1454_v47  ;;  %v1134_v14 = vld [vmem:[#allocation2 + $0x1b8] sm:$0xff]  ;;  %v1905_v4 = vld [vmem:[#allocation2 + $0x19d0] sm:$0xff] }
 0x32c   : > { %3852 = vmatpush.msra.mxu3 %v1966_v8  ;;  %3909 = vmatpush.msrb.mxu2 %v1103_v52  ;;  %v1646_v2 = vld [vmem:[#allocation2 + $0x11b8] sm:$0xff]  ;;  %v1743_v52 = vld [vmem:[#allocation2 + $0x14c0] sm:$0xff] }
 0x32d   : > { %3917 = vmatpush.msrb.mxu0 %v2095_v37  ;;  %4701 = vmatmul.msk.f32.vlgmr.msrb.gmra.mxu3 %vm2231_vm9, %v5171_v19  ;;  %v3316_v15 = vpop.f32.mrf.mxu3  ;;  %v1102_v47 = vld [vmem:[#allocation2 + $0xb8] sm:$0xff]  ;;  %v1873_v37 = vld [vmem:[#allocation2 + $0x18d0] sm:$0xff] }
 0x32e   : > { %3775 = vmatmul.f32.gmra.mxu0 %v5147_v6  ;;  %3910 = vmatmul.f32.vlgmr.msrb.gmra.mxu2 %v5130_v48  ;;  %v3317_v46 = vadd.f32 %v3316_v15, %v3293_v25  ;;  %v1775_v25 = vld [vmem:[#allocation2 + $0x15c0] sm:$0xff]  ;;  %v1614_v8 = vld [vmem:[#allocation2 + $0x10b8] sm:$0xff] }
 0x32f   : > { %4021 = vmatpush.msra.mxu2 %v2224_v59  ;;  %3830 = vmatpush.msra.mxu1 %v1422_v12  ;;  %v2223_v59 = vld [vmem:[#allocation2 + $0x23c0] sm:$0xff]  ;;  %v1584_v12 = vld [vmem:[#allocation2 + $0xfc8] sm:$0xff] }
 0x330   : > { %3853 = vmatpush.msra.mxu3 %v1934_v53  ;;  %3918 = vmatpush.msrb.mxu0 %v2063_v63  ;;  %v3340_v23 = vadd.f32 %v3339_v24, %v3317_v46  ;;  %v3385_v42 = vpop.f32.mrf.mxu0  ;;  %v1839_v24 = vld [vmem:[#allocation2 + $0x17c0] sm:$0xff]  ;;  %v1841_v53 = vld [vmem:[#allocation2 + $0x17d0] sm:$0xff]  ;;  %v3474_v63 = vpop.f32.mrf.mxu2 }
 0x331   : > { %4022 = vmatpush.msra.mxu2 %v2192_v26  ;;  %3831 = vmatpush.msra.mxu1 %v1390_v32  ;;  %v3405_v51 = vpop.f32.mrf.mxu1  ;;  %v3386_v56 = vadd.f32 %v3385_v42, %v3362_v20  ;;  %v2191_v15 = vld [vmem:[#allocation2 + $0x22c0] sm:$0xff]  ;;  %v1809_v46 = vld [vmem:[#allocation2 + $0x16d0] sm:$0xff]  ;;  %v1424_v42 = vld [vmem:[#allocation2 + $0xac8] sm:$0xff] }
 0x332   : > { %3854 = vmatpush.msra.mxu3 %v1902_v9  ;;  %3919 = vmatpush.msrb.mxu0 %v2031_v28  ;;  %4493 = vst [vmem:[%s5241_s19 + $0x178] sm:$0xff] %v3340_v23  ;;  %v3406_v36 = vadd.f32 %v3405_v51, %v3383_v16  ;;  %v1679_v32 = vld [vmem:[#allocation2 + $0x12c0] sm:$0xff]  ;;  %v1777_v23 = vld [vmem:[#allocation2 + $0x15d0] sm:$0xff]  ;;  %v2032_v20 = vld [vmem:[#allocation2 + $0x1dc8] sm:$0xff] }
 0x333   : > { %4023 = vmatpush.msra.mxu2 %v2160_v29  ;;  %3832 = vmatpush.msra.mxu1 %v1358_v31  ;;  %v2159_v9 = vld [vmem:[#allocation2 + $0x21c0] sm:$0xff]  ;;  %v1520_v29 = vld [vmem:[#allocation2 + $0xdc8] sm:$0xff] }
 0x334   : > { %3855 = vmatpush.msra.mxu3 %v1870_v39  ;;  %3920 = vmatpush.msrb.mxu0 %v1999_v3  ;;  %4462 = vst [vmem:[%s5241_s19 + $0x80] sm:$0xff] %v3406_v36  ;;  %v1647_v31 = vld [vmem:[#allocation2 + $0x11c0] sm:$0xff]  ;;  %v1488_v3 = vld [vmem:[#allocation2 + $0xcc8] sm:$0xff]  ;;  %v1745_v36 = vld [vmem:[#allocation2 + $0x14d0] sm:$0xff] }
 0x335   : > { %4024 = vmatpush.msra.mxu2 %v2128_v18  ;;  %3833 = vmatpush.msra.mxu1 %v1326_v34  ;;  %v2127_v39 = vld [vmem:[#allocation2 + $0x20c0] sm:$0xff]  ;;  %v2096_v34 = vld [vmem:[#allocation2 + $0x1fc8] sm:$0xff] }
 0x336   : > { %3856 = vmatpush.msra.mxu3 %v1838_v62  ;;  %3921 = vmatpush.msrb.mxu0 %v1967_v13  ;;  %v1615_v51 = vld [vmem:[#allocation2 + $0x10c0] sm:$0xff]  ;;  %v1456_v62 = vld [vmem:[#allocation2 + $0xbc8] sm:$0xff]  ;;  %v1585_v13 = vld [vmem:[#allocation2 + $0xfd0] sm:$0xff] }
 0x337   : > { %4055 = vmatpush.msrb.mxu2 %v2097_v45  ;;  %4702 = vmatmul.msk.f32.gmra.mxu3 %vm2231_vm9, %v5181_v54  ;;  %v2064_v45 = vld [vmem:[#allocation2 + $0x1ec8] sm:$0xff] }
 0x338   : > { %4703 = vmatmul.msk.f32.vlgmr.msra.gmra.mxu0 %vm2231_vm9, %v5171_v19  ;;  %3913 = vmatmul.f32.gmra.mxu2 %v5147_v6 }
 0x339   : > { %3834 = vmatpush.msra.mxu1 %v1294_v43  ;;  %3857 = vmatpush.msra.mxu3 %v1806_v41  ;;  %v3477_v43 = vpop.f32.mrf.mxu2  ;;  %v1713_v41 = vld [vmem:[#allocation2 + $0x13d0] sm:$0xff] }
 0x33a   : > { %3922 = vmatpush.msrb.mxu0 %v1935_v44  ;;  %4056 = vmatpush.msrb.mxu2 %v2065_v17  ;;  %v3408_v30 = vpop.f32.mrf.mxu1  ;;  %v1553_v17 = vld [vmem:[#allocation2 + $0xed0] sm:$0xff] }
 0x33b   : > { %3835 = vmatpush.msra.mxu1 %v1262_v50  ;;  %3858 = vmatpush.msra.mxu3 %v1774_v55  ;;  %v3409_v57 = vadd.f32 %v3408_v30, %v3386_v56  ;;  %v1681_v55 = vld [vmem:[#allocation2 + $0x12d0] sm:$0xff]  ;;  %v1360_v30 = vld [vmem:[#allocation2 + $0x8c8] sm:$0xff] }
 0x33c   : > { %3923 = vmatpush.msrb.mxu0 %v1903_v35  ;;  %4057 = vmatpush.msrb.mxu2 %v2033_v11  ;;  %v1392_v35 = vld [vmem:[#allocation2 + $0x9c8] sm:$0xff]  ;;  %v1521_v56 = vld [vmem:[#allocation2 + $0xdd0] sm:$0xff] }
 0x33d   : > { %3836 = vmatpush.msra.mxu1 %v1230_v40  ;;  %3859 = vmatpush.msra.mxu3 %v1742_v21  ;;  %4494 = vst [vmem:[%s5241_s19 + $0x180] sm:$0xff] %v3409_v57  ;;  %v2000_v40 = vld [vmem:[#allocation2 + $0x1cc8] sm:$0xff]  ;;  %v1649_v21 = vld [vmem:[#allocation2 + $0x11d0] sm:$0xff] }
 0x33e   : > { %3924 = vmatpush.msrb.mxu0 %v1871_v49  ;;  %4058 = vmatpush.msrb.mxu2 %v2001_v5  ;;  %v1489_v5 = vld [vmem:[#allocation2 + $0xcd0] sm:$0xff]  ;;  %v1968_v57 = vld [vmem:[#allocation2 + $0x1bc8] sm:$0xff] }
 0x33f   : > { %3837 = vmatpush.msra.mxu1 %v1198_v58  ;;  %3860 = vmatpush.msra.mxu3 %v1710_v60  ;;  %v1617_v58 = vld [vmem:[#allocation2 + $0x10d0] sm:$0xff] }
 0x340   : > { %3925 = vmatpush.msrb.mxu0 %v1839_v24  ;;  %4059 = vmatpush.msrb.mxu2 %v1969_v27  ;;  %v1328_v24 = vld [vmem:[#allocation2 + $0x7c8] sm:$0xff] }
 0x341   : > { %4704 = vmatmul.msk.f32.gmra.mxu0 %vm2231_vm9, %v5181_v54  ;;  %4707 = vmatmul.msk.f32.vlgmr.msra.gmra.mxu2 %vm2231_vm9, %v5171_v19  ;;  %v3520_v27 = vpop.f32.mrf.mxu2 }
 0x342   : > { %3838 = vmatpush.msra.mxu1 %v1166_v33  ;;  %3861 = vmatpush.msra.mxu3 %v1678_v61  ;;  %v1457_v33 = vld [vmem:[#allocation2 + $0xbd0] sm:$0xff]  ;;  %v1587_v61 = vld [vmem:[#allocation2 + $0xfe0] sm:$0xff] }
 0x343   : > { %3926 = vmatpush.msrb.mxu0 %v1807_v0  ;;  %4060 = vmatpush.msrb.mxu2 %v1937_v1  ;;  %v1936_v0 = vld [vmem:[#allocation2 + $0x1ac8] sm:$0xff] }
 0x344   : > { %3839 = vmatpush.msra.mxu1 %v1134_v14  ;;  %3862 = vmatpush.msra.mxu3 %v1646_v2  ;;  %v1296_v14 = vld [vmem:[#allocation2 + $0x6c8] sm:$0xff]  ;;  %v1425_v2 = vld [vmem:[#allocation2 + $0xad0] sm:$0xff] }
 0x345   : > { %3927 = vmatpush.msrb.mxu0 %v1775_v25  ;;  %4061 = vmatpush.msrb.mxu2 %v1905_v4  ;;  %v1555_v4 = vld [vmem:[#allocation2 + $0xee0] sm:$0xff] }
 0x346   : > { %3840 = vmatpush.msra.mxu1 %v1102_v47  ;;  %3863 = vmatpush.msra.mxu3 %v1614_v8  ;;  %v1904_v47 = vld [vmem:[#allocation2 + $0x19c8] sm:$0xff] }
 0x347   : > { %3928 = vmatpush.msrb.mxu0 %v1743_v52  ;;  %4062 = vmatpush.msrb.mxu2 %v1873_v37  ;;  %v1264_v52 = vld [vmem:[#allocation2 + $0x5c8] sm:$0xff]  ;;  %v1393_v37 = vld [vmem:[#allocation2 + $0x9d0] sm:$0xff] }
 0x348   : > { %3841 = vmatmul.f32.vlgmr.msra.gmra.mxu1 %v5130_v48  ;;  %3864 = vmatmul.f32.vlgmr.msra.gmra.mxu3 %v5159_v10  ;;  %v3428_v26 = vpop.f32.mrf.mxu3 }
 0x349   : > { %3952 = vmatpush.msrb.mxu1 %v2223_v59  ;;  %3963 = vmatpush.msrb.mxu3 %v1584_v12  ;;  %v1523_v59 = vld [vmem:[#allocation2 + $0xde0] sm:$0xff]  ;;  %v1872_v12 = vld [vmem:[#allocation2 + $0x18c8] sm:$0xff] }
 0x34a   : > { %3929 = vmatpush.msrb.mxu0 %v1711_v7  ;;  %4063 = vmatpush.msrb.mxu2 %v1841_v53  ;;  %v3451_v28 = vpop.f32.mrf.mxu1  ;;  %v1232_v7 = vld [vmem:[#allocation2 + $0x4c8] sm:$0xff]  ;;  %v1361_v53 = vld [vmem:[#allocation2 + $0x8d0] sm:$0xff] }
 0x34b   : > { %3953 = vmatpush.msrb.mxu1 %v2191_v15  ;;  %3964 = vmatpush.msrb.mxu3 %v1552_v22  ;;  %v3452_v16 = vadd.f32 %v3451_v28, %v3428_v26  ;;  %v1840_v15 = vld [vmem:[#allocation2 + $0x17c8] sm:$0xff] }
 0x34c   : > { %4708 = vmatmul.msk.f32.gmra.mxu2 %vm2231_vm9, %v5181_v54  ;;  %3930 = vmatpush.msrb.mxu0 %v1679_v32  ;;  %v1200_v22 = vld [vmem:[#allocation2 + $0x3c8] sm:$0xff]  ;;  %v1329_v32 = vld [vmem:[#allocation2 + $0x7d0] sm:$0xff] }
 0x34d   : > { %4064 = vmatpush.msrb.mxu2 %v1809_v46  ;;  %3954 = vmatpush.msrb.mxu1 %v2159_v9  ;;  %v3475_v18 = vadd.f32 %v3474_v63, %v3452_v16  ;;  %v3497_v60 = vpop.f32.mrf.mxu0  ;;  %v1491_v63 = vld [vmem:[#allocation2 + $0xce0] sm:$0xff]  ;;  %v3523_v46 = vpop.f32.mrf.mxu2  ;;  %v1808_v28 = vld [vmem:[#allocation2 + $0x16c8] sm:$0xff] }
 0x34e   : > { %3965 = vmatpush.msrb.mxu3 %v1520_v29  ;;  %3931 = vmatpush.msrb.mxu0 %v1647_v31  ;;  %v3521_v1 = vadd.f32 %v3520_v27, %v3497_v60  ;;  %v1459_v9 = vld [vmem:[#allocation2 + $0xbe0] sm:$0xff]  ;;  %v1168_v29 = vld [vmem:[#allocation2 + $0x2c8] sm:$0xff]  ;;  %v1297_v31 = vld [vmem:[#allocation2 + $0x6d0] sm:$0xff] }
 0x34f   : > { %4065 = vmatpush.msrb.mxu2 %v1777_v23  ;;  %3955 = vmatpush.msrb.mxu1 %v2127_v39  ;;  %4463 = vst [vmem:[%s5241_s19 + $0x88] sm:$0xff] %v3475_v18  ;;  %v1427_v23 = vld [vmem:[#allocation2 + $0xae0] sm:$0xff]  ;;  %v1776_v39 = vld [vmem:[#allocation2 + $0x15c8] sm:$0xff]  ;;  %v1265_v18 = vld [vmem:[#allocation2 + $0x5d0] sm:$0xff] }
 0x350   : > { %3966 = vmatpush.msrb.mxu3 %v1488_v3  ;;  %3932 = vmatpush.msrb.mxu0 %v1615_v51  ;;  %v1136_v51 = vld [vmem:[#allocation2 + $0x1c8] sm:$0xff]  ;;  %v1586_v60 = vld [vmem:[#allocation2 + $0xfd8] sm:$0xff]  ;;  %v1235_v27 = vld [vmem:[#allocation2 + $0x4e0] sm:$0xff] }
 0x351   : > { %3986 = vmatpush.msra.mxu1 %v2096_v34  ;;  %4066 = vmatpush.msrb.mxu2 %v1745_v36  ;;  %v1395_v36 = vld [vmem:[#allocation2 + $0x9e0] sm:$0xff] }
 0x352   : > { %3844 = vmatmul.f32.gmra.mxu1 %v5147_v6  ;;  %3867 = vmatmul.f32.gmra.mxu3 %v5168_v38  ;;  %v3431_v44 = vpop.f32.mrf.mxu3 }
 0x353   : > { %3933 = vmatmul.f32.vlgmr.msrb.gmra.mxu0 %v5159_v10  ;;  %3967 = vmatpush.msrb.mxu3 %v1456_v62  ;;  %v3454_v50 = vpop.f32.mrf.mxu1  ;;  %v1744_v62 = vld [vmem:[#allocation2 + $0x14c8] sm:$0xff] }
 0x354   : > { %4032 = vmatpush.msra.mxu0 %v1585_v13  ;;  %3987 = vmatpush.msra.mxu1 %v2064_v45  ;;  %v3455_v11 = vadd.f32 %v3454_v50, %v3431_v44  ;;  %v1104_v13 = vld [vmem:[#allocation2 + $0xc8] sm:$0xff]  ;;  %v1233_v45 = vld [vmem:[#allocation2 + $0x4d0] sm:$0xff] }
 0x355   : > { %4067 = vmatpush.msrb.mxu2 %v1713_v41  ;;  %3968 = vmatpush.msrb.mxu3 %v1424_v42  ;;  %v1712_v41 = vld [vmem:[#allocation2 + $0x13c8] sm:$0xff]  ;;  %v2225_v42 = vld [vmem:[#allocation2 + $0x23d0] sm:$0xff] }
 0x356   : > { %4033 = vmatpush.msra.mxu0 %v1553_v17  ;;  %3988 = vmatpush.msra.mxu1 %v2032_v20  ;;  %v3478_v49 = vadd.f32 %v3477_v43, %v3455_v11  ;;  %v1363_v43 = vld [vmem:[#allocation2 + $0x8e0] sm:$0xff]  ;;  %v1201_v44 = vld [vmem:[#allocation2 + $0x3d0] sm:$0xff]  ;;  %v1680_v20 = vld [vmem:[#allocation2 + $0x12c8] sm:$0xff] }
 0x357   : > { %4068 = vmatpush.msrb.mxu2 %v1681_v55  ;;  %3969 = vmatpush.msrb.mxu3 %v1392_v35  ;;  %v3500_v26 = vpop.f32.mrf.mxu0  ;;  %v1331_v17 = vld [vmem:[#allocation2 + $0x7e0] sm:$0xff]  ;;  %v2193_v50 = vld [vmem:[#allocation2 + $0x22d0] sm:$0xff] }
 0x358   : > { %4034 = vmatpush.msra.mxu0 %v1521_v56  ;;  %3989 = vmatpush.msra.mxu1 %v2000_v40  ;;  %4495 = vst [vmem:[%s5241_s19 + $0x188] sm:$0xff] %v3478_v49  ;;  %v3524_v16 = vadd.f32 %v3523_v46, %v3500_v26  ;;  %v1169_v55 = vld [vmem:[#allocation2 + $0x2d0] sm:$0xff]  ;;  %v1299_v35 = vld [vmem:[#allocation2 + $0x6e0] sm:$0xff]  ;;  %v1648_v56 = vld [vmem:[#allocation2 + $0x11c8] sm:$0xff] }
 0x359   : > { %4069 = vmatpush.msrb.mxu2 %v1649_v21  ;;  %3970 = vmatpush.msrb.mxu3 %v1360_v30  ;;  %v2161_v40 = vld [vmem:[#allocation2 + $0x21d0] sm:$0xff]  ;;  %v1267_v30 = vld [vmem:[#allocation2 + $0x5e0] sm:$0xff]  ;;  %v1616_v49 = vld [vmem:[#allocation2 + $0x10c8] sm:$0xff] }
 0x35a   : > { %4035 = vmatpush.msra.mxu0 %v1489_v5  ;;  %3990 = vmatpush.msra.mxu1 %v1968_v57  ;;  %v1137_v21 = vld [vmem:[#allocation2 + $0x1d0] sm:$0xff]  ;;  %v1970_v26 = vld [vmem:[#allocation2 + $0x1bd8] sm:$0xff]  ;;  %v2099_v46 = vld [vmem:[#allocation2 + $0x1fe0] sm:$0xff] }
 0x35b   : > { %4070 = vmatpush.msrb.mxu2 %v1617_v58  ;;  %3936 = vmatmul.f32.gmra.mxu0 %v5168_v38  ;;  %v2129_v5 = vld [vmem:[#allocation2 + $0x20d0] sm:$0xff] }
 0x35c   : > { %4705 = vmatmul.msk.f32.vlgmr.msrb.gmra.mxu1 %vm2231_vm9, %v5171_v19  ;;  %3971 = vmatpush.msrb.mxu3 %v1328_v24  ;;  %v3543_v25 = vpop.f32.mrf.mxu3  ;;  %v1105_v58 = vld [vmem:[#allocation2 + $0xd0] sm:$0xff]  ;;  %v2098_v24 = vld [vmem:[#allocation2 + $0x1fd8] sm:$0xff] }
 0x35d   : > { %4036 = vmatpush.msra.mxu0 %v1457_v33  ;;  %4071 = vmatmul.f32.vlgmr.msrb.gmra.mxu2 %v5159_v10  ;;  %v3544_v8 = vadd.f32 %v3543_v25, %v3521_v1  ;;  %v1554_v33 = vld [vmem:[#allocation2 + $0xed8] sm:$0xff]  ;;  %v1203_v1 = vld [vmem:[#allocation2 + $0x3e0] sm:$0xff] }
 0x35e   : > { %4170 = vmatpush.msra.mxu2 %v1587_v61  ;;  %3991 = vmatpush.msra.mxu1 %v1936_v0  ;;  %v2226_v61 = vld [vmem:[#allocation2 + $0x23d8] sm:$0xff] }
 0x35f   : > { %3972 = vmatpush.msrb.mxu3 %v1296_v14  ;;  %4037 = vmatpush.msra.mxu0 %v1425_v2  ;;  %4464 = vst [vmem:[%s5241_s19 + $0x90] sm:$0xff] %v3544_v8  ;;  %v2066_v0 = vld [vmem:[#allocation2 + $0x1ed8] sm:$0xff] }
 0x360   : > { %4171 = vmatpush.msra.mxu2 %v1555_v4  ;;  %3992 = vmatpush.msra.mxu1 %v1904_v47  ;;  %v1522_v14 = vld [vmem:[#allocation2 + $0xdd8] sm:$0xff] }
 0x361   : > { %3973 = vmatpush.msrb.mxu3 %v1264_v52  ;;  %4038 = vmatpush.msra.mxu0 %v1393_v37  ;;  %v3612_v11 = vpop.f32.mrf.mxu0  ;;  %v2194_v25 = vld [vmem:[#allocation2 + $0x22d8] sm:$0xff]  ;;  %v1171_v52 = vld [vmem:[#allocation2 + $0x2e0] sm:$0xff] }
 0x362   : > { %4172 = vmatpush.msra.mxu2 %v1523_v59  ;;  %3993 = vmatpush.msra.mxu1 %v1872_v12  ;;  %v2034_v4 = vld [vmem:[#allocation2 + $0x1dd8] sm:$0xff] }
 0x363   : > { %3974 = vmatpush.msrb.mxu3 %v1232_v7  ;;  %4039 = vmatpush.msra.mxu0 %v1361_v53  ;;  %v1490_v37 = vld [vmem:[#allocation2 + $0xcd8] sm:$0xff]  ;;  %v1139_v53 = vld [vmem:[#allocation2 + $0x1e0] sm:$0xff] }
 0x364   : > { %4173 = vmatpush.msra.mxu2 %v1491_v63  ;;  %3994 = vmatpush.msra.mxu1 %v1840_v15  ;;  %v2162_v59 = vld [vmem:[#allocation2 + $0x21d8] sm:$0xff] }
 0x365   : > { %4706 = vmatmul.msk.f32.gmra.mxu1 %vm2231_vm9, %v5181_v54  ;;  %3975 = vmatpush.msrb.mxu3 %v1200_v22  ;;  %v2002_v12 = vld [vmem:[#allocation2 + $0x1cd8] sm:$0xff] }
 0x366   : > { %4040 = vmatpush.msra.mxu0 %v1329_v32  ;;  %4074 = vmatmul.f32.gmra.mxu2 %v5168_v38  ;;  %v3546_v3 = vpop.f32.mrf.mxu3  ;;  %v2130_v15 = vld [vmem:[#allocation2 + $0x20d8] sm:$0xff]  ;;  %v1107_v32 = vld [vmem:[#allocation2 + $0xe0] sm:$0xff] }
 0x367   : > { %4174 = vmatpush.msra.mxu2 %v1459_v9  ;;  %3995 = vmatpush.msra.mxu1 %v1808_v28  ;;  %v3547_v34 = vadd.f32 %v3546_v3, %v3524_v16  ;;  %v1458_v22 = vld [vmem:[#allocation2 + $0xbd8] sm:$0xff]  ;;  %v2228_v9 = vld [vmem:[#allocation2 + $0x23e8] sm:$0xff]  ;;  %v2067_v16 = vld [vmem:[#allocation2 + $0x1ee0] sm:$0xff] }
 0x368   : > { %3976 = vmatpush.msrb.mxu3 %v1168_v29  ;;  %4041 = vmatpush.msra.mxu0 %v1297_v31  ;;  %v1426_v28 = vld [vmem:[#allocation2 + $0xad8] sm:$0xff]  ;;  %v2196_v3 = vld [vmem:[#allocation2 + $0x22e8] sm:$0xff] }
 0x369   : > { %4175 = vmatpush.msra.mxu2 %v1427_v23  ;;  %3996 = vmatpush.msra.mxu1 %v1776_v39  ;;  %4496 = vst [vmem:[%s5241_s19 + $0x190] sm:$0xff] %v3547_v34  ;;  %v1938_v31 = vld [vmem:[#allocation2 + $0x1ad8] sm:$0xff]  ;;  %v3635_v39 = vpop.f32.mrf.mxu2 }
 0x36a   : > { %3977 = vmatpush.msrb.mxu3 %v1136_v51  ;;  %4042 = vmatpush.msra.mxu0 %v1265_v18  ;;  %v3615_v47 = vpop.f32.mrf.mxu0  ;;  %v1394_v51 = vld [vmem:[#allocation2 + $0x9d8] sm:$0xff] }
 0x36b   : > { %4176 = vmatpush.msra.mxu2 %v1395_v36  ;;  %3997 = vmatpush.msra.mxu1 %v1744_v62  ;;  %v1906_v34 = vld [vmem:[#allocation2 + $0x19d8] sm:$0xff]  ;;  %v2035_v36 = vld [vmem:[#allocation2 + $0x1de0] sm:$0xff]  ;;  %v2164_v62 = vld [vmem:[#allocation2 + $0x21e8] sm:$0xff] }
 0x36c   : > { %3978 = vmatpush.msrb.mxu3 %v1104_v13  ;;  %4043 = vmatpush.msra.mxu0 %v1233_v45  ;;  %v1362_v13 = vld [vmem:[#allocation2 + $0x8d8] sm:$0xff] }
 0x36d   : > { %4177 = vmatpush.msra.mxu2 %v1363_v43  ;;  %3979 = vmatmul.f32.vlgmr.msrb.gmra.mxu3 %v5130_v48 }
 0x36e   : > { %3998 = vmatpush.msra.mxu1 %v1712_v41  ;;  %4090 = vmatpush.msra.mxu3 %v2225_v42  ;;  %v1874_v41 = vld [vmem:[#allocation2 + $0x18d8] sm:$0xff]  ;;  %v2003_v42 = vld [vmem:[#allocation2 + $0x1ce0] sm:$0xff] }
 0x36f   : > { %4044 = vmatpush.msra.mxu0 %v1201_v44  ;;  %4178 = vmatpush.msra.mxu2 %v1331_v17  ;;  %v2132_v17 = vld [vmem:[#allocation2 + $0x20e8] sm:$0xff] }
 0x370   : > { %3999 = vmatpush.msra.mxu1 %v1680_v20  ;;  %4091 = vmatpush.msra.mxu3 %v2193_v50  ;;  %v1330_v20 = vld [vmem:[#allocation2 + $0x7d8] sm:$0xff] }
 0x371   : > { %4045 = vmatpush.msra.mxu0 %v1169_v55  ;;  %4179 = vmatpush.msra.mxu2 %v1299_v35  ;;  %v3566_v57 = vpop.f32.mrf.mxu1  ;;  %v1842_v55 = vld [vmem:[#allocation2 + $0x17d8] sm:$0xff]  ;;  %v1971_v35 = vld [vmem:[#allocation2 + $0x1be0] sm:$0xff] }
 0x372   : > { %4000 = vmatpush.msra.mxu1 %v1648_v56  ;;  %4092 = vmatpush.msra.mxu3 %v2161_v40  ;;  %v1298_v56 = vld [vmem:[#allocation2 + $0x6d8] sm:$0xff] }
 0x373   : > { %4046 = vmatpush.msra.mxu0 %v1137_v21  ;;  %4180 = vmatpush.msra.mxu2 %v1267_v30  ;;  %v1810_v40 = vld [vmem:[#allocation2 + $0x16d8] sm:$0xff]  ;;  %v1939_v30 = vld [vmem:[#allocation2 + $0x1ae0] sm:$0xff] }
 0x374   : > { %4001 = vmatpush.msra.mxu1 %v1616_v49  ;;  %4093 = vmatpush.msra.mxu3 %v2129_v5  ;;  %v2069_v49 = vld [vmem:[#allocation2 + $0x1ef0] sm:$0xff]  ;;  %v3638_v5 = vpop.f32.mrf.mxu2 }
 0x375   : > { %4002 = vmatmul.f32.vlgmr.msra.gmra.mxu1 %v5159_v10  ;;  %4047 = vmatpush.msra.mxu0 %v1105_v58  ;;  %v1778_v58 = vld [vmem:[#allocation2 + $0x15d8] sm:$0xff] }
 0x376   : > { %4101 = vmatpush.msrb.mxu1 %v1586_v60  ;;  %4124 = vmatpush.msrb.mxu3 %v2098_v24  ;;  %v1907_v60 = vld [vmem:[#allocation2 + $0x19e0] sm:$0xff]  ;;  %v2037_v24 = vld [vmem:[#allocation2 + $0x1df0] sm:$0xff] }
 0x377   : > { %4181 = vmatpush.msra.mxu2 %v1235_v27  ;;  %3982 = vmatmul.f32.gmra.mxu3 %v5147_v6  ;;  %v3589_v2 = vpop.f32.mrf.mxu3 }
 0x378   : > { %4048 = vmatmul.f32.vlgmr.msra.gmra.mxu0 %v5130_v48  ;;  %4102 = vmatpush.msrb.mxu1 %v1554_v33  ;;  %v3590_v8 = vadd.f32 %v3589_v2, %v3566_v57  ;;  %v1266_v57 = vld [vmem:[#allocation2 + $0x5d8] sm:$0xff] }
 0x379   : > { %4159 = vmatpush.msrb.mxu0 %v2226_v61  ;;  %4125 = vmatpush.msrb.mxu3 %v2066_v0  ;;  %v1234_v33 = vld [vmem:[#allocation2 + $0x4d8] sm:$0xff] }
 0x37a   : > { %4182 = vmatpush.msra.mxu2 %v1203_v1  ;;  %4103 = vmatpush.msrb.mxu1 %v1522_v14  ;;  %v3613_v7 = vadd.f32 %v3612_v11, %v3590_v8  ;;  %v2101_v11 = vld [vmem:[#allocation2 + $0x1ff0] sm:$0xff]  ;;  %v1746_v61 = vld [vmem:[#allocation2 + $0x14d8] sm:$0xff]  ;;  %v1875_v1 = vld [vmem:[#allocation2 + $0x18e0] sm:$0xff] }
 0x37b   : > { %4160 = vmatpush.msrb.mxu0 %v2194_v25  ;;  %4126 = vmatpush.msrb.mxu3 %v2034_v4  ;;  %v3569_v63 = vpop.f32.mrf.mxu1  ;;  %v2005_v14 = vld [vmem:[#allocation2 + $0x1cf0] sm:$0xff]  ;;  %v1202_v25 = vld [vmem:[#allocation2 + $0x3d8] sm:$0xff] }
 0x37c   : > { %4183 = vmatpush.msra.mxu2 %v1171_v52  ;;  %4104 = vmatpush.msrb.mxu1 %v1490_v37  ;;  %4465 = vst [vmem:[%s5241_s19 + $0x98] sm:$0xff] %v3613_v7  ;;  %v3658_v29 = vpop.f32.mrf.mxu0  ;;  %v1714_v4 = vld [vmem:[#allocation2 + $0x13d8] sm:$0xff]  ;;  %v1973_v8 = vld [vmem:[#allocation2 + $0x1bf0] sm:$0xff] }
 0x37d   : > { %4161 = vmatpush.msrb.mxu0 %v2162_v59  ;;  %4127 = vmatpush.msrb.mxu3 %v2002_v12  ;;  %v3659_v45 = vadd.f32 %v3658_v29, %v3635_v39  ;;  %v1170_v52 = vld [vmem:[#allocation2 + $0x2d8] sm:$0xff]  ;;  %v1811_v59 = vld [vmem:[#allocation2 + $0x16e0] sm:$0xff]  ;;  %v1941_v12 = vld [vmem:[#allocation2 + $0x1af0] sm:$0xff] }
 0x37e   : > { %4184 = vmatpush.msra.mxu2 %v1139_v53  ;;  %4005 = vmatmul.f32.gmra.mxu1 %v5168_v38  ;;  %v1682_v37 = vld [vmem:[#allocation2 + $0x12d8] sm:$0xff]  ;;  %v1715_v29 = vld [vmem:[#allocation2 + $0x13e0] sm:$0xff]  ;;  %v1556_v39 = vld [vmem:[#allocation2 + $0xee8] sm:$0xff] }
 0x37f   : > { %4162 = vmatpush.msrb.mxu0 %v2130_v15  ;;  %4105 = vmatpush.msrb.mxu1 %v1458_v22  ;;  %v1138_v7 = vld [vmem:[#allocation2 + $0x1d8] sm:$0xff]  ;;  %v1909_v15 = vld [vmem:[#allocation2 + $0x19f0] sm:$0xff] }
 0x380   : > { %4128 = vmatpush.msrb.mxu3 %v1970_v26  ;;  %4185 = vmatpush.msra.mxu2 %v1107_v32  ;;  %v1650_v53 = vld [vmem:[#allocation2 + $0x11d8] sm:$0xff]  ;;  %v1747_v32 = vld [vmem:[#allocation2 + $0x14e0] sm:$0xff] }
 0x381   : > { %4193 = vmatpush.msra.mxu0 %v2099_v46  ;;  %4709 = vmatmul.msk.f32.vlgmr.msra.gmra.mxu3 %vm2231_vm9, %v5171_v19  ;;  %v3592_v23 = vpop.f32.mrf.mxu3  ;;  %v1106_v22 = vld [vmem:[#allocation2 + $0xd8] sm:$0xff]  ;;  %v1877_v46 = vld [vmem:[#allocation2 + $0x18f0] sm:$0xff] }
 0x382   : > { %4051 = vmatmul.f32.gmra.mxu0 %v5147_v6  ;;  %4186 = vmatmul.f32.vlgmr.msra.gmra.mxu2 %v5130_v48  ;;  %v3593_v18 = vadd.f32 %v3592_v23, %v3569_v63  ;;  %v1779_v63 = vld [vmem:[#allocation2 + $0x15e0] sm:$0xff]  ;;  %v1618_v26 = vld [vmem:[#allocation2 + $0x10d8] sm:$0xff] }
 0x383   : > { %4297 = vmatpush.msrb.mxu2 %v2228_v9  ;;  %4106 = vmatpush.msrb.mxu1 %v1426_v28  ;;  %v2227_v9 = vld [vmem:[#allocation2 + $0x23e0] sm:$0xff]  ;;  %v1588_v28 = vld [vmem:[#allocation2 + $0xfe8] sm:$0xff] }
 0x384   : > { %4129 = vmatpush.msrb.mxu3 %v1938_v31  ;;  %4194 = vmatpush.msra.mxu0 %v2067_v16  ;;  %v3616_v43 = vadd.f32 %v3615_v47, %v3593_v18  ;;  %v3661_v21 = vpop.f32.mrf.mxu0  ;;  %v1843_v47 = vld [vmem:[#allocation2 + $0x17e0] sm:$0xff]  ;;  %v1845_v31 = vld [vmem:[#allocation2 + $0x17f0] sm:$0xff]  ;;  %v3750_v16 = vpop.f32.mrf.mxu2 }
 0x385   : > { %4298 = vmatpush.msrb.mxu2 %v2196_v3  ;;  %4107 = vmatpush.msrb.mxu1 %v1394_v51  ;;  %v3681_v44 = vpop.f32.mrf.mxu1  ;;  %v3662_v27 = vadd.f32 %v3661_v21, %v3638_v5  ;;  %v2195_v23 = vld [vmem:[#allocation2 + $0x22e0] sm:$0xff]  ;;  %v1813_v18 = vld [vmem:[#allocation2 + $0x16f0] sm:$0xff]  ;;  %v1428_v21 = vld [vmem:[#allocation2 + $0xae8] sm:$0xff] }
 0x386   : > { %4130 = vmatpush.msrb.mxu3 %v1906_v34  ;;  %4195 = vmatpush.msra.mxu0 %v2035_v36  ;;  %4497 = vst [vmem:[%s5241_s19 + $0x198] sm:$0xff] %v3616_v43  ;;  %v3682_v50 = vadd.f32 %v3681_v44, %v3659_v45  ;;  %v1683_v51 = vld [vmem:[#allocation2 + $0x12e0] sm:$0xff]  ;;  %v1781_v43 = vld [vmem:[#allocation2 + $0x15f0] sm:$0xff]  ;;  %v2036_v5 = vld [vmem:[#allocation2 + $0x1de8] sm:$0xff] }
 0x387   : > { %4299 = vmatpush.msrb.mxu2 %v2164_v62  ;;  %4108 = vmatpush.msrb.mxu1 %v1362_v13  ;;  %v2163_v34 = vld [vmem:[#allocation2 + $0x21e0] sm:$0xff]  ;;  %v1524_v62 = vld [vmem:[#allocation2 + $0xde8] sm:$0xff] }
 0x388   : > { %4131 = vmatpush.msrb.mxu3 %v1874_v41  ;;  %4196 = vmatpush.msra.mxu0 %v2003_v42  ;;  %4466 = vst [vmem:[%s5241_s19 + $0xa0] sm:$0xff] %v3682_v50  ;;  %v1651_v13 = vld [vmem:[#allocation2 + $0x11e0] sm:$0xff]  ;;  %v1492_v42 = vld [vmem:[#allocation2 + $0xce8] sm:$0xff]  ;;  %v1749_v50 = vld [vmem:[#allocation2 + $0x14f0] sm:$0xff] }
 0x389   : > { %4300 = vmatpush.msrb.mxu2 %v2132_v17  ;;  %4109 = vmatpush.msrb.mxu1 %v1330_v20  ;;  %v2131_v41 = vld [vmem:[#allocation2 + $0x20e0] sm:$0xff]  ;;  %v2100_v20 = vld [vmem:[#allocation2 + $0x1fe8] sm:$0xff] }
 0x38a   : > { %4132 = vmatpush.msrb.mxu3 %v1842_v55  ;;  %4197 = vmatpush.msra.mxu0 %v1971_v35  ;;  %v1619_v44 = vld [vmem:[#allocation2 + $0x10e0] sm:$0xff]  ;;  %v1460_v55 = vld [vmem:[#allocation2 + $0xbe8] sm:$0xff]  ;;  %v1589_v35 = vld [vmem:[#allocation2 + $0xff0] sm:$0xff] }
 0x38b   : > { %4331 = vmatpush.msra.mxu2 %v2101_v11  ;;  %4710 = vmatmul.msk.f32.gmra.mxu3 %vm2231_vm9, %v5181_v54  ;;  %v2068_v11 = vld [vmem:[#allocation2 + $0x1ee8] sm:$0xff] }
 0x38c   : > { %4711 = vmatmul.msk.f32.vlgmr.msrb.gmra.mxu0 %vm2231_vm9, %v5171_v19  ;;  %4189 = vmatmul.f32.gmra.mxu2 %v5147_v6 }
 0x38d   : > { %4110 = vmatpush.msrb.mxu1 %v1298_v56  ;;  %4133 = vmatpush.msrb.mxu3 %v1810_v40  ;;  %v3753_v56 = vpop.f32.mrf.mxu2  ;;  %v1717_v40 = vld [vmem:[#allocation2 + $0x13f0] sm:$0xff] }
 0x38e   : > { %4198 = vmatpush.msra.mxu0 %v1939_v30  ;;  %4332 = vmatpush.msra.mxu2 %v2069_v49  ;;  %v3684_v0 = vpop.f32.mrf.mxu1  ;;  %v1557_v49 = vld [vmem:[#allocation2 + $0xef0] sm:$0xff] }
 0x38f   : > { %4111 = vmatpush.msrb.mxu1 %v1266_v57  ;;  %4134 = vmatpush.msrb.mxu3 %v1778_v58  ;;  %v3685_v2 = vadd.f32 %v3684_v0, %v3662_v27  ;;  %v1685_v58 = vld [vmem:[#allocation2 + $0x12f0] sm:$0xff]  ;;  %v1364_v0 = vld [vmem:[#allocation2 + $0x8e8] sm:$0xff] }
 0x390   : > { %4199 = vmatpush.msra.mxu0 %v1907_v60  ;;  %4333 = vmatpush.msra.mxu2 %v2037_v24  ;;  %v1396_v60 = vld [vmem:[#allocation2 + $0x9e8] sm:$0xff]  ;;  %v1525_v27 = vld [vmem:[#allocation2 + $0xdf0] sm:$0xff] }
 0x391   : > { %4112 = vmatpush.msrb.mxu1 %v1234_v33  ;;  %4135 = vmatpush.msrb.mxu3 %v1746_v61  ;;  %4498 = vst [vmem:[%s5241_s19 + $0x1a0] sm:$0xff] %v3685_v2  ;;  %v2004_v33 = vld [vmem:[#allocation2 + $0x1ce8] sm:$0xff]  ;;  %v1653_v61 = vld [vmem:[#allocation2 + $0x11f0] sm:$0xff] }
 0x392   : > { %4200 = vmatpush.msra.mxu0 %v1875_v1  ;;  %4334 = vmatpush.msra.mxu2 %v2005_v14  ;;  %v1493_v14 = vld [vmem:[#allocation2 + $0xcf0] sm:$0xff]  ;;  %v1972_v2 = vld [vmem:[#allocation2 + $0x1be8] sm:$0xff] }
 0x393   : > { %4113 = vmatpush.msrb.mxu1 %v1202_v25  ;;  %4136 = vmatpush.msrb.mxu3 %v1714_v4  ;;  %v1621_v25 = vld [vmem:[#allocation2 + $0x10f0] sm:$0xff] }
 0x394   : > { %4201 = vmatpush.msra.mxu0 %v1843_v47  ;;  %4335 = vmatpush.msra.mxu2 %v1973_v8  ;;  %v1332_v47 = vld [vmem:[#allocation2 + $0x7e8] sm:$0xff] }
 0x395   : > { %4712 = vmatmul.msk.f32.gmra.mxu0 %vm2231_vm9, %v5181_v54  ;;  %4715 = vmatmul.msk.f32.vlgmr.msrb.gmra.mxu2 %vm2231_vm9, %v5171_v19  ;;  %v3796_v8 = vpop.f32.mrf.mxu2 }
 0x396   : > { %4114 = vmatpush.msrb.mxu1 %v1170_v52  ;;  %4137 = vmatpush.msrb.mxu3 %v1682_v37  ;;  %v1461_v52 = vld [vmem:[#allocation2 + $0xbf0] sm:$0xff]  ;;  %v1940_v37 = vld [vmem:[#allocation2 + $0x1ae8] sm:$0xff] }
 0x397   : > { %4202 = vmatpush.msra.mxu0 %v1811_v59  ;;  %4336 = vmatpush.msra.mxu2 %v1941_v12  ;;  %v1300_v59 = vld [vmem:[#allocation2 + $0x6e8] sm:$0xff] }
 0x398   : > { %4115 = vmatpush.msrb.mxu1 %v1138_v7  ;;  %4138 = vmatpush.msrb.mxu3 %v1650_v53  ;;  %v1429_v7 = vld [vmem:[#allocation2 + $0xaf0] sm:$0xff] }
 0x399   : > { %4203 = vmatpush.msra.mxu0 %v1779_v63  ;;  %4337 = vmatpush.msra.mxu2 %v1909_v15  ;;  %v1908_v63 = vld [vmem:[#allocation2 + $0x19e8] sm:$0xff] }
 0x39a   : > { %4116 = vmatpush.msrb.mxu1 %v1106_v22  ;;  %4139 = vmatpush.msrb.mxu3 %v1618_v26  ;;  %v1268_v15 = vld [vmem:[#allocation2 + $0x5e8] sm:$0xff]  ;;  %v1397_v26 = vld [vmem:[#allocation2 + $0x9f0] sm:$0xff] }
 0x39b   : > { %4204 = vmatpush.msra.mxu0 %v1747_v32  ;;  %4338 = vmatpush.msra.mxu2 %v1877_v46  ;;  %v1876_v32 = vld [vmem:[#allocation2 + $0x18e8] sm:$0xff] }
 0x39c   : > { %4117 = vmatmul.f32.vlgmr.msrb.gmra.mxu1 %v5130_v48  ;;  %4140 = vmatmul.f32.vlgmr.msrb.gmra.mxu3 %v5159_v10  ;;  %v3704_v3 = vpop.f32.mrf.mxu3  ;;  %v1236_v46 = vld [vmem:[#allocation2 + $0x4e8] sm:$0xff] }
 0x39d   : > { %4228 = vmatpush.msra.mxu1 %v2227_v9  ;;  %4239 = vmatpush.msra.mxu3 %v1588_v28  ;;  %v1365_v9 = vld [vmem:[#allocation2 + $0x8f0] sm:$0xff]  ;;  %v1844_v28 = vld [vmem:[#allocation2 + $0x17e8] sm:$0xff] }
 0x39e   : > { %4205 = vmatpush.msra.mxu0 %v1715_v29  ;;  %4339 = vmatpush.msra.mxu2 %v1845_v31  ;;  %v3727_v36 = vpop.f32.mrf.mxu1  ;;  %v1204_v29 = vld [vmem:[#allocation2 + $0x3e8] sm:$0xff]  ;;  %v1333_v31 = vld [vmem:[#allocation2 + $0x7f0] sm:$0xff] }
 0x39f   : > { %4229 = vmatpush.msra.mxu1 %v2195_v23  ;;  %4240 = vmatpush.msra.mxu3 %v1556_v39  ;;  %v3728_v45 = vadd.f32 %v3727_v36, %v3704_v3  ;;  %v1812_v23 = vld [vmem:[#allocation2 + $0x16e8] sm:$0xff]  ;;  %v3799_v39 = vpop.f32.mrf.mxu2 }
 0x3a0   : > { %4716 = vmatmul.msk.f32.gmra.mxu2 %vm2231_vm9, %v5181_v54  ;;  %4206 = vmatpush.msra.mxu0 %v1683_v51  ;;  %v1172_v3 = vld [vmem:[#allocation2 + $0x2e8] sm:$0xff]  ;;  %v1301_v51 = vld [vmem:[#allocation2 + $0x6f0] sm:$0xff] }
 0x3a1   : > { %4340 = vmatpush.msra.mxu2 %v1813_v18  ;;  %4230 = vmatpush.msra.mxu1 %v2163_v34  ;;  %v3751_v17 = vadd.f32 %v3750_v16, %v3728_v45  ;;  %v3773_v4 = vpop.f32.mrf.mxu0  ;;  %v1780_v18 = vld [vmem:[#allocation2 + $0x15e8] sm:$0xff] }
 0x3a2   : > { %4241 = vmatpush.msra.mxu3 %v1524_v62  ;;  %4207 = vmatpush.msra.mxu0 %v1651_v13  ;;  %v3797_v12 = vadd.f32 %v3796_v8, %v3773_v4  ;;  %v1140_v36 = vld [vmem:[#allocation2 + $0x1e8] sm:$0xff]  ;;  %v1269_v62 = vld [vmem:[#allocation2 + $0x5f0] sm:$0xff]  ;;  %v1462_v8 = vld [vmem:[#allocation2 + $0xbf8] sm:$0xff] }
 0x3a3   : > { %4341 = vmatpush.msra.mxu2 %v1781_v43  ;;  %4231 = vmatpush.msra.mxu1 %v2131_v41  ;;  %4467 = vst [vmem:[%s5241_s19 + $0xa8] sm:$0xff] %v3751_v17  ;;  %v1748_v45 = vld [vmem:[#allocation2 + $0x14e8] sm:$0xff]  ;;  %v2229_v17 = vld [vmem:[#allocation2 + $0x23f0] sm:$0xff] }
 0x3a4   : > { %4242 = vmatpush.msra.mxu3 %v1492_v42  ;;  %4208 = vmatpush.msra.mxu0 %v1619_v44  ;;  %v1108_v41 = vld [vmem:[#allocation2 + $0xe8] sm:$0xff]  ;;  %v1237_v42 = vld [vmem:[#allocation2 + $0x4f0] sm:$0xff] }
 0x3a5   : > { %4262 = vmatpush.msrb.mxu1 %v2100_v20  ;;  %4342 = vmatpush.msra.mxu2 %v1749_v50  ;;  %v1716_v44 = vld [vmem:[#allocation2 + $0x13e8] sm:$0xff]  ;;  %v1205_v20 = vld [vmem:[#allocation2 + $0x3f0] sm:$0xff] }
 0x3a6   : > { %4120 = vmatmul.f32.gmra.mxu1 %v5147_v6  ;;  %4143 = vmatmul.f32.gmra.mxu3 %v5168_v38  ;;  %v3707_v30 = vpop.f32.mrf.mxu3  ;;  %v1684_v50 = vld [vmem:[#allocation2 + $0x12e8] sm:$0xff] }
 0x3a7   : > { %4209 = vmatmul.f32.vlgmr.msra.gmra.mxu0 %v5159_v10  ;;  %4243 = vmatpush.msra.mxu3 %v1460_v55  ;;  %v3730_v57 = vpop.f32.mrf.mxu1  ;;  %v2197_v55 = vld [vmem:[#allocation2 + $0x22f0] sm:$0xff] }
 0x3a8   : > { %4308 = vmatpush.msrb.mxu0 %v1589_v35  ;;  %4263 = vmatpush.msrb.mxu1 %v2068_v11  ;;  %v3731_v24 = vadd.f32 %v3730_v57, %v3707_v30  ;;  %v1173_v35 = vld [vmem:[#allocation2 + $0x2f0] sm:$0xff]  ;;  %v1652_v11 = vld [vmem:[#allocation2 + $0x11e8] sm:$0xff]  ;;  %v1590_v57 = vld [vmem:[#allocation2 + $0xff8] sm:$0xff] }
 0x3a9   : > { %4343 = vmatpush.msra.mxu2 %v1717_v40  ;;  %4244 = vmatpush.msra.mxu3 %v1428_v21  ;;  %v1141_v40 = vld [vmem:[#allocation2 + $0x1f0] sm:$0xff]  ;;  %v1620_v30 = vld [vmem:[#allocation2 + $0x10e8] sm:$0xff] }
 0x3aa   : > { %4309 = vmatpush.msrb.mxu0 %v1557_v49  ;;  %4264 = vmatpush.msrb.mxu1 %v2036_v5  ;;  %v3754_v1 = vadd.f32 %v3753_v56, %v3731_v24  ;;  %v2165_v56 = vld [vmem:[#allocation2 + $0x21f0] sm:$0xff]  ;;  %v1558_v24 = vld [vmem:[#allocation2 + $0xef8] sm:$0xff] }
 0x3ab   : > { %4344 = vmatpush.msra.mxu2 %v1685_v58  ;;  %4245 = vmatpush.msra.mxu3 %v1396_v60  ;;  %v3776_v16 = vpop.f32.mrf.mxu0  ;;  %v2133_v49 = vld [vmem:[#allocation2 + $0x20f0] sm:$0xff]  ;;  %v2102_v60 = vld [vmem:[#allocation2 + $0x1ff8] sm:$0xff] }
 0x3ac   : > { %4310 = vmatpush.msrb.mxu0 %v1525_v27  ;;  %4265 = vmatpush.msrb.mxu1 %v2004_v33  ;;  %4499 = vst [vmem:[%s5241_s19 + $0x1a8] sm:$0xff] %v3754_v1  ;;  %v3800_v34 = vadd.f32 %v3799_v39, %v3776_v16  ;;  %v1109_v5 = vld [vmem:[#allocation2 + $0xf0] sm:$0xff]  ;;  %v2070_v27 = vld [vmem:[#allocation2 + $0x1ef8] sm:$0xff] }
 0x3ad   : > { %4345 = vmatpush.msra.mxu2 %v1653_v61  ;;  %4246 = vmatpush.msra.mxu3 %v1364_v0  ;;  %v2230_v33 = vld [vmem:[#allocation2 + $0x23f8] sm:$0xff] }
 0x3ae   : > { %4311 = vmatpush.msrb.mxu0 %v1493_v14  ;;  %4266 = vmatpush.msrb.mxu1 %v1972_v2  ;;  %v1526_v61 = vld [vmem:[#allocation2 + $0xdf8] sm:$0xff] }
 0x3af   : > { %4346 = vmatpush.msra.mxu2 %v1621_v25  ;;  %4212 = vmatmul.f32.gmra.mxu0 %v5168_v38  ;;  %v2038_v0 = vld [vmem:[#allocation2 + $0x1df8] sm:$0xff] }
 0x3b0   : > { %4713 = vmatmul.msk.f32.vlgmr.msra.gmra.mxu1 %vm2231_vm9, %v5171_v19  ;;  %4247 = vmatpush.msra.mxu3 %v1332_v47  ;;  %v3819_v53 = vpop.f32.mrf.mxu3  ;;  %v2198_v1 = vld [vmem:[#allocation2 + $0x22f8] sm:$0xff] }
 0x3b1   : > { %4312 = vmatpush.msrb.mxu0 %v1461_v52  ;;  %4347 = vmatmul.f32.vlgmr.msra.gmra.mxu2 %v5159_v10  ;;  %v3820_v22 = vadd.f32 %v3819_v53, %v3797_v12  ;;  %v1494_v14 = vld [vmem:[#allocation2 + $0xcf8] sm:$0xff] }
 0x3b2   : > { %4267 = vmatpush.msrb.mxu1 %v1940_v37  ;;  %4248 = vmatpush.msra.mxu3 %v1300_v59  ;;  %v2006_v25 = vld [vmem:[#allocation2 + $0x1cf8] sm:$0xff] }
 0x3b3   : > { %4313 = vmatpush.msrb.mxu0 %v1429_v7  ;;  %4468 = vst [vmem:[%s5241_s19 + $0xb0] sm:$0xff] %v3820_v22  ;;  %v2166_v52 = vld [vmem:[#allocation2 + $0x21f8] sm:$0xff] }
 0x3b4   : > { %4268 = vmatpush.msrb.mxu1 %v1908_v63  ;;  %4249 = vmatpush.msra.mxu3 %v1268_v15  ;;  %v1974_v37 = vld [vmem:[#allocation2 + $0x1bf8] sm:$0xff] }
 0x3b5   : > { %4314 = vmatpush.msrb.mxu0 %v1397_v26  ;;  %v3888_v21 = vpop.f32.mrf.mxu0  ;;  %v1430_v12 = vld [vmem:[#allocation2 + $0xaf8] sm:$0xff] }
 0x3b6   : > { %4269 = vmatpush.msrb.mxu1 %v1876_v32  ;;  %4250 = vmatpush.msra.mxu3 %v1236_v46  ;;  %v1942_v53 = vld [vmem:[#allocation2 + $0x1af8] sm:$0xff] }
 0x3b7   : > { %4315 = vmatpush.msrb.mxu0 %v1365_v9  ;;  %v2134_v63 = vld [vmem:[#allocation2 + $0x20f8] sm:$0xff] }
 0x3b8   : > { %4270 = vmatpush.msrb.mxu1 %v1844_v28  ;;  %4251 = vmatpush.msra.mxu3 %v1204_v29  ;;  %v1398_v15 = vld [vmem:[#allocation2 + $0x9f8] sm:$0xff]  ;;  %v3911_v29 = vpop.f32.mrf.mxu2 }
 0x3b9   : > { %4714 = vmatmul.msk.f32.gmra.mxu1 %vm2231_vm9, %v5181_v54  ;;  %4316 = vmatpush.msrb.mxu0 %v1333_v31  ;;  %v1910_v22 = vld [vmem:[#allocation2 + $0x19f8] sm:$0xff] }
 0x3ba   : > { %4350 = vmatmul.f32.gmra.mxu2 %v5168_v38  ;;  %4271 = vmatpush.msrb.mxu1 %v1812_v23  ;;  %v3822_v13 = vpop.f32.mrf.mxu3  ;;  %v1366_v26 = vld [vmem:[#allocation2 + $0x8f8] sm:$0xff] }
 0x3bb   : > { %4252 = vmatpush.msra.mxu3 %v1172_v3  ;;  %4317 = vmatpush.msrb.mxu0 %v1301_v51  ;;  %v3823_v43 = vadd.f32 %v3822_v13, %v3800_v34  ;;  %v1878_v32 = vld [vmem:[#allocation2 + $0x18f8] sm:$0xff] }
 0x3bc   : > { %4272 = vmatpush.msrb.mxu1 %v1780_v18  ;;  %v1334_v9 = vld [vmem:[#allocation2 + $0x7f8] sm:$0xff] }
 0x3bd   : > { %4253 = vmatpush.msra.mxu3 %v1140_v36  ;;  %4318 = vmatpush.msrb.mxu0 %v1269_v62  ;;  %4500 = vst [vmem:[%s5241_s19 + $0x1b0] sm:$0xff] %v3823_v43  ;;  %v1846_v31 = vld [vmem:[#allocation2 + $0x17f8] sm:$0xff] }
 0x3be   : > { %4273 = vmatpush.msrb.mxu1 %v1748_v45  ;;  %v3891_v4 = vpop.f32.mrf.mxu0  ;;  %v1302_v23 = vld [vmem:[#allocation2 + $0x6f8] sm:$0xff] }
 0x3bf   : > { %4254 = vmatpush.msra.mxu3 %v1108_v41  ;;  %4319 = vmatpush.msrb.mxu0 %v1237_v42  ;;  %v1814_v39 = vld [vmem:[#allocation2 + $0x16f8] sm:$0xff] }
 0x3c0   : > { %4255 = vmatmul.f32.vlgmr.msra.gmra.mxu3 %v5130_v48  ;;  %4274 = vmatpush.msrb.mxu1 %v1716_v44  ;;  %v1270_v18 = vld [vmem:[#allocation2 + $0x5f8] sm:$0xff]  ;;  %v3914_v44 = vpop.f32.mrf.mxu2 }
 0x3c1   : > { %4366 = vmatpush.msrb.mxu3 %v2229_v17  ;;  %4320 = vmatpush.msrb.mxu0 %v1205_v20  ;;  %v1782_v36 = vld [vmem:[#allocation2 + $0x15f8] sm:$0xff] }
 0x3c2   : > { %4275 = vmatpush.msrb.mxu1 %v1684_v50  ;;  %v1238_v13 = vld [vmem:[#allocation2 + $0x4f8] sm:$0xff] }
 0x3c3   : > { %4367 = vmatpush.msrb.mxu3 %v2197_v55  ;;  %4321 = vmatpush.msrb.mxu0 %v1173_v35  ;;  %v1750_v45 = vld [vmem:[#allocation2 + $0x14f8] sm:$0xff] }
 0x3c4   : > { %4276 = vmatpush.msrb.mxu1 %v1652_v11  ;;  %v1206_v43 = vld [vmem:[#allocation2 + $0x3f8] sm:$0xff] }
 0x3c5   : > { %4368 = vmatpush.msrb.mxu3 %v2165_v56  ;;  %4322 = vmatpush.msrb.mxu0 %v1141_v40  ;;  %v3842_v58 = vpop.f32.mrf.mxu1  ;;  %v1718_v41 = vld [vmem:[#allocation2 + $0x13f8] sm:$0xff] }
 0x3c6   : > { %4277 = vmatpush.msrb.mxu1 %v1620_v30  ;;  %v1686_v17 = vld [vmem:[#allocation2 + $0x12f8] sm:$0xff] }
 0x3c7   : > { %4369 = vmatpush.msrb.mxu3 %v2133_v49  ;;  %4278 = vmatmul.f32.vlgmr.msrb.gmra.mxu1 %v5159_v10  ;;  %v1142_v20 = vld [vmem:[#allocation2 + $0x1f8] sm:$0xff] }
 0x3c8   : > { %4323 = vmatpush.msrb.mxu0 %v1109_v5  ;;  %4377 = vmatpush.msra.mxu1 %v1590_v57  ;;  %v1654_v55 = vld [vmem:[#allocation2 + $0x11f8] sm:$0xff] }
 0x3c9   : > { %4400 = vmatpush.msra.mxu3 %v2102_v60  ;;  %4324 = vmatmul.f32.vlgmr.msrb.gmra.mxu0 %v5130_v48  ;;  %v1110_v11 = vld [vmem:[#allocation2 + $0xf8] sm:$0xff] }
 0x3ca   : > { %4258 = vmatmul.f32.gmra.mxu3 %v5147_v6  ;;  %4378 = vmatpush.msra.mxu1 %v1558_v24  ;;  %v1622_v40 = vld [vmem:[#allocation2 + $0x10f8] sm:$0xff] }
 0x3cb   : > { %4401 = vmatpush.msra.mxu3 %v2070_v27  ;;  %4435 = vmatpush.msra.mxu0 %v2230_v33  ;;  %v3865_v2 = vpop.f32.mrf.mxu3 }
 0x3cc   : > { %4379 = vmatpush.msra.mxu1 %v1526_v61  ;;  %v3866_v47 = vadd.f32 %v3865_v2, %v3842_v58 }
 0x3cd   : > { %4402 = vmatpush.msra.mxu3 %v2038_v0  ;;  %4436 = vmatpush.msra.mxu0 %v2198_v1 }
 0x3ce   : > { %4380 = vmatpush.msra.mxu1 %v1494_v14  ;;  %v3889_v59 = vadd.f32 %v3888_v21, %v3866_v47 }
 0x3cf   : > { %4403 = vmatpush.msra.mxu3 %v2006_v25  ;;  %4281 = vmatmul.f32.gmra.mxu1 %v5168_v38  ;;  %v3845_v7 = vpop.f32.mrf.mxu1 }
 0x3d0   : > { %4381 = vmatpush.msra.mxu1 %v1462_v8  ;;  %4437 = vmatpush.msra.mxu0 %v2166_v52  ;;  %4469 = vst [vmem:[%s5241_s19 + $0xb8] sm:$0xff] %v3889_v59  ;;  %v3934_v46 = vpop.f32.mrf.mxu0 }
 0x3d1   : > { %4404 = vmatpush.msra.mxu3 %v1974_v37  ;;  %4327 = vmatmul.f32.gmra.mxu0 %v5147_v6  ;;  %v3935_v3 = vadd.f32 %v3934_v46, %v3911_v29 }
 0x3d2   : > { %4717 = vmatmul.msk.f32.vlgmr.msrb.gmra.mxu3 %vm2231_vm9, %v5171_v19  ;;  %4382 = vmatpush.msra.mxu1 %v1430_v12 }
 0x3d3   : > { %4405 = vmatpush.msra.mxu3 %v1942_v53  ;;  %4438 = vmatpush.msra.mxu0 %v2134_v63 }
 0x3d4   : > { %4383 = vmatpush.msra.mxu1 %v1398_v15 }
 0x3d5   : > { %4406 = vmatpush.msra.mxu3 %v1910_v22  ;;  %v3868_v28 = vpop.f32.mrf.mxu3 }
 0x3d6   : > { %4384 = vmatpush.msra.mxu1 %v1366_v26  ;;  %v3869_v16 = vadd.f32 %v3868_v28, %v3845_v7 }
 0x3d7   : > { %4407 = vmatpush.msra.mxu3 %v1878_v32 }
 0x3d8   : > { %4385 = vmatpush.msra.mxu1 %v1334_v9  ;;  %v3892_v51 = vadd.f32 %v3891_v4, %v3869_v16  ;;  %v3937_v42 = vpop.f32.mrf.mxu0 }
 0x3d9   : > { %4408 = vmatpush.msra.mxu3 %v1846_v31  ;;  %4719 = vmatmul.msk.f32.vlgmr.msra.gmra.mxu0 %vm2231_vm9, %v5171_v19  ;;  %v3957_v34 = vpop.f32.mrf.mxu1  ;;  %v1174_v19 = vld [vmem:[#allocation2 + $0x2f8] sm:$0xff]  ;;  %v3938_v50 = vadd.f32 %v3937_v42, %v3914_v44 }
 0x3da   : > { %4718 = vmatmul.msk.f32.gmra.mxu3 %vm2231_vm9, %v5181_v54  ;;  %4386 = vmatpush.msra.mxu1 %v1302_v23  ;;  %4501 = vst [vmem:[%s5241_s19 + $0x1b8] sm:$0xff] %v3892_v51  ;;  %v3958_v62 = vadd.f32 %v3957_v34, %v3935_v3 }
 0x3db   : > { %4409 = vmatpush.msra.mxu3 %v1814_v39 }
 0x3dc   : > { %4387 = vmatpush.msra.mxu1 %v1270_v18  ;;  %4470 = vst [vmem:[%s5241_s19 + $0xc0] sm:$0xff] %v3958_v62 }
 0x3dd   : > { %4410 = vmatpush.msra.mxu3 %v1782_v36 }
 0x3de   : > { %4388 = vmatpush.msra.mxu1 %v1238_v13 }
 0x3df   : > { %4411 = vmatpush.msra.mxu3 %v1750_v45 }
 0x3e0   : > { %4389 = vmatpush.msra.mxu1 %v1206_v43 }
 0x3e1   : > { %4412 = vmatpush.msra.mxu3 %v1718_v41  ;;  %4720 = vmatmul.msk.f32.gmra.mxu0 %vm2231_vm9, %v5181_v54  ;;  %v4026_v54 = vpop.f32.mrf.mxu2 }
 0x3e2   : > { %4390 = vmatpush.msra.mxu1 %v1174_v19  ;;  %v3960_v35 = vpop.f32.mrf.mxu1 }
 0x3e3   : > { %4413 = vmatpush.msra.mxu3 %v1686_v17  ;;  %v3961_v56 = vadd.f32 %v3960_v35, %v3938_v50 }
 0x3e4   : > { %4391 = vmatpush.msra.mxu1 %v1142_v20 }
 0x3e5   : > { %4414 = vmatpush.msra.mxu3 %v1654_v55  ;;  %4502 = vst [vmem:[%s5241_s19 + $0x1c0] sm:$0xff] %v3961_v56 }
 0x3e6   : > { %4392 = vmatpush.msra.mxu1 %v1110_v11 }
 0x3e7   : > { %4415 = vmatpush.msra.mxu3 %v1622_v40  ;;  %4393 = vmatmul.f32.vlgmr.msra.gmra.mxu1 %v5130_v48 }
 0x3e8   : > { %4416 = vmatmul.f32.vlgmr.msra.gmra.mxu3 %v5159_v10 }
 0x3e9   : > { %v4029_v57 = vpop.f32.mrf.mxu2 }
 0x3ef   : > { %4396 = vmatmul.f32.gmra.mxu1 %v5147_v6 }
 0x3f0   : > { %4419 = vmatmul.f32.gmra.mxu3 %v5168_v38  ;;  %v3980_v21 = vpop.f32.mrf.mxu3 }
 0x3f1   : > { %v4072_v10 = vpop.f32.mrf.mxu2 }
 0x3f2   : > { %v4003_v30 = vpop.f32.mrf.mxu1 }
 0x3f3   : > { %v4004_v49 = vadd.f32 %v4003_v30, %v3980_v21 }
 0x3f5   : > { %v4027_v5 = vadd.f32 %v4026_v54, %v4004_v49  ;;  %v4049_v27 = vpop.f32.mrf.mxu0 }
 0x3f6   : > { %v4073_v33 = vadd.f32 %v4072_v10, %v4049_v27 }
 0x3f7   : > { %4471 = vst [vmem:[%s5241_s19 + $0xc8] sm:$0xff] %v4027_v5 }
 0x3f9   : > { %v4075_v0 = vpop.f32.mrf.mxu2 }
 0x3fa   : > { %v3983_v58 = vpop.f32.mrf.mxu3 }
 0x3fb   : > { %v4006_v60 = vpop.f32.mrf.mxu1 }
 0x3fc   : > { %v4007_v24 = vadd.f32 %v4006_v60, %v3983_v58 }
 0x3fe   : > { %v4030_v48 = vadd.f32 %v4029_v57, %v4007_v24 }
 0x3ff   : > { %v4052_v38 = vpop.f32.mrf.mxu0 }
 0x400   : > { %4503 = vst [vmem:[%s5241_s19 + $0x1c8] sm:$0xff] %v4030_v48  ;;  %v4076_v1 = vadd.f32 %v4075_v0, %v4052_v38 }
 0x404   : > { %v4095_v6 = vpop.f32.mrf.mxu3 }
 0x405   : > { %v4096_v61 = vadd.f32 %v4095_v6, %v4073_v33  ;;  %v4187_v53 = vpop.f32.mrf.mxu2 }
 0x407   : > { %4472 = vst [vmem:[%s5241_s19 + $0xd0] sm:$0xff] %v4096_v61 }
 0x409   : > { %v4164_v25 = vpop.f32.mrf.mxu0 }
 0x40e   : > { %v4098_v14 = vpop.f32.mrf.mxu3 }
 0x40f   : > { %v4099_v2 = vadd.f32 %v4098_v14, %v4076_v1  ;;  %v4190_v9 = vpop.f32.mrf.mxu2 }
 0x411   : > { %4504 = vst [vmem:[%s5241_s19 + $0x1d0] sm:$0xff] %v4099_v2 }
 0x412   : > { %v4167_v8 = vpop.f32.mrf.mxu0 }
 0x418   : > { %v4302_v16 = vpop.f32.mrf.mxu2 }
 0x419   : > { %v4118_v4 = vpop.f32.mrf.mxu1 }
 0x41f   : > { %v4141_v47 = vpop.f32.mrf.mxu3 }
 0x420   : > { %v4142_v52 = vadd.f32 %v4141_v47, %v4118_v4 }
 0x422   : > { %v4165_v37 = vadd.f32 %v4164_v25, %v4142_v52 }
 0x423   : > { %v4121_v59 = vpop.f32.mrf.mxu1  ;;  %v4305_v18 = vpop.f32.mrf.mxu2 }
 0x424   : > { %4473 = vst [vmem:[%s5241_s19 + $0xd8] sm:$0xff] %v4165_v37  ;;  %v4210_v12 = vpop.f32.mrf.mxu0 }
 0x425   : > { %v4211_v15 = vadd.f32 %v4210_v12, %v4187_v53 }
 0x429   : > { %v4144_v7 = vpop.f32.mrf.mxu3 }
 0x42a   : > { %v4145_v63 = vadd.f32 %v4144_v7, %v4121_v59 }
 0x42c   : > { %v4168_v22 = vadd.f32 %v4167_v8, %v4145_v63  ;;  %v4213_v46 = vpop.f32.mrf.mxu0 }
 0x42d   : > { %v4233_v26 = vpop.f32.mrf.mxu1  ;;  %v4214_v28 = vadd.f32 %v4213_v46, %v4190_v9 }
 0x42e   : > { %4505 = vst [vmem:[%s5241_s19 + $0x1d8] sm:$0xff] %v4168_v22  ;;  %v4234_v32 = vadd.f32 %v4233_v26, %v4211_v15 }
 0x430   : > { %4474 = vst [vmem:[%s5241_s19 + $0xe0] sm:$0xff] %v4234_v32 }
 0x434   : > { %v4348_v43 = vpop.f32.mrf.mxu2 }
 0x436   : > { %v4236_v29 = vpop.f32.mrf.mxu1 }
 0x437   : > { %v4237_v31 = vadd.f32 %v4236_v29, %v4214_v28 }
 0x439   : > { %4506 = vst [vmem:[%s5241_s19 + $0x1e0] sm:$0xff] %v4237_v31 }
 0x43d   : > { %v4351_v17 = vpop.f32.mrf.mxu2 }
 0x443   : > { %v4256_v23 = vpop.f32.mrf.mxu3 }
 0x444   : > { %v4279_v39 = vpop.f32.mrf.mxu1 }
 0x445   : > { %v4280_v3 = vadd.f32 %v4279_v39, %v4256_v23 }
 0x446   : > { %v4325_v13 = vpop.f32.mrf.mxu0 }
 0x447   : > { %v4303_v51 = vadd.f32 %v4302_v16, %v4280_v3  ;;  %v4349_v41 = vadd.f32 %v4348_v43, %v4325_v13 }
 0x449   : > { %4475 = vst [vmem:[%s5241_s19 + $0xe8] sm:$0xff] %v4303_v51 }
 0x44c   : > { %v4282_v34 = vpop.f32.mrf.mxu1 }
 0x44d   : > { %v4259_v36 = vpop.f32.mrf.mxu3 }
 0x44e   : > { %v4283_v62 = vadd.f32 %v4282_v34, %v4259_v36  ;;  %v4328_v44 = vpop.f32.mrf.mxu0 }
 0x44f   : > { %v4352_v20 = vadd.f32 %v4351_v17, %v4328_v44 }
 0x450   : > { %v4306_v45 = vadd.f32 %v4305_v18, %v4283_v62 }
 0x452   : > { %4507 = vst [vmem:[%s5241_s19 + $0x1e8] sm:$0xff] %v4306_v45 }
 0x455   : > { %v4371_v42 = vpop.f32.mrf.mxu3 }
 0x456   : > { %v4372_v19 = vadd.f32 %v4371_v42, %v4349_v41  ;;  %v4440_v11 = vpop.f32.mrf.mxu0 }
 0x458   : > { %4476 = vst [vmem:[%s5241_s19 + $0xf0] sm:$0xff] %v4372_v19 }
 0x45d   : > { %v4374_v50 = vpop.f32.mrf.mxu3 }
 0x45e   : > { %v4375_v55 = vadd.f32 %v4374_v50, %v4352_v20  ;;  %v4443_v5 = vpop.f32.mrf.mxu0 }
 0x460   : > { %4508 = vst [vmem:[%s5241_s19 + $0x1f0] sm:$0xff] %v4375_v55 }
 0x464   : > { %v4394_v35 = vpop.f32.mrf.mxu1 }
 0x46b   : > { %v4417_v56 = vpop.f32.mrf.mxu3 }
 0x46c   : > { %v4418_v40 = vadd.f32 %v4417_v56, %v4394_v35  ;;  %v4397_v21 = vpop.f32.mrf.mxu1 }
 0x46e   : > { %v4441_v54 = vadd.f32 %v4440_v11, %v4418_v40 }
 0x470   : > { %4477 = vst [vmem:[%s5241_s19 + $0xf8] sm:$0xff] %v4441_v54 }
 0x473   : > { %v4420_v30 = vpop.f32.mrf.mxu3 }
 0x474   : > { %v4421_v49 = vadd.f32 %v4420_v30, %v4397_v21 }
 0x476   : > { %v4444_v57 = vadd.f32 %v4443_v5, %v4421_v49 }
 0x478   : > { %4509 = vst [vmem:[%s5241_s19 + $0x1f8] sm:$0xff] %v4444_v57 }
 0x479 PF: > { %s15_s15 = sadd.s32 1, %s4839_s15  }
 0x47a   : > { %p12_p7 = scmp.ge.s32.totalorder %s15_s15, 4  }
 0x47c   :  { %14 = sbr.rel (!%p12_p7) target bundleno = 1 (0x1), region = 79 }
 0x481   :  { %4531 = vsyncpa [#allocation3], 1 }
 0x482   :  { %4533 = vsyncpa [#allocation3 + $0x1], 1 }

</bundles_post_ra>
